<compile_context>
chip_gen: v7x
topology: tpu7x:2x2x1
jax: 0.10.0
libtpu: 0.0.40
codegen_flags: <defaults>
</compile_context>

<pallas_src>
import jax
import jax.numpy as jnp
from jax.experimental import pallas as pl
from jax.experimental.pallas import tpu as pltpu

IN_DIM = 2
HL1 = 1024
HL2 = 1024
HL3 = 1024          # folded into layer 4 inside the kernel (no activation between 3 & 4)
OUT_DIM = 6
OUT_PAD = 128       # lane-dense padded output width
DEFAULT_BATCH_TILE = 512


def _mlp_kernel(x_ref,
                w1_ref, b1_ref,
                w2_ref, b2_ref,
                w34_ref, b34_ref,
                o_ref):
    x = x_ref[...]                                       # (TB, 2); input scaling folded into W1

    # Layer 1: K=2 contraction -> two broadcast FMAs on the VPU.
    h1 = x[:, 0:1] * w1_ref[0:1, :] + x[:, 1:2] * w1_ref[1:2, :] + b1_ref[...]
    h1 = jnp.maximum(h1, 0.0)                            # relu

    # Layer 2 on the MXU + relu.
    h2 = jnp.dot(h1, w2_ref[...], preferred_element_type=jnp.float32) + b2_ref[...]
    h2 = jnp.maximum(h2, 0.0)                            # relu

    # Layers 3 + 4 folded into one linear map (no nonlinearity between them).
    y = jnp.dot(h2, w34_ref[...], preferred_element_type=jnp.float32) + b34_ref[...]
    o_ref[...] = y.astype(o_ref.dtype)                   # (TB, 128) lane-dense store


def _round_up(a, m):
    return (a + m - 1) // m * m


def _build_call(bp, tb, semantics, cost):
    const = lambda shape: pl.BlockSpec(shape, lambda i: (0, 0))   # constant block -> no re-DMA
    return pl.pallas_call(
        _mlp_kernel,
        out_shape=jax.ShapeDtypeStruct((bp, OUT_PAD), jnp.float32),
        grid_spec=pltpu.PrefetchScalarGridSpec(
            num_scalar_prefetch=0,
            grid=(bp // tb,),
            in_specs=[
                pl.BlockSpec((tb, IN_DIM), lambda i: (i, 0)),     # x (batch-tiled)
                const((IN_DIM, HL1)),  const((1, HL1)),           # W1 (pre-scaled), b1
                const((HL1, HL2)),     const((1, HL2)),           # W2, b2
                const((HL2, OUT_PAD)), const((1, OUT_PAD)),       # W3@W4 (padded), b3@W4+b4 (padded)
            ],
            out_specs=pl.BlockSpec((tb, OUT_PAD), lambda i: (i, 0)),
        ),
        compiler_params=pltpu.CompilerParams(
            dimension_semantics=semantics,
            vmem_limit_bytes=32 << 20,   # kernel footprint ~14 MiB; fits v5e/v6e/v7x
        ),
        cost_estimate=cost,
    )


def prop_apc0_forward(x, params, *, batch_tile=None):
    """Pallas forward pass for PropAPC0.

    x      : (B, 2) or (2,) array (cast to f32)
    params : dict with w1,b1,w2,b2,w3,b3,w4,b4 (weights (in,out), biases (1,out))
    """
    x = jnp.asarray(x, jnp.float32)
    if x.ndim == 1:
        x = x.reshape(1, x.shape[0])
    B = x.shape[0]

    # Batch tiling: pad B up to a multiple of the tile (multiple of 8).
    if batch_tile is None:
        tb = DEFAULT_BATCH_TILE if B >= DEFAULT_BATCH_TILE else _round_up(B, 8)
    else:
        tb = batch_tile
    assert tb % 8 == 0, "batch_tile must be a multiple of 8"
    Bp = _round_up(B, tb)
    if Bp != B:
        x = jnp.pad(x, ((0, Bp - B), (0, 0)))

    hi = jax.lax.Precision.HIGHEST

    # Fold the input scaling (1/36000, 1/200) into W1 (diagonal on contraction dim).
    scale_col = jnp.array([[1.0 / 36000.0], [1.0 / 200.0]], dtype=jnp.float32)   # (2, 1)
    w1 = params["w1"] * scale_col
    b1 = params["b1"]
    w2, b2 = params["w2"], params["b2"]

    # Fold linear4 ∘ linear3 into one linear map (mathematically identical: no
    # activation between them), then zero-pad the 6-wide output to 128 lanes.
    w34 = jnp.dot(params["w3"], params["w4"], precision=hi)           # (1024, 6)
    b34 = jnp.dot(params["b3"], params["w4"], precision=hi) + params["b4"]
    w34 = jnp.pad(w34, ((0, 0), (0, OUT_PAD - OUT_DIM)))
    b34 = jnp.pad(b34, ((0, 0), (0, OUT_PAD - OUT_DIM)))

    # Only mark the batch axis parallel when the batch is large enough to
    # amortize per-core weight duplication (v7x has two TensorCores).
    semantics = ("parallel",) if Bp >= 2048 else ("arbitrary",)

    flops = 2 * Bp * (IN_DIM * HL1 + HL1 * HL2 + HL2 * OUT_PAD)
    bytes_accessed = 4 * (Bp * IN_DIM + w1.size + b1.size + w2.size + b2.size
                          + w34.size + b34.size + Bp * OUT_PAD)
    cost = pl.CostEstimate(flops=flops, transcendentals=0,
                           bytes_accessed=bytes_accessed)

    y = _build_call(Bp, tb, semantics, cost)(x, w1, b1, w2, b2, w34, b34)
    return y[:B, :OUT_DIM]


def init_params(key):
    """Deterministic synthetic parameters (same shapes/init style as the torch module)."""
    ks = jax.random.split(key, 8)

    def lin(kw, kb, fan_in, fan_out):
        bound = 1.0 / jnp.sqrt(float(fan_in))
        w = jax.random.uniform(kw, (fan_in, fan_out), jnp.float32, -bound, bound)
        b = jax.random.uniform(kb, (1, fan_out), jnp.float32, -bound, bound)
        return w, b

    w1, b1 = lin(ks[0], ks[1], IN_DIM, HL1)
    w2, b2 = lin(ks[2], ks[3], HL1, HL2)
    w3, b3 = lin(ks[4], ks[5], HL2, HL3)
    w4, b4 = lin(ks[6], ks[7], HL3, OUT_DIM)
    return dict(w1=w1, b1=b1, w2=w2, b2=b2, w3=w3, b3=b3, w4=w4, b4=b4)


def _reference(x, p):
    """Faithful (unfused) JAX mirror of the torch module's forward."""
    x = jnp.asarray(x, jnp.float32)
    if x.ndim == 1:
        x = x.reshape(1, -1)
    x = x * jnp.array([[1.0 / 36000.0, 1.0 / 200.0]], jnp.float32)
    h = jnp.maximum(x @ p["w1"] + p["b1"], 0.0)
    h = jnp.maximum(h @ p["w2"] + p["b2"], 0.0)
    h = h @ p["w3"] + p["b3"]
    return h @ p["w4"] + p["b4"]


if __name__ == "__main__":
    key = jax.random.PRNGKey(0)
    kp, kx = jax.random.split(key)
    params = init_params(kp)

    # Tolerances allow for MXU default-precision passes and the (mathematically
    # exact) W3@W4 reassociation vs the unfused XLA reference.
    RTOL, ATOL = 2e-3, 2e-3

    B = 8
    # Inputs in the rough magnitude the scaling implies (time-of-day, speed).
    x = jax.random.uniform(kx, (B, IN_DIM), jnp.float32) * jnp.array([36000.0, 200.0])

    y = jax.block_until_ready(prop_apc0_forward(x, params))
    y_ref = _reference(x, params)
    assert y.shape == (B, OUT_DIM)
    assert jnp.allclose(y, y_ref, rtol=RTOL, atol=ATOL), "mismatch vs reference (2-D)"

    # 1-D input path (module reshapes (2,) -> (1, 2)); also exercises padding.
    y1 = jax.block_until_ready(prop_apc0_forward(x[0], params))
    assert y1.shape == (1, OUT_DIM)
    assert jnp.allclose(y1, y_ref[:1], rtol=RTOL, atol=ATOL), "mismatch vs reference (1-D)"

    # Multi-tile grid + batch padding path (grid of 3 steps over batch).
    B2 = 260
    x2 = jax.random.uniform(jax.random.PRNGKey(1), (B2, IN_DIM), jnp.float32) \
         * jnp.array([36000.0, 200.0])
    y2 = jax.block_until_ready(prop_apc0_forward(x2, params, batch_tile=128))
    y2_ref = _reference(x2, params)
    assert y2.shape == (B2, OUT_DIM)
    assert jnp.allclose(y2, y2_ref, rtol=RTOL, atol=ATOL), "mismatch vs reference (tiled)"

    print("KERNEL_OK")
</pallas_src>

<mosaic_0001>
module attributes {stable_mosaic.version = 11 : i64} {
  func.func @_mlp_kernel(%arg0: i32, %arg1: memref<8x2xf32, #tpu.memory_space<vmem>>, %arg2: memref<2x1024xf32, #tpu.memory_space<vmem>>, %arg3: memref<1x1024xf32, #tpu.memory_space<vmem>>, %arg4: memref<1024x1024xf32, #tpu.memory_space<vmem>>, %arg5: memref<1x1024xf32, #tpu.memory_space<vmem>>, %arg6: memref<1024x128xf32, #tpu.memory_space<vmem>>, %arg7: memref<1x128xf32, #tpu.memory_space<vmem>>, %arg8: memref<8x128xf32, #tpu.memory_space<vmem>>) attributes {dimension_semantics = [#tpu.dimension_semantics<arbitrary>], iteration_bounds = array<i64: 1>, scalar_prefetch = 0 : i64, scratch_operands = 0 : i64, tpu.core_type = #tpu.core_type<tc>, window_params = [{transform_indices = @transform_0, window_bounds = array<i64: 8, 2>}, {pipeline_mode = #tpu.pipeline_mode<synchronous>, transform_indices = @transform_1, window_bounds = array<i64: 2, 1024>}, {pipeline_mode = #tpu.pipeline_mode<synchronous>, transform_indices = @transform_2, window_bounds = array<i64: 1, 1024>}, {pipeline_mode = #tpu.pipeline_mode<synchronous>, transform_indices = @transform_3, window_bounds = array<i64: 1024, 1024>}, {pipeline_mode = #tpu.pipeline_mode<synchronous>, transform_indices = @transform_4, window_bounds = array<i64: 1, 1024>}, {pipeline_mode = #tpu.pipeline_mode<synchronous>, transform_indices = @transform_5, window_bounds = array<i64: 1024, 128>}, {pipeline_mode = #tpu.pipeline_mode<synchronous>, transform_indices = @transform_6, window_bounds = array<i64: 1, 128>}, {transform_indices = @transform_7, window_bounds = array<i64: 8, 128>}]} {
    %c0 = arith.constant 0 : index
    %c0_0 = arith.constant 0 : index
    %0 = vector.load %arg1[%c0, %c0_0] : memref<8x2xf32, #tpu.memory_space<vmem>>, vector<8x2xf32>
    %1 = vector.extract_strided_slice %0 {offsets = [0, 0], sizes = [8, 1], strides = [1, 1]} : vector<8x2xf32> to vector<8x1xf32>
    %c0_1 = arith.constant 0 : index
    %c0_2 = arith.constant 0 : index
    %2 = vector.load %arg2[%c0_1, %c0_2] : memref<2x1024xf32, #tpu.memory_space<vmem>>, vector<1x1024xf32>
    %3 = vector.broadcast %1 : vector<8x1xf32> to vector<8x1024xf32>
    %4 = vector.broadcast %2 : vector<1x1024xf32> to vector<8x1024xf32>
    %5 = arith.mulf %3, %4 : vector<8x1024xf32>
    %6 = vector.extract_strided_slice %0 {offsets = [0, 1], sizes = [8, 1], strides = [1, 1]} : vector<8x2xf32> to vector<8x1xf32>
    %c1 = arith.constant 1 : index
    %c0_3 = arith.constant 0 : index
    %7 = vector.load %arg2[%c1, %c0_3] : memref<2x1024xf32, #tpu.memory_space<vmem>>, vector<1x1024xf32>
    %8 = vector.broadcast %6 : vector<8x1xf32> to vector<8x1024xf32>
    %9 = vector.broadcast %7 : vector<1x1024xf32> to vector<8x1024xf32>
    %10 = arith.mulf %8, %9 : vector<8x1024xf32>
    %11 = arith.addf %5, %10 : vector<8x1024xf32>
    %c0_4 = arith.constant 0 : index
    %c0_5 = arith.constant 0 : index
    %12 = vector.load %arg3[%c0_4, %c0_5] : memref<1x1024xf32, #tpu.memory_space<vmem>>, vector<1x1024xf32>
    %13 = vector.broadcast %12 : vector<1x1024xf32> to vector<8x1024xf32>
    %14 = arith.addf %11, %13 : vector<8x1024xf32>
    %cst = arith.constant 0.000000e+00 : f32
    %15 = vector.broadcast %cst : f32 to vector<8x1024xf32>
    %16 = arith.maximumf %14, %15 : vector<8x1024xf32>
    %c0_6 = arith.constant 0 : index
    %c0_7 = arith.constant 0 : index
    %17 = vector.load %arg4[%c0_6, %c0_7] : memref<1024x1024xf32, #tpu.memory_space<vmem>>, vector<1024x1024xf32>
    %cst_8 = arith.constant dense<0.000000e+00> : vector<8x1024xf32>
    %18 = tpu.matmul %16, %17, %cst_8 {dimension_numbers = #tpu.dot_dimension_numbers<[1], [0], [0], [1], [0, 0, 1, 1], [], []>} : vector<8x1024xf32>, vector<1024x1024xf32>, vector<8x1024xf32> -> vector<8x1024xf32>
    %c0_9 = arith.constant 0 : index
    %c0_10 = arith.constant 0 : index
    %19 = vector.load %arg5[%c0_9, %c0_10] : memref<1x1024xf32, #tpu.memory_space<vmem>>, vector<1x1024xf32>
    %20 = vector.broadcast %19 : vector<1x1024xf32> to vector<8x1024xf32>
    %21 = arith.addf %18, %20 : vector<8x1024xf32>
    %cst_11 = arith.constant 0.000000e+00 : f32
    %22 = vector.broadcast %cst_11 : f32 to vector<8x1024xf32>
    %23 = arith.maximumf %21, %22 : vector<8x1024xf32>
    %c0_12 = arith.constant 0 : index
    %c0_13 = arith.constant 0 : index
    %24 = vector.load %arg6[%c0_12, %c0_13] : memref<1024x128xf32, #tpu.memory_space<vmem>>, vector<1024x128xf32>
    %cst_14 = arith.constant dense<0.000000e+00> : vector<8x128xf32>
    %25 = tpu.matmul %23, %24, %cst_14 {dimension_numbers = #tpu.dot_dimension_numbers<[1], [0], [0], [1], [0, 0, 1, 1], [], []>} : vector<8x1024xf32>, vector<1024x128xf32>, vector<8x128xf32> -> vector<8x128xf32>
    %c0_15 = arith.constant 0 : index
    %c0_16 = arith.constant 0 : index
    %26 = vector.load %arg7[%c0_15, %c0_16] : memref<1x128xf32, #tpu.memory_space<vmem>>, vector<1x128xf32>
    %27 = vector.broadcast %26 : vector<1x128xf32> to vector<8x128xf32>
    %28 = arith.addf %25, %27 : vector<8x128xf32>
    %c0_17 = arith.constant 0 : index
    %c0_18 = arith.constant 0 : index
    %29 = vector.load %arg8[%c0_17, %c0_18] : memref<8x128xf32, #tpu.memory_space<vmem>>, vector<8x128xf32>
    tpu.vector_store %arg8[%c0_17, %c0_18], %28 {strides = array<i32>} : memref<8x128xf32, #tpu.memory_space<vmem>>, vector<8x128xf32>,
    return
  }
  func.func @transform_0(%arg0: i32) -> (i32, i32) {
    %c0_i32 = arith.constant 0 : i32
    %c0_i32_0 = arith.constant 0 : i32
    return %arg0, %c0_i32 : i32, i32
  }
  func.func @transform_1(%arg0: i32) -> (i32, i32) {
    %c0_i32 = arith.constant 0 : i32
    %c0_i32_0 = arith.constant 0 : i32
    %c0_i32_1 = arith.constant 0 : i32
    return %c0_i32, %c0_i32_0 : i32, i32
  }
  func.func @transform_2(%arg0: i32) -> (i32, i32) {
    %c0_i32 = arith.constant 0 : i32
    %c0_i32_0 = arith.constant 0 : i32
    %c0_i32_1 = arith.constant 0 : i32
    return %c0_i32, %c0_i32_0 : i32, i32
  }
  func.func @transform_3(%arg0: i32) -> (i32, i32) {
    %c0_i32 = arith.constant 0 : i32
    %c0_i32_0 = arith.constant 0 : i32
    %c0_i32_1 = arith.constant 0 : i32
    return %c0_i32, %c0_i32_0 : i32, i32
  }
  func.func @transform_4(%arg0: i32) -> (i32, i32) {
    %c0_i32 = arith.constant 0 : i32
    %c0_i32_0 = arith.constant 0 : i32
    %c0_i32_1 = arith.constant 0 : i32
    return %c0_i32, %c0_i32_0 : i32, i32
  }
  func.func @transform_5(%arg0: i32) -> (i32, i32) {
    %c0_i32 = arith.constant 0 : i32
    %c0_i32_0 = arith.constant 0 : i32
    %c0_i32_1 = arith.constant 0 : i32
    return %c0_i32, %c0_i32_0 : i32, i32
  }
  func.func @transform_6(%arg0: i32) -> (i32, i32) {
    %c0_i32 = arith.constant 0 : i32
    %c0_i32_0 = arith.constant 0 : i32
    %c0_i32_1 = arith.constant 0 : i32
    return %c0_i32, %c0_i32_0 : i32, i32
  }
  func.func @transform_7(%arg0: i32) -> (i32, i32) {
    %c0_i32 = arith.constant 0 : i32
    %c0_i32_0 = arith.constant 0 : i32
    return %arg0, %c0_i32 : i32, i32
  }
}

</mosaic_0001>

<bundles_post_ra>
// kernel: tpu_custom_call.1
= control target key start
LH: loop header
LB: loop body
LE: loop exit
PB: predicated region body
PF: predicated region fallthrough
CT: control target
= control target key end

     0   :  { %12 = vsyncpa [#allocation3], 0  ;;  %s4729_s0 = inlined_call_operand.vmem [shape: f32[8,2], index: 0, kind: input, shape index: {}]   ;;  %s4730_s1 = inlined_call_operand.hbm [shape: f32[2,1024], index: 1, kind: input, shape index: {}]   ;;  %s4731_s2 = inlined_call_operand.hbm [shape: f32[1,1024], index: 2, kind: input, shape index: {}]   ;;  %s4732_s3 = inlined_call_operand.hbm [shape: f32[1024,1024], index: 3, kind: input, shape index: {}]   ;;  %s4733_s4 = inlined_call_operand.hbm [shape: f32[1,1024], index: 4, kind: input, shape index: {}]   ;;  %s4734_s5 = inlined_call_operand.hbm [shape: f32[1024,128], index: 5, kind: input, shape index: {}]   ;;  %s4735_s6 = inlined_call_operand.hbm [shape: f32[1,128], index: 6, kind: input, shape index: {}]   ;;  %s4736_s7 = inlined_call_operand.hbm [shape: f32[8,128], index: 7, kind: output, shape index: {}]  }
   0x1   :  { %13 = vsyncpa [#allocation6], 0 }
   0x2   :  { %14 = vsyncpa [#allocation9], 0 }
   0x3   :  { %15 = vsyncpa [#allocation12], 0 }
   0x4   :  { %16 = vsyncpa [#allocation4], 0  ;;  %s4426_s24 = smov [#allocation5]   ;;  %s4427_s26 = smov [#allocation8]  }
   0x5   :  { %s35_s25 = sshll.u32 %s4426_s24, 4  ;;  %s57_s27 = sshll.u32 %s4427_s26, 4  ;;  %s36_s25 = int_to_ptr.vmem [resolvable:$true] %s35_s25  ;;  %s58_s27 = int_to_ptr.vmem [resolvable:$true] %s57_s27 }
   0x6   :  { %s4262_s30 = scalar_lea.hbm %s4731_s2, 128 }
   0x7   :  { %p4263_p0 = scmp.ne.s32.totalorder %s4731_s2, %s4262_s30  ;;  %p4266_p1 = scmp.lt.u32.totalorder %s4262_s30, %s4731_s2 }
   0x9   :  { %p4268_p2 = pnand %p4266_p1, %p4263_p0 }
   0xb   :  { %4271 = shalt.err (!%p4268_p2)
}
   0xc   :  { %s4272_s12 = scalar_lea.vmem %s36_s25, 128  ;;  %p4277_p4 = scmp.lt.s32.totalorder %s36_s25, %s36_s25 }
   0xd   :  { %p4273_p3 = scmp.ne.s32.totalorder %s36_s25, %s4272_s12  ;;  %p4278_p5 = scmp.lt.s32.totalorder %s4272_s12, %s4272_s12 }
   0xf   :  { %p4279_p6 = por %p4278_p5, %p4277_p4 }
  0x11   :  { %p4280_p7 = pnand %p4279_p6, %p4273_p3 }
  0x13   :  { %4283 = shalt.err (!%p4280_p7)
}
  0x14   :  { %38 = dma.hbm_to_vmem [thread:$0]  %s4731_s2, 128, %s36_s25, [#allocation6]  }
  0x15   :  { %s4284_s17 = scalar_lea.hbm %s4733_s4, 128 }
  0x16   :  { %p4285_p8 = scmp.ne.s32.totalorder %s4733_s4, %s4284_s17  ;;  %p4288_p9 = scmp.lt.u32.totalorder %s4284_s17, %s4733_s4 }
  0x18   :  { %p4290_p10 = pnand %p4288_p9, %p4285_p8 }
  0x1a   :  { %4293 = shalt.err (!%p4290_p10)
}
  0x1b   :  { %s4294_s22 = scalar_lea.vmem %s58_s27, 128  ;;  %p4299_p12 = scmp.lt.s32.totalorder %s58_s27, %s58_s27 }
  0x1c   :  { %p4295_p11 = scmp.ne.s32.totalorder %s58_s27, %s4294_s22  ;;  %p4300_p13 = scmp.lt.s32.totalorder %s4294_s22, %s4294_s22 }
  0x1e   :  { %p4301_p0 = por %p4300_p13, %p4299_p12 }
  0x20   :  { %p4302_p1 = pnand %p4301_p0, %p4295_p11 }
  0x22   :  { %4305 = shalt.err (!%p4302_p1)
}
  0x23   :  { %60 = dma.hbm_to_vmem [thread:$0]  %s4733_s4, 128, %s58_s27, [#allocation9]  }
  0x24   :  { %s4428_s24 = smov [#allocation2]   ;;  %s4429_s26 = smov [#allocation7]  }
  0x25   :  { %s25_s25 = sshll.u32 %s4428_s24, 4  ;;  %s44_s28 = sshll.u32 %s4429_s26, 4  ;;  %s26_s25 = int_to_ptr.vmem [resolvable:$true] %s25_s25  ;;  %s4503_s28 = int_to_ptr.vmem [resolvable:$true] %s44_s28 }
  0x26   :  { %s4306_s8 = scalar_lea.hbm %s4730_s1, 256 }
  0x27   :  { %p4307_p2 = scmp.ne.s32.totalorder %s4730_s1, %s4306_s8  ;;  %p4310_p3 = scmp.lt.u32.totalorder %s4306_s8, %s4730_s1 }
  0x29   :  { %p4312_p4 = pnand %p4310_p3, %p4307_p2 }
  0x2b   :  { %4315 = shalt.err (!%p4312_p4)
}
  0x2c   :  { %s4316_s4 = scalar_lea.vmem %s26_s25, 256  ;;  %p4321_p6 = scmp.lt.s32.totalorder %s26_s25, %s26_s25 }
  0x2d   :  { %p4317_p5 = scmp.ne.s32.totalorder %s26_s25, %s4316_s4  ;;  %p4322_p7 = scmp.lt.s32.totalorder %s4316_s4, %s4316_s4 }
  0x2f   :  { %p4323_p8 = por %p4322_p7, %p4321_p6 }
  0x31   :  { %p4324_p9 = pnand %p4323_p8, %p4317_p5 }
  0x33   :  { %4327 = shalt.err (!%p4324_p9)
}
  0x34   :  { %28 = dma.hbm_to_vmem [thread:$0]  %s4730_s1, 256, %s26_s25, [#allocation3]  }
  0x35   :  { %s4328_s16 = scalar_lea.hbm %s4732_s3, 131072 }
  0x36   :  { %p4329_p10 = scmp.ne.s32.totalorder %s4732_s3, %s4328_s16  ;;  %p4332_p11 = scmp.lt.u32.totalorder %s4328_s16, %s4732_s3 }
  0x38   :  { %p4334_p12 = pnand %p4332_p11, %p4329_p10 }
  0x3a   :  { %4337 = shalt.err (!%p4334_p12)
}
  0x3b   :  { %s4338_s21 = scalar_lea.vmem %s4503_s28, 131072  ;;  %p4343_p0 = scmp.lt.s32.totalorder %s4503_s28, %s4503_s28 }
  0x3c   :  { %p4339_p13 = scmp.ne.s32.totalorder %s4503_s28, %s4338_s21  ;;  %p4344_p1 = scmp.lt.s32.totalorder %s4338_s21, %s4338_s21 }
  0x3e   :  { %p4345_p2 = por %p4344_p1, %p4343_p0 }
  0x40   :  { %p4346_p3 = pnand %p4345_p2, %p4339_p13 }
  0x42   :  { %4349 = shalt.err (!%p4346_p3)
}
  0x43   :  { %s4430_s1 = smov 1024   ;;  %s4431_s22 = smov 64  }
  0x44   :  { %50 = dma.hbm_to_vmem [thread:$0]  %s4732_s3, 131072, %s4503_s28, [#allocation6], %s4430_s1, %s4430_s1, %s4431_s22  }
  0x45   :  { %s4432_s24 = smov [#allocation10]   ;;  %s4350_s30 = scalar_lea.hbm %s4734_s5, 16384 }
  0x46   :  { %s66_s25 = sshll.u32 %s4432_s24, 4  ;;  %p4351_p4 = scmp.ne.s32.totalorder %s4734_s5, %s4350_s30  ;;  %s67_s25 = int_to_ptr.vmem [resolvable:$true] %s66_s25 }
  0x47   :  { %p4354_p5 = scmp.lt.u32.totalorder %s4350_s30, %s4734_s5 }
  0x49   :  { %p4356_p6 = pnand %p4354_p5, %p4351_p4 }
  0x4b   :  { %4359 = shalt.err (!%p4356_p6)
}
  0x4c   :  { %s4360_s12 = scalar_lea.vmem %s67_s25, 16384  ;;  %p4365_p8 = scmp.lt.s32.totalorder %s67_s25, %s67_s25 }
  0x4d   :  { %p4361_p7 = scmp.ne.s32.totalorder %s67_s25, %s4360_s12  ;;  %p4366_p9 = scmp.lt.s32.totalorder %s4360_s12, %s4360_s12 }
  0x4f   :  { %p4367_p10 = por %p4366_p9, %p4365_p8 }
  0x51   :  { %p4368_p11 = pnand %p4367_p10, %p4361_p7 }
  0x53   :  { %4371 = shalt.err (!%p4368_p11)
}
  0x54   :  { %s4433_s3 = smov 128   ;;  %s4434_s28 = smov 8  }
  0x55   :  { %72 = dma.hbm_to_vmem [thread:$0]  %s4734_s5, 16384, %s67_s25, [#allocation9], %s4433_s3, %s4433_s3, %s4434_s28  }
  0x56   :  { %s4435_s13 = smov [#allocation11]   ;;  %s4372_s17 = scalar_lea.hbm %s4735_s6, 16 }
  0x57   :  { %s79_s14 = sshll.u32 %s4435_s13, 4  ;;  %p4373_p12 = scmp.ne.s32.totalorder %s4735_s6, %s4372_s17  ;;  %s80_s14 = int_to_ptr.vmem [resolvable:$true] %s79_s14 }
  0x58   :  { %p4376_p13 = scmp.lt.u32.totalorder %s4372_s17, %s4735_s6 }
  0x5a   :  { %p4378_p0 = pnand %p4376_p13, %p4373_p12 }
  0x5c   :  { %4381 = shalt.err (!%p4378_p0)
}
  0x5d   :  { %s4382_s1 = scalar_lea.vmem %s80_s14, 16  ;;  %s4386_s5 = scalar_lea.vmem %s80_s14, 32 }
  0x5e   :  { %p4383_p1 = scmp.ne.s32.totalorder %s80_s14, %s4382_s1  ;;  %p4387_p2 = scmp.lt.s32.totalorder %s80_s14, %s80_s14 }
  0x5f   :  { %p4388_p3 = scmp.lt.s32.totalorder %s4386_s5, %s4382_s1 }
  0x61   :  { %p4389_p4 = por %p4388_p3, %p4387_p2 }
  0x63   :  { %p4390_p5 = pnand %p4389_p4, %p4383_p1 }
  0x65   :  { %4393 = shalt.err (!%p4390_p5)
}
  0x66   :  { %82 = dma.hbm_to_vmem [thread:$0]  %s4735_s6, 16, %s80_s14, [#allocation12]  }
  0x67   :  { %4416 = dma.done.wait [#allocation3], 256  }
  0x68   :  { %4417 = vsyncadd [#allocation3], 4294967040 }
  0x69   :  { %4418 = dma.done.wait [#allocation6], 131200  }
  0x6a   :  { %4419 = vsyncadd [#allocation6], 4294836096 }
  0x6b   :  { %4420 = dma.done.wait [#allocation9], 16512  }
  0x6c   :  { %4421 = vsyncadd [#allocation9], 4294950784 }
  0x6d   :  { %4422 = dma.done.wait [#allocation12], 16  }
  0x6e   :  { %4423 = vsyncadd [#allocation12], 4294967280  ;;  %v4436_v0 = vmov 0   ;;  %v101_v1 = vld [vmem:[%s4729_s0] sm:$0xff]  ;;  %v281_v5 = vld [vmem:[#allocation7 + $0x18] sm:$0xff]  ;;  %v4437_v21 = vmov 1  }
  0x6f   :  { %4260 = vset.pattern.permute.xlu0 %v4436_v0  ;;  %v279_v2 = vld [vmem:[#allocation7 + $0x8] sm:$0xff]  ;;  %v289_v6 = vld [vmem:[#allocation7 + $0x58] sm:$0xff]  ;;  %v278_v7 = vld [vmem:[#allocation7] sm:$0xff]  ;;  %s4438_s0 = smov [#allocation13]  }
  0x70   :  { %v287_v3 = vld [vmem:[#allocation7 + $0x48] sm:$0xff]  ;;  %105 = vperm.xlu0 %4260, %v101_v1   ;;  %v3319_v8 = vpack.c.bf16 %v289_v6, %v281_v5  ;;  %v286_v9 = vld [vmem:[#allocation7 + $0x40] sm:$0xff]  ;;  %v280_v10 = vld [vmem:[#allocation7 + $0x10] sm:$0xff]  ;;  %s2910_s6 = sshll.u32 %s4438_s0, 4  ;;  %s2911_s6 = int_to_ptr.vmem [resolvable:$true] %s2910_s6 }
  0x71   :  { %v3063_v4 = vpack.c.bf16 %v287_v3, %v279_v2  ;;  %v288_v11 = vld [vmem:[#allocation7 + $0x50] sm:$0xff]  ;;  %v3065_v12 = vpack.c.bf16 %v286_v9, %v278_v7  ;;  %v295_v14 = vld [vmem:[#allocation7 + $0x88] sm:$0xff]  ;;  %v297_v16 = vld [vmem:[#allocation7 + $0x98] sm:$0xff]  ;;  %s4394_s25 = scalar_lea.vmem %s2911_s6, 128  ;;  %p4399_p7 = scmp.lt.s32.totalorder %s2911_s6, %s2911_s6 }
  0x72   :  { %v3321_v13 = vpack.c.bf16 %v288_v11, %v280_v10  ;;  %v303_v15 = vld [vmem:[#allocation7 + $0xc8] sm:$0xff]  ;;  %3320 = vmatprep.subr.bf16.mxu1 %v3319_v8  ;;  %v305_v18 = vld [vmem:[#allocation7 + $0xd8] sm:$0xff]  ;;  %v294_v19 = vld [vmem:[#allocation7 + $0x80] sm:$0xff]  ;;  %p4395_p6 = scmp.ne.s32.totalorder %s2911_s6, %s4394_s25  ;;  %p4400_p8 = scmp.lt.s32.totalorder %s4394_s25, %s4394_s25 }
  0x73   :  { %3064 = vmatprep.subr.bf16.mxu0 %v3063_v4  ;;  %v3067_v17 = vpack.c.bf16 %v303_v15, %v295_v14  ;;  %v302_v20 = vld [vmem:[#allocation7 + $0xc0] sm:$0xff]  ;;  %v3323_v22 = vpack.c.bf16 %v305_v18, %v297_v16  ;;  %v296_v24 = vld [vmem:[#allocation7 + $0x90] sm:$0xff]  ;;  %v311_v26 = vld [vmem:[#allocation7 + $0x108] sm:$0xff] }
  0x74   :  { %4261 = vset.pattern.permute.xlu0 %v4437_v21  ;;  %3066 = vmatpush1.bf16.msra.mxu0 %v3065_v12  ;;  %v3069_v23 = vpack.c.bf16 %v302_v20, %v294_v19  ;;  %v304_v25 = vld [vmem:[#allocation7 + $0xd0] sm:$0xff]  ;;  %v319_v28 = vld [vmem:[#allocation7 + $0x148] sm:$0xff]  ;;  %v313_v29 = vld [vmem:[#allocation7 + $0x118] sm:$0xff]  ;;  %p4401_p9 = por %p4400_p8, %p4399_p7 }
  0x75   :  { %160 = vperm.xlu0 %4261, %v101_v1   ;;  %3322 = vmatpush1.bf16.msra.mxu1 %v3321_v13  ;;  %v3325_v27 = vpack.c.bf16 %v304_v25, %v296_v24  ;;  %v321_v30 = vld [vmem:[#allocation7 + $0x158] sm:$0xff]  ;;  %v3071_v31 = vpack.c.bf16 %v319_v28, %v311_v26  ;;  %v310_v33 = vld [vmem:[#allocation7 + $0x100] sm:$0xff]  ;;  %v312_v35 = vld [vmem:[#allocation7 + $0x110] sm:$0xff] }
  0x76   :  { %3068 = vmatprep.subr.bf16.mxu0 %v3067_v17  ;;  %3324 = vmatprep.subr.bf16.mxu1 %v3323_v22  ;;  %v3327_v32 = vpack.c.bf16 %v321_v30, %v313_v29  ;;  %v318_v34 = vld [vmem:[#allocation7 + $0x140] sm:$0xff]  ;;  %v320_v36 = vld [vmem:[#allocation7 + $0x150] sm:$0xff]  ;;  %v327_v37 = vld [vmem:[#allocation7 + $0x188] sm:$0xff]  ;;  %p4402_p10 = pnand %p4401_p9, %p4395_p6 }
  0x77   :  { %v335_v38 = vld [vmem:[#allocation7 + $0x1c8] sm:$0xff]  ;;  %v3073_v39 = vpack.c.bf16 %v318_v34, %v310_v33  ;;  %v329_v40 = vld [vmem:[#allocation7 + $0x198] sm:$0xff]  ;;  %v3329_v42 = vpack.c.bf16 %v320_v36, %v312_v35  ;;  %v326_v44 = vld [vmem:[#allocation7 + $0x180] sm:$0xff] }
  0x78   :  { %3070 = vmatpush1.bf16.msra.mxu0 %v3069_v23  ;;  %v337_v41 = vld [vmem:[#allocation7 + $0x1d8] sm:$0xff]  ;;  %v3075_v43 = vpack.c.bf16 %v335_v38, %v327_v37  ;;  %v334_v45 = vld [vmem:[#allocation7 + $0x1c0] sm:$0xff]  ;;  %v328_v46 = vld [vmem:[#allocation7 + $0x190] sm:$0xff] }
  0x79   :  { %3326 = vmatpush1.bf16.msra.mxu1 %v3325_v27  ;;  %3072 = vmatprep.subr.bf16.mxu0 %v3071_v31  ;;  %v3331_v47 = vpack.c.bf16 %v337_v41, %v329_v40  ;;  %v336_v48 = vld [vmem:[#allocation7 + $0x1d0] sm:$0xff]  ;;  %v343_v49 = vld [vmem:[#allocation7 + $0x208] sm:$0xff]  ;;  %v345_v51 = vld [vmem:[#allocation7 + $0x218] sm:$0xff]  ;;  %v3077_v53 = vpack.c.bf16 %v334_v45, %v326_v44 }
  0x7a   :  { %3328 = vmatprep.subr.bf16.mxu1 %v3327_v32  ;;  %v351_v50 = vld [vmem:[#allocation7 + $0x248] sm:$0xff]  ;;  %v353_v52 = vld [vmem:[#allocation7 + $0x258] sm:$0xff]  ;;  %v3333_v54 = vpack.c.bf16 %v336_v48, %v328_v46  ;;  %v342_v56 = vld [vmem:[#allocation7 + $0x200] sm:$0xff] }
  0x7b   :  { %v3079_v55 = vpack.c.bf16 %v351_v50, %v343_v49  ;;  %v350_v57 = vld [vmem:[#allocation7 + $0x240] sm:$0xff]  ;;  %v344_v58 = vld [vmem:[#allocation7 + $0x210] sm:$0xff]  ;;  %v3335_v59 = vpack.c.bf16 %v353_v52, %v345_v51  ;;  %v359_v61 = vld [vmem:[#allocation7 + $0x288] sm:$0xff] }
  0x7c   :  { %3074 = vmatpush1.bf16.msra.mxu0 %v3073_v39  ;;  %v352_v60 = vld [vmem:[#allocation7 + $0x250] sm:$0xff]  ;;  %v367_v62 = vld [vmem:[#allocation7 + $0x2c8] sm:$0xff]  ;;  %v361_v63 = vld [vmem:[#allocation7 + $0x298] sm:$0xff]  ;;  %v3081_v1 = vpack.c.bf16 %v350_v57, %v342_v56 }
  0x7d   :  { %3330 = vmatpush1.bf16.msra.mxu1 %v3329_v42  ;;  %3076 = vmatprep.subr.bf16.mxu0 %v3075_v43  ;;  %v369_v0 = vld [vmem:[#allocation7 + $0x2d8] sm:$0xff]  ;;  %v3337_v2 = vpack.c.bf16 %v352_v60, %v344_v58  ;;  %v3083_v3 = vpack.c.bf16 %v367_v62, %v359_v61  ;;  %v358_v4 = vld [vmem:[#allocation7 + $0x280] sm:$0xff]  ;;  %v360_v6 = vld [vmem:[#allocation7 + $0x290] sm:$0xff] }
  0x7e   :  { %3332 = vmatprep.subr.bf16.mxu1 %v3331_v47  ;;  %v366_v5 = vld [vmem:[#allocation7 + $0x2c0] sm:$0xff]  ;;  %v3339_v7 = vpack.c.bf16 %v369_v0, %v361_v63  ;;  %v368_v8 = vld [vmem:[#allocation7 + $0x2d0] sm:$0xff]  ;;  %v375_v9 = vld [vmem:[#allocation7 + $0x308] sm:$0xff] }
  0x7f   :  { %v383_v10 = vld [vmem:[#allocation7 + $0x348] sm:$0xff]  ;;  %v377_v11 = vld [vmem:[#allocation7 + $0x318] sm:$0xff]  ;;  %v3085_v13 = vpack.c.bf16 %v366_v5, %v358_v4  ;;  %v3341_v14 = vpack.c.bf16 %v368_v8, %v360_v6  ;;  %v374_v16 = vld [vmem:[#allocation7 + $0x300] sm:$0xff] }
  0x80   :  { %3078 = vmatpush1.bf16.msra.mxu0 %v3077_v53  ;;  %v385_v12 = vld [vmem:[#allocation7 + $0x358] sm:$0xff]  ;;  %v3087_v15 = vpack.c.bf16 %v383_v10, %v375_v9  ;;  %v382_v17 = vld [vmem:[#allocation7 + $0x340] sm:$0xff]  ;;  %v376_v18 = vld [vmem:[#allocation7 + $0x310] sm:$0xff] }
  0x81   :  { %3334 = vmatpush1.bf16.msra.mxu1 %v3333_v54  ;;  %3080 = vmatprep.subr.bf16.mxu0 %v3079_v55  ;;  %v3343_v19 = vpack.c.bf16 %v385_v12, %v377_v11  ;;  %v384_v20 = vld [vmem:[#allocation7 + $0x350] sm:$0xff]  ;;  %v391_v21 = vld [vmem:[#allocation7 + $0x388] sm:$0xff]  ;;  %v393_v23 = vld [vmem:[#allocation7 + $0x398] sm:$0xff]  ;;  %v3089_v25 = vpack.c.bf16 %v382_v17, %v374_v16 }
  0x82   :  { %3336 = vmatprep.subr.bf16.mxu1 %v3335_v59  ;;  %v399_v22 = vld [vmem:[#allocation7 + $0x3c8] sm:$0xff]  ;;  %v401_v24 = vld [vmem:[#allocation7 + $0x3d8] sm:$0xff]  ;;  %v3345_v26 = vpack.c.bf16 %v384_v20, %v376_v18  ;;  %v390_v28 = vld [vmem:[#allocation7 + $0x380] sm:$0xff] }
  0x83   :  { %v3091_v27 = vpack.c.bf16 %v399_v22, %v391_v21  ;;  %v398_v29 = vld [vmem:[#allocation7 + $0x3c0] sm:$0xff]  ;;  %v392_v30 = vld [vmem:[#allocation7 + $0x390] sm:$0xff]  ;;  %v3347_v31 = vpack.c.bf16 %v401_v24, %v393_v23  ;;  %v407_v33 = vld [vmem:[#allocation7 + $0x408] sm:$0xff] }
  0x84   :  { %3082 = vmatpush1.bf16.msra.mxu0 %v3081_v1  ;;  %v400_v32 = vld [vmem:[#allocation7 + $0x3d0] sm:$0xff]  ;;  %v415_v34 = vld [vmem:[#allocation7 + $0x448] sm:$0xff]  ;;  %v409_v35 = vld [vmem:[#allocation7 + $0x418] sm:$0xff]  ;;  %v3093_v37 = vpack.c.bf16 %v398_v29, %v390_v28 }
  0x85   :  { %3338 = vmatpush1.bf16.msra.mxu1 %v3337_v2  ;;  %3084 = vmatprep.subr.bf16.mxu0 %v3083_v3  ;;  %v417_v36 = vld [vmem:[#allocation7 + $0x458] sm:$0xff]  ;;  %v3349_v38 = vpack.c.bf16 %v400_v32, %v392_v30  ;;  %v3095_v39 = vpack.c.bf16 %v415_v34, %v407_v33  ;;  %v406_v40 = vld [vmem:[#allocation7 + $0x400] sm:$0xff]  ;;  %v408_v42 = vld [vmem:[#allocation7 + $0x410] sm:$0xff] }
  0x86   :  { %3340 = vmatprep.subr.bf16.mxu1 %v3339_v7  ;;  %v414_v41 = vld [vmem:[#allocation7 + $0x440] sm:$0xff]  ;;  %v3351_v43 = vpack.c.bf16 %v417_v36, %v409_v35  ;;  %v416_v44 = vld [vmem:[#allocation7 + $0x450] sm:$0xff]  ;;  %v423_v45 = vld [vmem:[#allocation7 + $0x488] sm:$0xff] }
  0x87   :  { %v431_v46 = vld [vmem:[#allocation7 + $0x4c8] sm:$0xff]  ;;  %v425_v47 = vld [vmem:[#allocation7 + $0x498] sm:$0xff]  ;;  %v3097_v49 = vpack.c.bf16 %v414_v41, %v406_v40  ;;  %v3353_v50 = vpack.c.bf16 %v416_v44, %v408_v42  ;;  %v422_v52 = vld [vmem:[#allocation7 + $0x480] sm:$0xff] }
  0x88   :  { %3086 = vmatpush1.bf16.msra.mxu0 %v3085_v13  ;;  %v433_v48 = vld [vmem:[#allocation7 + $0x4d8] sm:$0xff]  ;;  %v3099_v51 = vpack.c.bf16 %v431_v46, %v423_v45  ;;  %v430_v53 = vld [vmem:[#allocation7 + $0x4c0] sm:$0xff]  ;;  %v424_v54 = vld [vmem:[#allocation7 + $0x490] sm:$0xff] }
  0x89   :  { %3342 = vmatpush1.bf16.msra.mxu1 %v3341_v14  ;;  %3088 = vmatprep.subr.bf16.mxu0 %v3087_v15  ;;  %v3355_v55 = vpack.c.bf16 %v433_v48, %v425_v47  ;;  %v432_v56 = vld [vmem:[#allocation7 + $0x4d0] sm:$0xff]  ;;  %v439_v57 = vld [vmem:[#allocation7 + $0x508] sm:$0xff]  ;;  %v441_v59 = vld [vmem:[#allocation7 + $0x518] sm:$0xff]  ;;  %v3101_v61 = vpack.c.bf16 %v430_v53, %v422_v52 }
  0x8a   :  { %3344 = vmatprep.subr.bf16.mxu1 %v3343_v19  ;;  %v447_v58 = vld [vmem:[#allocation7 + $0x548] sm:$0xff]  ;;  %v449_v60 = vld [vmem:[#allocation7 + $0x558] sm:$0xff]  ;;  %v3357_v62 = vpack.c.bf16 %v432_v56, %v424_v54  ;;  %v438_v0 = vld [vmem:[#allocation7 + $0x500] sm:$0xff] }
  0x8b   :  { %v3103_v63 = vpack.c.bf16 %v447_v58, %v439_v57  ;;  %v446_v1 = vld [vmem:[#allocation7 + $0x540] sm:$0xff]  ;;  %v440_v2 = vld [vmem:[#allocation7 + $0x510] sm:$0xff]  ;;  %v3359_v3 = vpack.c.bf16 %v449_v60, %v441_v59  ;;  %v455_v5 = vld [vmem:[#allocation7 + $0x588] sm:$0xff] }
  0x8c   :  { %3090 = vmatpush1.bf16.msra.mxu0 %v3089_v25  ;;  %v448_v4 = vld [vmem:[#allocation7 + $0x550] sm:$0xff]  ;;  %v463_v6 = vld [vmem:[#allocation7 + $0x5c8] sm:$0xff]  ;;  %v457_v7 = vld [vmem:[#allocation7 + $0x598] sm:$0xff]  ;;  %v3105_v9 = vpack.c.bf16 %v446_v1, %v438_v0 }
  0x8d   :  { %3346 = vmatpush1.bf16.msra.mxu1 %v3345_v26  ;;  %3092 = vmatprep.subr.bf16.mxu0 %v3091_v27  ;;  %v465_v8 = vld [vmem:[#allocation7 + $0x5d8] sm:$0xff]  ;;  %v3361_v10 = vpack.c.bf16 %v448_v4, %v440_v2  ;;  %v3107_v11 = vpack.c.bf16 %v463_v6, %v455_v5  ;;  %v454_v12 = vld [vmem:[#allocation7 + $0x580] sm:$0xff]  ;;  %v456_v14 = vld [vmem:[#allocation7 + $0x590] sm:$0xff] }
  0x8e   :  { %3348 = vmatprep.subr.bf16.mxu1 %v3347_v31  ;;  %v462_v13 = vld [vmem:[#allocation7 + $0x5c0] sm:$0xff]  ;;  %v3363_v15 = vpack.c.bf16 %v465_v8, %v457_v7  ;;  %v464_v16 = vld [vmem:[#allocation7 + $0x5d0] sm:$0xff]  ;;  %v471_v17 = vld [vmem:[#allocation7 + $0x608] sm:$0xff] }
  0x8f   :  { %v479_v18 = vld [vmem:[#allocation7 + $0x648] sm:$0xff]  ;;  %v473_v19 = vld [vmem:[#allocation7 + $0x618] sm:$0xff]  ;;  %v3109_v21 = vpack.c.bf16 %v462_v13, %v454_v12  ;;  %v3365_v22 = vpack.c.bf16 %v464_v16, %v456_v14  ;;  %v470_v24 = vld [vmem:[#allocation7 + $0x600] sm:$0xff] }
  0x90   :  { %3094 = vmatpush1.bf16.msra.mxu0 %v3093_v37  ;;  %v481_v20 = vld [vmem:[#allocation7 + $0x658] sm:$0xff]  ;;  %v3111_v23 = vpack.c.bf16 %v479_v18, %v471_v17  ;;  %v478_v25 = vld [vmem:[#allocation7 + $0x640] sm:$0xff]  ;;  %v472_v26 = vld [vmem:[#allocation7 + $0x610] sm:$0xff] }
  0x91   :  { %3350 = vmatpush1.bf16.msra.mxu1 %v3349_v38  ;;  %3096 = vmatprep.subr.bf16.mxu0 %v3095_v39  ;;  %v3367_v27 = vpack.c.bf16 %v481_v20, %v473_v19  ;;  %v480_v28 = vld [vmem:[#allocation7 + $0x650] sm:$0xff]  ;;  %v487_v29 = vld [vmem:[#allocation7 + $0x688] sm:$0xff]  ;;  %v489_v31 = vld [vmem:[#allocation7 + $0x698] sm:$0xff]  ;;  %v3113_v33 = vpack.c.bf16 %v478_v25, %v470_v24 }
  0x92   :  { %3352 = vmatprep.subr.bf16.mxu1 %v3351_v43  ;;  %v495_v30 = vld [vmem:[#allocation7 + $0x6c8] sm:$0xff]  ;;  %v497_v32 = vld [vmem:[#allocation7 + $0x6d8] sm:$0xff]  ;;  %v3369_v34 = vpack.c.bf16 %v480_v28, %v472_v26  ;;  %v486_v36 = vld [vmem:[#allocation7 + $0x680] sm:$0xff] }
  0x93   :  { %v3115_v35 = vpack.c.bf16 %v495_v30, %v487_v29  ;;  %v494_v37 = vld [vmem:[#allocation7 + $0x6c0] sm:$0xff]  ;;  %v488_v38 = vld [vmem:[#allocation7 + $0x690] sm:$0xff]  ;;  %v3371_v39 = vpack.c.bf16 %v497_v32, %v489_v31  ;;  %v503_v41 = vld [vmem:[#allocation7 + $0x708] sm:$0xff] }
  0x94   :  { %3098 = vmatpush1.bf16.msra.mxu0 %v3097_v49  ;;  %v496_v40 = vld [vmem:[#allocation7 + $0x6d0] sm:$0xff]  ;;  %v511_v42 = vld [vmem:[#allocation7 + $0x748] sm:$0xff]  ;;  %v505_v43 = vld [vmem:[#allocation7 + $0x718] sm:$0xff]  ;;  %v3117_v45 = vpack.c.bf16 %v494_v37, %v486_v36 }
  0x95   :  { %3354 = vmatpush1.bf16.msra.mxu1 %v3353_v50  ;;  %3100 = vmatprep.subr.bf16.mxu0 %v3099_v51  ;;  %v513_v44 = vld [vmem:[#allocation7 + $0x758] sm:$0xff]  ;;  %v3373_v46 = vpack.c.bf16 %v496_v40, %v488_v38  ;;  %v3119_v47 = vpack.c.bf16 %v511_v42, %v503_v41  ;;  %v502_v48 = vld [vmem:[#allocation7 + $0x700] sm:$0xff]  ;;  %v504_v50 = vld [vmem:[#allocation7 + $0x710] sm:$0xff] }
  0x96   :  { %3356 = vmatprep.subr.bf16.mxu1 %v3355_v55  ;;  %v510_v49 = vld [vmem:[#allocation7 + $0x740] sm:$0xff]  ;;  %v3375_v51 = vpack.c.bf16 %v513_v44, %v505_v43  ;;  %v512_v52 = vld [vmem:[#allocation7 + $0x750] sm:$0xff]  ;;  %v519_v53 = vld [vmem:[#allocation7 + $0x788] sm:$0xff] }
  0x97   :  { %v527_v54 = vld [vmem:[#allocation7 + $0x7c8] sm:$0xff]  ;;  %v521_v55 = vld [vmem:[#allocation7 + $0x798] sm:$0xff]  ;;  %v3121_v57 = vpack.c.bf16 %v510_v49, %v502_v48  ;;  %v3377_v58 = vpack.c.bf16 %v512_v52, %v504_v50  ;;  %v518_v60 = vld [vmem:[#allocation7 + $0x780] sm:$0xff] }
  0x98   :  { %3102 = vmatpush1.bf16.msra.mxu0 %v3101_v61  ;;  %v529_v56 = vld [vmem:[#allocation7 + $0x7d8] sm:$0xff]  ;;  %v3123_v59 = vpack.c.bf16 %v527_v54, %v519_v53  ;;  %v526_v61 = vld [vmem:[#allocation7 + $0x7c0] sm:$0xff]  ;;  %v528_v0 = vld [vmem:[#allocation7 + $0x7d0] sm:$0xff] }
  0x99   :  { %3358 = vmatpush1.bf16.msra.mxu1 %v3357_v62  ;;  %3104 = vmatprep.subr.bf16.mxu0 %v3103_v63  ;;  %v520_v62 = vld [vmem:[#allocation7 + $0x790] sm:$0xff]  ;;  %v3379_v63 = vpack.c.bf16 %v529_v56, %v521_v55  ;;  %v535_v1 = vld [vmem:[#allocation7 + $0x808] sm:$0xff]  ;;  %v545_v4 = vld [vmem:[#allocation7 + $0x858] sm:$0xff]  ;;  %v3125_v5 = vpack.c.bf16 %v526_v61, %v518_v60 }
  0x9a   :  { %3360 = vmatprep.subr.bf16.mxu1 %v3359_v3  ;;  %v543_v2 = vld [vmem:[#allocation7 + $0x848] sm:$0xff]  ;;  %v537_v3 = vld [vmem:[#allocation7 + $0x818] sm:$0xff]  ;;  %v3381_v6 = vpack.c.bf16 %v528_v0, %v520_v62  ;;  %v542_v62 = vld [vmem:[#allocation7 + $0x840] sm:$0xff] }
  0x9b   :  { %v3127_v7 = vpack.c.bf16 %v543_v2, %v535_v1  ;;  %v3383_v8 = vpack.c.bf16 %v545_v4, %v537_v3  ;;  %v102_v12 = vld [vmem:[#allocation2] ss:$2 sm:$0xff]  ;;  %v4575_v19 = vld [vmem:[#allocation2 + $0x1] ss:$2 sm:$0xff]  ;;  %v4588_v30 = vld [vmem:[#allocation5] sm:$0xff] }
  0x9c   :  { %3106 = vmatpush1.bf16.msra.mxu0 %v3105_v9  ;;  %v109_v9 = vlaneseq  ;;  %v544_v0 = vld [vmem:[#allocation7 + $0x850] sm:$0xff] }
  0x9d   :  { %3362 = vmatpush1.bf16.msra.mxu1 %v3361_v10  ;;  %3108 = vmatprep.subr.bf16.mxu0 %v3107_v11 }
  0x9e   :  { %3364 = vmatprep.subr.bf16.mxu1 %v3363_v15  ;;  %v110_v10 = vshrl.u32 %v109_v9, 7 }
  0xa0   :  { %3110 = vmatpush1.bf16.msra.mxu0 %v3109_v21  ;;  %v4561_v11 = vsub.s32 2, %v110_v10  ;;  %v4563_v13 = vsub.s32 5, %v110_v10  ;;  %v4565_v14 = vsub.s32 4, %v110_v10  ;;  %v4567_v15 = vsub.s32 7, %v110_v10 }
  0xa1   :  { %3366 = vmatpush1.bf16.msra.mxu1 %v3365_v22  ;;  %3112 = vmatprep.subr.bf16.mxu0 %v3111_v23  ;;  %v4569_v16 = vsub.s32 6, %v110_v10  ;;  %v4571_v17 = vsub.s32 1, %v110_v10  ;;  %v4573_v18 = vsub.s32 0, %v110_v10  ;;  %v4577_v20 = vsub.s32 3, %v110_v10 }
  0xa2   :  { %3368 = vmatprep.subr.bf16.mxu1 %v3367_v27  ;;  %v120_v21 = vrot.slane %v102_v12, %v4561_v11  ;;  %v132_v22 = vrot.slane %v102_v12, %v4563_v13  ;;  %v128_v23 = vrot.slane %v102_v12, %v4565_v14  ;;  %v140_v24 = vrot.slane %v102_v12, %v4567_v15 }
  0xa3   :  { %v136_v25 = vrot.slane %v102_v12, %v4569_v16  ;;  %v116_v27 = vrot.slane %v102_v12, %v4571_v17  ;;  %v171_v28 = vrot.slane %v4575_v19, %v4571_v17  ;;  %v112_v29 = vrot.slane %v102_v12, %v4573_v18 }
  0xa4   :  { %3114 = vmatpush1.bf16.msra.mxu0 %v3113_v33  ;;  %v167_v31 = vrot.slane %v4575_v19, %v4573_v18  ;;  %v124_v32 = vrot.slane %v102_v12, %v4577_v20  ;;  %v179_v33 = vrot.slane %v4575_v19, %v4577_v20  ;;  %v229_v41 = vrot.slane %v4588_v30, %v4571_v17  ;;  %v553_v12 = vld [vmem:[#allocation7 + $0x898] sm:$0xff] }
  0xa5   :  { %3370 = vmatpush1.bf16.msra.mxu1 %v3369_v34  ;;  %3116 = vmatprep.subr.bf16.mxu0 %v3115_v35  ;;  %v175_v35 = vrot.slane %v4575_v19, %v4561_v11  ;;  %v225_v42 = vrot.slane %v4588_v30, %v4573_v18  ;;  %v233_v43 = vrot.slane %v4588_v30, %v4561_v11 }
  0xa6   :  { %3372 = vmatprep.subr.bf16.mxu1 %v3371_v39  ;;  %v187_v39 = vrot.slane %v4575_v19, %v4563_v13  ;;  %v183_v44 = vrot.slane %v4575_v19, %v4565_v14  ;;  %v195_v49 = vrot.slane %v4575_v19, %v4567_v15  ;;  %v237_v54 = vrot.slane %v4588_v30, %v4577_v20 }
  0xa7   :  { %v245_v56 = vrot.slane %v4588_v30, %v4563_v13  ;;  %v191_v9 = vrot.slane %v4575_v19, %v4569_v16 }
  0xa8   :  { %3118 = vmatpush1.bf16.msra.mxu0 %v3117_v45 }
  0xa9   :  { %3374 = vmatpush1.bf16.msra.mxu1 %v3373_v46  ;;  %3120 = vmatprep.subr.bf16.mxu0 %v3119_v47 }
  0xaa   :  { %3376 = vmatprep.subr.bf16.mxu1 %v3375_v51 }
  0xac   :  { %3122 = vmatpush1.bf16.msra.mxu0 %v3121_v57 }
  0xad   :  { %3378 = vmatpush1.bf16.msra.mxu1 %v3377_v58  ;;  %3124 = vmatprep.subr.bf16.mxu0 %v3123_v59  ;;  %v534_v59 = vld [vmem:[#allocation7 + $0x800] sm:$0xff] }
  0xae   :  { %3380 = vmatprep.subr.bf16.mxu1 %v3379_v63  ;;  %v536_v63 = vld [vmem:[#allocation7 + $0x810] sm:$0xff] }
  0xb0   :  { %3126 = vmatpush1.bf16.msra.mxu0 %v3125_v5 }
  0xb1   :  { %3382 = vmatpush1.bf16.msra.mxu1 %v3381_v6  ;;  %3128 = vmatprep.subr.bf16.mxu0 %v3127_v7  ;;  %v551_v6 = vld [vmem:[#allocation7 + $0x888] sm:$0xff] }
  0xb2   :  { %3384 = vmatprep.subr.bf16.mxu1 %v3383_v8  ;;  %v559_v7 = vld [vmem:[#allocation7 + $0x8c8] sm:$0xff] }
  0xb3   :  { %v3131_v19 = vpack.c.bf16 %v559_v7, %v551_v6  ;;  %v609_v6 = vld [vmem:[#allocation7 + $0xa58] sm:$0xff] }
  0xef   :  { %v106_v26 = vpop.permute.xlu0 %105 }
  0xf0   :  { %v151_v34 = vmul.f32 %v120_v21, %v106_v26  ;;  %v154_v36 = vmul.f32 %v132_v22, %v106_v26  ;;  %v153_v37 = vmul.f32 %v128_v23, %v106_v26  ;;  %v156_v38 = vmul.f32 %v140_v24, %v106_v26  ;;  %v561_v21 = vld [vmem:[#allocation7 + $0x8d8] sm:$0xff] }
  0xf1   :  { %v4599_v40 = vmul.f32 %v136_v25, %v106_v26  ;;  %v150_v46 = vmul.f32 %v116_v27, %v106_v26  ;;  %v149_v47 = vmul.f32 %v112_v29, %v106_v26  ;;  %v152_v48 = vmul.f32 %v124_v32, %v106_v26  ;;  %v550_v29 = vld [vmem:[#allocation7 + $0x880] sm:$0xff]  ;;  %v552_v32 = vld [vmem:[#allocation7 + $0x890] sm:$0xff] }
  0xf2   :  { %v241_v23 = vrot.slane %v4588_v30, %v4565_v14  ;;  %v253_v24 = vrot.slane %v4588_v30, %v4567_v15  ;;  %v3129_v27 = vpack.c.bf16 %v542_v62, %v534_v59  ;;  %v590_v62 = vld [vmem:[#allocation7 + $0x9c0] sm:$0xff] }
  0xf4   :  { %v161_v45 = vpop.permute.xlu0 %160 }
  0xf5   :  { %v205_v50 = vmul.f32 %v171_v28, %v161_v45  ;;  %v204_v51 = vmul.f32 %v167_v31, %v161_v45  ;;  %v207_v52 = vmul.f32 %v179_v33, %v161_v45  ;;  %v206_v53 = vmul.f32 %v175_v35, %v161_v45  ;;  %v558_v31 = vld [vmem:[#allocation7 + $0x8c0] sm:$0xff]  ;;  %v560_v33 = vld [vmem:[#allocation7 + $0x8d0] sm:$0xff] }
  0xf6   :  { %v209_v55 = vmul.f32 %v187_v39, %v161_v45  ;;  %v208_v2 = vmul.f32 %v183_v44, %v161_v45  ;;  %v211_v3 = vmul.f32 %v195_v49, %v161_v45  ;;  %v3385_v28 = vpack.c.bf16 %v544_v0, %v536_v63 }
  0xf7   :  { %v213_v57 = vadd.f32 %v205_v50, %v150_v46  ;;  %v212_v58 = vadd.f32 %v204_v51, %v149_v47  ;;  %v215_v60 = vadd.f32 %v207_v52, %v152_v48  ;;  %v214_v61 = vadd.f32 %v206_v53, %v151_v34  ;;  %v567_v34 = vld [vmem:[#allocation7 + $0x908] sm:$0xff]  ;;  %v566_v50 = vld [vmem:[#allocation7 + $0x900] sm:$0xff]  ;;  %v568_v53 = vld [vmem:[#allocation7 + $0x910] sm:$0xff] }
  0xf8   :  { %v217_v1 = vadd.f32 %v209_v55, %v154_v36  ;;  %v216_v35 = vadd.f32 %v208_v2, %v153_v37  ;;  %v219_v36 = vadd.f32 %v211_v3, %v156_v38  ;;  %v3387_v39 = vpack.c.bf16 %v561_v21, %v553_v12  ;;  %v574_v51 = vld [vmem:[#allocation7 + $0x940] sm:$0xff]  ;;  %v583_v55 = vld [vmem:[#allocation7 + $0x988] sm:$0xff]  ;;  %v592_v2 = vld [vmem:[#allocation7 + $0x9d0] sm:$0xff] }
  0xf9   :  { %v263_v4 = vadd.f32 %v229_v41, %v213_v57  ;;  %v262_v5 = vadd.f32 %v225_v42, %v212_v58  ;;  %v4615_v8 = vadd.f32 %v233_v43, %v214_v61  ;;  %v265_v10 = vadd.f32 %v237_v54, %v215_v60  ;;  %v575_v41 = vld [vmem:[#allocation7 + $0x948] sm:$0xff]  ;;  %v569_v42 = vld [vmem:[#allocation7 + $0x918] sm:$0xff]  ;;  %v576_v54 = vld [vmem:[#allocation7 + $0x950] sm:$0xff] }
  0xfa   :  { %v4619_v22 = vadd.f32 %v245_v56, %v217_v1  ;;  %v577_v43 = vld [vmem:[#allocation7 + $0x958] sm:$0xff]  ;;  %v210_v44 = vmul.f32 %v191_v9, %v161_v45  ;;  %v249_v46 = vrot.slane %v4588_v30, %v4569_v16  ;;  %v4637_v37 = vadd.f32 %v241_v23, %v216_v35  ;;  %v591_v56 = vld [vmem:[#allocation7 + $0x9c8] sm:$0xff]  ;;  %v582_v61 = vld [vmem:[#allocation7 + $0x980] sm:$0xff] }
  0xfb   :  { %v4625_v25 = vmax.f32 %v263_v4, 0.0  ;;  %v4627_v26 = vmax.f32 %v262_v5, 0.0  ;;  %v4635_v47 = vmax.f32 %v265_v10, 0.0  ;;  %v4639_v38 = vadd.f32 %v253_v24, %v219_v36  ;;  %v585_v57 = vld [vmem:[#allocation7 + $0x998] sm:$0xff]  ;;  %v584_v1 = vld [vmem:[#allocation7 + $0x990] sm:$0xff]  ;;  %v599_v3 = vld [vmem:[#allocation7 + $0xa08] sm:$0xff] }
  0xfc   :  { %v3133_v48 = vpack.c.bf16 %v558_v31, %v550_v29  ;;  %v3389_v49 = vpack.c.bf16 %v560_v33, %v552_v32  ;;  %v218_v45 = vadd.f32 %v210_v44, %v4599_v40  ;;  %v3135_v30 = vpack.c.bf16 %v575_v41, %v567_v34  ;;  %v593_v58 = vld [vmem:[#allocation7 + $0x9d8] sm:$0xff]  ;;  %v607_v4 = vld [vmem:[#allocation7 + $0xa48] sm:$0xff]  ;;  %v598_v10 = vld [vmem:[#allocation7 + $0xa00] sm:$0xff] }
  0xfd   :  { %1408 = vmatprep.mubr.f32.mxu0 %v4625_v25  ;;  %1692 = vmatprep.mubr.f32.mxu1 %v4625_v25  ;;  %v3391_v52 = vpack.c.bf16 %v577_v43, %v569_v42  ;;  %v3137_v60 = vpack.c.bf16 %v574_v51, %v566_v50  ;;  %v3393_v40 = vpack.c.bf16 %v576_v54, %v568_v53  ;;  %v601_v5 = vld [vmem:[#allocation7 + $0xa18] sm:$0xff]  ;;  %v606_v12 = vld [vmem:[#allocation7 + $0xa40] sm:$0xff]  ;;  %v600_v24 = vld [vmem:[#allocation7 + $0xa10] sm:$0xff] }
  0xfe   :  { %1409 = vmatmul.mubr.f32.vlgmr.msra.gmra.mrb[0].mxu0 %v4627_v26  ;;  %1693 = vmatmul.mubr.f32.vlgmr.msra.gmra.mrb[0].mxu1 %v4627_v26  ;;  %v4644_v59 = vadd.f32 %v249_v46, %v218_v45  ;;  %v3139_v63 = vpack.c.bf16 %v591_v56, %v583_v55  ;;  %v3395_v0 = vpack.c.bf16 %v593_v58, %v585_v57  ;;  %v623_v29 = vld [vmem:[#allocation7 + $0xac8] sm:$0xff]  ;;  %v617_v31 = vld [vmem:[#allocation7 + $0xa98] sm:$0xff]  ;;  %v614_v34 = vld [vmem:[#allocation7 + $0xa80] sm:$0xff] }
  0xff   :  { %3130 = vmatpush1.bf16.msra.mxu0 %v3129_v27  ;;  %3386 = vmatpush1.bf16.msra.mxu1 %v3385_v28  ;;  %v3141_v7 = vpack.c.bf16 %v590_v62, %v582_v61  ;;  %v3397_v9 = vpack.c.bf16 %v592_v2, %v584_v1  ;;  %v3143_v21 = vpack.c.bf16 %v607_v4, %v599_v3  ;;  %v608_v27 = vld [vmem:[#allocation7 + $0xa50] sm:$0xff]  ;;  %v615_v28 = vld [vmem:[#allocation7 + $0xa88] sm:$0xff]  ;;  %v622_v35 = vld [vmem:[#allocation7 + $0xac0] sm:$0xff] }
 0x100   :  { %1479 = vmatprep.mubr.f32.mxu0 %v4635_v47  ;;  %1763 = vmatprep.mubr.f32.mxu1 %v4635_v47  ;;  %v3399_v23 = vpack.c.bf16 %v609_v6, %v601_v5  ;;  %v3145_v32 = vpack.c.bf16 %v606_v12, %v598_v10  ;;  %v3401_v33 = vpack.c.bf16 %v608_v27, %v600_v24  ;;  %v616_v41 = vld [vmem:[#allocation7 + $0xa90] sm:$0xff]  ;;  %v631_v43 = vld [vmem:[#allocation7 + $0xb08] sm:$0xff]  ;;  %v633_v46 = vld [vmem:[#allocation7 + $0xb18] sm:$0xff] }
 0x101   :  { %3132 = vmatprep.subr.bf16.mxu0 %v3131_v19  ;;  %3388 = vmatprep.subr.bf16.mxu1 %v3387_v39  ;;  %v625_v19 = vld [vmem:[#allocation7 + $0xad8] sm:$0xff]  ;;  %v3147_v36 = vpack.c.bf16 %v623_v29, %v615_v28  ;;  %v624_v42 = vld [vmem:[#allocation7 + $0xad0] sm:$0xff]  ;;  %v639_v44 = vld [vmem:[#allocation7 + $0xb48] sm:$0xff] }
 0x102   :  { %v3403_v39 = vpack.c.bf16 %v625_v19, %v617_v31  ;;  %v3405_v50 = vpack.c.bf16 %v624_v42, %v616_v41  ;;  %v630_v51 = vld [vmem:[#allocation7 + $0xb00] sm:$0xff]  ;;  %v632_v53 = vld [vmem:[#allocation7 + $0xb10] sm:$0xff]  ;;  %v647_v55 = vld [vmem:[#allocation7 + $0xb88] sm:$0xff] }
 0x103   :  { %3134 = vmatpush1.bf16.msra.mxu0 %v3133_v48  ;;  %3390 = vmatpush1.bf16.msra.mxu1 %v3389_v49  ;;  %v641_v48 = vld [vmem:[#allocation7 + $0xb58] sm:$0xff]  ;;  %v3149_v49 = vpack.c.bf16 %v622_v35, %v614_v34  ;;  %v638_v45 = vld [vmem:[#allocation7 + $0xb40] sm:$0xff]  ;;  %v640_v54 = vld [vmem:[#allocation7 + $0xb50] sm:$0xff] }
 0x104   :  { %3136 = vmatprep.subr.bf16.mxu0 %v3135_v30  ;;  %3392 = vmatprep.subr.bf16.mxu1 %v3391_v52  ;;  %v3151_v30 = vpack.c.bf16 %v639_v44, %v631_v43  ;;  %v3407_v52 = vpack.c.bf16 %v641_v48, %v633_v46  ;;  %v655_v56 = vld [vmem:[#allocation7 + $0xbc8] sm:$0xff]  ;;  %v649_v57 = vld [vmem:[#allocation7 + $0xb98] sm:$0xff]  ;;  %v646_v61 = vld [vmem:[#allocation7 + $0xb80] sm:$0xff] }
 0x105   :  { %v657_v58 = vld [vmem:[#allocation7 + $0xbd8] sm:$0xff]  ;;  %v654_v62 = vld [vmem:[#allocation7 + $0xbc0] sm:$0xff]  ;;  %v648_v1 = vld [vmem:[#allocation7 + $0xb90] sm:$0xff] }
 0x106   :  { %v656_v2 = vld [vmem:[#allocation7 + $0xbd0] sm:$0xff]  ;;  %v663_v3 = vld [vmem:[#allocation7 + $0xc08] sm:$0xff]  ;;  %v665_v5 = vld [vmem:[#allocation7 + $0xc18] sm:$0xff] }
 0x107   :  { %3138 = vmatpush1.bf16.msra.mxu0 %v3137_v60  ;;  %3394 = vmatpush1.bf16.msra.mxu1 %v3393_v40  ;;  %v3153_v60 = vpack.c.bf16 %v638_v45, %v630_v51  ;;  %v3409_v40 = vpack.c.bf16 %v640_v54, %v632_v53  ;;  %v671_v4 = vld [vmem:[#allocation7 + $0xc48] sm:$0xff]  ;;  %v673_v6 = vld [vmem:[#allocation7 + $0xc58] sm:$0xff]  ;;  %v662_v10 = vld [vmem:[#allocation7 + $0xc00] sm:$0xff] }
 0x108   :  { %3140 = vmatprep.subr.bf16.mxu0 %v3139_v63  ;;  %3396 = vmatprep.subr.bf16.mxu1 %v3395_v0  ;;  %v3155_v63 = vpack.c.bf16 %v655_v56, %v647_v55  ;;  %v3411_v0 = vpack.c.bf16 %v657_v58, %v649_v57  ;;  %v670_v12 = vld [vmem:[#allocation7 + $0xc40] sm:$0xff]  ;;  %v664_v24 = vld [vmem:[#allocation7 + $0xc10] sm:$0xff]  ;;  %v679_v28 = vld [vmem:[#allocation7 + $0xc88] sm:$0xff] }
 0x109   :  { %v672_v27 = vld [vmem:[#allocation7 + $0xc50] sm:$0xff]  ;;  %v687_v29 = vld [vmem:[#allocation7 + $0xcc8] sm:$0xff]  ;;  %v681_v31 = vld [vmem:[#allocation7 + $0xc98] sm:$0xff] }
 0x10a   :  { %v689_v19 = vld [vmem:[#allocation7 + $0xcd8] sm:$0xff]  ;;  %v678_v34 = vld [vmem:[#allocation7 + $0xc80] sm:$0xff]  ;;  %v680_v41 = vld [vmem:[#allocation7 + $0xc90] sm:$0xff] }
 0x10b   :  { %3142 = vmatpush1.bf16.msra.mxu0 %v3141_v7  ;;  %3398 = vmatpush1.bf16.msra.mxu1 %v3397_v9  ;;  %v3157_v7 = vpack.c.bf16 %v654_v62, %v646_v61  ;;  %v3413_v9 = vpack.c.bf16 %v656_v2, %v648_v1  ;;  %v686_v35 = vld [vmem:[#allocation7 + $0xcc0] sm:$0xff]  ;;  %v688_v42 = vld [vmem:[#allocation7 + $0xcd0] sm:$0xff]  ;;  %v695_v43 = vld [vmem:[#allocation7 + $0xd08] sm:$0xff] }
 0x10c   :  { %3144 = vmatprep.subr.bf16.mxu0 %v3143_v21  ;;  %3400 = vmatprep.subr.bf16.mxu1 %v3399_v23  ;;  %v3159_v21 = vpack.c.bf16 %v671_v4, %v663_v3  ;;  %v3415_v23 = vpack.c.bf16 %v673_v6, %v665_v5  ;;  %v703_v44 = vld [vmem:[#allocation7 + $0xd48] sm:$0xff]  ;;  %v697_v46 = vld [vmem:[#allocation7 + $0xd18] sm:$0xff]  ;;  %v694_v51 = vld [vmem:[#allocation7 + $0xd00] sm:$0xff] }
 0x10d   :  { %v705_v48 = vld [vmem:[#allocation7 + $0xd58] sm:$0xff]  ;;  %v702_v45 = vld [vmem:[#allocation7 + $0xd40] sm:$0xff]  ;;  %v696_v53 = vld [vmem:[#allocation7 + $0xd10] sm:$0xff] }
 0x10e   :  { %v704_v54 = vld [vmem:[#allocation7 + $0xd50] sm:$0xff]  ;;  %v711_v55 = vld [vmem:[#allocation7 + $0xd88] sm:$0xff]  ;;  %v713_v57 = vld [vmem:[#allocation7 + $0xd98] sm:$0xff] }
 0x10f   :  { %3146 = vmatpush1.bf16.msra.mxu0 %v3145_v32  ;;  %3402 = vmatpush1.bf16.msra.mxu1 %v3401_v33  ;;  %v3161_v32 = vpack.c.bf16 %v670_v12, %v662_v10  ;;  %v3417_v33 = vpack.c.bf16 %v672_v27, %v664_v24  ;;  %v719_v56 = vld [vmem:[#allocation7 + $0xdc8] sm:$0xff]  ;;  %v721_v58 = vld [vmem:[#allocation7 + $0xdd8] sm:$0xff]  ;;  %v710_v61 = vld [vmem:[#allocation7 + $0xd80] sm:$0xff] }
 0x110   :  { %3148 = vmatprep.subr.bf16.mxu0 %v3147_v36  ;;  %3404 = vmatprep.subr.bf16.mxu1 %v3403_v39  ;;  %v3163_v36 = vpack.c.bf16 %v687_v29, %v679_v28  ;;  %v3419_v39 = vpack.c.bf16 %v689_v19, %v681_v31  ;;  %v718_v62 = vld [vmem:[#allocation7 + $0xdc0] sm:$0xff]  ;;  %v712_v1 = vld [vmem:[#allocation7 + $0xd90] sm:$0xff]  ;;  %v727_v3 = vld [vmem:[#allocation7 + $0xe08] sm:$0xff] }
 0x111   :  { %v720_v2 = vld [vmem:[#allocation7 + $0xdd0] sm:$0xff]  ;;  %v735_v4 = vld [vmem:[#allocation7 + $0xe48] sm:$0xff]  ;;  %v729_v5 = vld [vmem:[#allocation7 + $0xe18] sm:$0xff] }
 0x112   :  { %v737_v6 = vld [vmem:[#allocation7 + $0xe58] sm:$0xff]  ;;  %v726_v10 = vld [vmem:[#allocation7 + $0xe00] sm:$0xff]  ;;  %v728_v24 = vld [vmem:[#allocation7 + $0xe10] sm:$0xff] }
 0x113   :  { %3150 = vmatpush1.bf16.msra.mxu0 %v3149_v49  ;;  %3406 = vmatpush1.bf16.msra.mxu1 %v3405_v50  ;;  %v3165_v49 = vpack.c.bf16 %v686_v35, %v678_v34  ;;  %v3421_v50 = vpack.c.bf16 %v688_v42, %v680_v41  ;;  %v734_v12 = vld [vmem:[#allocation7 + $0xe40] sm:$0xff]  ;;  %v736_v27 = vld [vmem:[#allocation7 + $0xe50] sm:$0xff]  ;;  %v743_v28 = vld [vmem:[#allocation7 + $0xe88] sm:$0xff] }
 0x114   :  { %3152 = vmatprep.subr.bf16.mxu0 %v3151_v30  ;;  %3408 = vmatprep.subr.bf16.mxu1 %v3407_v52  ;;  %v3167_v30 = vpack.c.bf16 %v703_v44, %v695_v43  ;;  %v3423_v52 = vpack.c.bf16 %v705_v48, %v697_v46  ;;  %v751_v29 = vld [vmem:[#allocation7 + $0xec8] sm:$0xff]  ;;  %v745_v31 = vld [vmem:[#allocation7 + $0xe98] sm:$0xff]  ;;  %v742_v34 = vld [vmem:[#allocation7 + $0xe80] sm:$0xff] }
 0x115   :  { %v753_v19 = vld [vmem:[#allocation7 + $0xed8] sm:$0xff]  ;;  %v750_v35 = vld [vmem:[#allocation7 + $0xec0] sm:$0xff]  ;;  %v744_v41 = vld [vmem:[#allocation7 + $0xe90] sm:$0xff] }
 0x116   :  { %v752_v42 = vld [vmem:[#allocation7 + $0xed0] sm:$0xff]  ;;  %v759_v43 = vld [vmem:[#allocation7 + $0xf08] sm:$0xff]  ;;  %v761_v46 = vld [vmem:[#allocation7 + $0xf18] sm:$0xff] }
 0x117   :  { %3154 = vmatpush1.bf16.msra.mxu0 %v3153_v60  ;;  %3410 = vmatpush1.bf16.msra.mxu1 %v3409_v40  ;;  %v3169_v60 = vpack.c.bf16 %v702_v45, %v694_v51  ;;  %v3425_v40 = vpack.c.bf16 %v704_v54, %v696_v53  ;;  %v767_v44 = vld [vmem:[#allocation7 + $0xf48] sm:$0xff]  ;;  %v769_v48 = vld [vmem:[#allocation7 + $0xf58] sm:$0xff]  ;;  %v758_v51 = vld [vmem:[#allocation7 + $0xf00] sm:$0xff] }
 0x118   :  { %3156 = vmatprep.subr.bf16.mxu0 %v3155_v63  ;;  %3412 = vmatprep.subr.bf16.mxu1 %v3411_v0  ;;  %v3171_v63 = vpack.c.bf16 %v719_v56, %v711_v55  ;;  %v3427_v0 = vpack.c.bf16 %v721_v58, %v713_v57  ;;  %v766_v45 = vld [vmem:[#allocation7 + $0xf40] sm:$0xff]  ;;  %v760_v53 = vld [vmem:[#allocation7 + $0xf10] sm:$0xff]  ;;  %v775_v55 = vld [vmem:[#allocation7 + $0xf88] sm:$0xff] }
 0x119   :  { %v768_v54 = vld [vmem:[#allocation7 + $0xf50] sm:$0xff]  ;;  %v783_v56 = vld [vmem:[#allocation7 + $0xfc8] sm:$0xff]  ;;  %v777_v57 = vld [vmem:[#allocation7 + $0xf98] sm:$0xff] }
 0x11a   :  { %v785_v58 = vld [vmem:[#allocation7 + $0xfd8] sm:$0xff] }
 0x11b   :  { %3158 = vmatpush1.bf16.msra.mxu0 %v3157_v7  ;;  %3414 = vmatpush1.bf16.msra.mxu1 %v3413_v9  ;;  %v3173_v7 = vpack.c.bf16 %v718_v62, %v710_v61  ;;  %v3429_v9 = vpack.c.bf16 %v720_v2, %v712_v1  ;;  %v774_v61 = vld [vmem:[#allocation7 + $0xf80] sm:$0xff]  ;;  %v776_v1 = vld [vmem:[#allocation7 + $0xf90] sm:$0xff] }
 0x11c   :  { %3160 = vmatprep.subr.bf16.mxu0 %v3159_v21  ;;  %3416 = vmatprep.subr.bf16.mxu1 %v3415_v23  ;;  %v3175_v21 = vpack.c.bf16 %v735_v4, %v727_v3  ;;  %v3431_v23 = vpack.c.bf16 %v737_v6, %v729_v5  ;;  %v782_v62 = vld [vmem:[#allocation7 + $0xfc0] sm:$0xff]  ;;  %v784_v2 = vld [vmem:[#allocation7 + $0xfd0] sm:$0xff]  ;;  %v791_v3 = vld [vmem:[#allocation7 + $0x1008] sm:$0xff] }
 0x11d   :  { %v799_v4 = vld [vmem:[#allocation7 + $0x1048] sm:$0xff]  ;;  %v793_v5 = vld [vmem:[#allocation7 + $0x1018] sm:$0xff] }
 0x11e   :  { %v801_v6 = vld [vmem:[#allocation7 + $0x1058] sm:$0xff] }
 0x11f   :  { %3162 = vmatpush1.bf16.msra.mxu0 %v3161_v32  ;;  %3418 = vmatpush1.bf16.msra.mxu1 %v3417_v33  ;;  %v3177_v32 = vpack.c.bf16 %v734_v12, %v726_v10  ;;  %v3433_v33 = vpack.c.bf16 %v736_v27, %v728_v24  ;;  %v3191_v10 = vpack.c.bf16 %v799_v4, %v791_v3  ;;  %v792_v24 = vld [vmem:[#allocation7 + $0x1010] sm:$0xff]  ;;  %v855_v3 = vld [vmem:[#allocation7 + $0x1208] sm:$0xff] }
 0x120   :  { %3164 = vmatprep.subr.bf16.mxu0 %v3163_v36  ;;  %3420 = vmatprep.subr.bf16.mxu1 %v3419_v39  ;;  %v3179_v36 = vpack.c.bf16 %v751_v29, %v743_v28  ;;  %v3435_v39 = vpack.c.bf16 %v753_v19, %v745_v31  ;;  %v3447_v12 = vpack.c.bf16 %v801_v6, %v793_v5  ;;  %v800_v27 = vld [vmem:[#allocation7 + $0x1050] sm:$0xff]  ;;  %v807_v28 = vld [vmem:[#allocation7 + $0x1088] sm:$0xff]  ;;  %v809_v31 = vld [vmem:[#allocation7 + $0x1098] sm:$0xff] }
 0x121   :  { %v815_v29 = vld [vmem:[#allocation7 + $0x10c8] sm:$0xff]  ;;  %v817_v19 = vld [vmem:[#allocation7 + $0x10d8] sm:$0xff] }
 0x122   :  { %v863_v4 = vld [vmem:[#allocation7 + $0x1248] sm:$0xff]  ;;  %v857_v5 = vld [vmem:[#allocation7 + $0x1218] sm:$0xff] }
 0x123   :  { %3166 = vmatpush1.bf16.msra.mxu0 %v3165_v49  ;;  %3422 = vmatpush1.bf16.msra.mxu1 %v3421_v50  ;;  %v3181_v49 = vpack.c.bf16 %v750_v35, %v742_v34  ;;  %v3437_v50 = vpack.c.bf16 %v752_v42, %v744_v41  ;;  %v3449_v34 = vpack.c.bf16 %v800_v27, %v792_v24  ;;  %v806_v35 = vld [vmem:[#allocation7 + $0x1080] sm:$0xff]  ;;  %v4650_v41 = vmax.f32 %v4619_v22, 0.0  ;;  %v865_v6 = vld [vmem:[#allocation7 + $0x1258] sm:$0xff]  ;;  %v864_v27 = vld [vmem:[#allocation7 + $0x1250] sm:$0xff] }
 0x124   :  { %3168 = vmatprep.subr.bf16.mxu0 %v3167_v30  ;;  %3424 = vmatprep.subr.bf16.mxu1 %v3423_v52  ;;  %v3183_v30 = vpack.c.bf16 %v767_v44, %v759_v43  ;;  %v3439_v52 = vpack.c.bf16 %v769_v48, %v761_v46  ;;  %v3195_v42 = vpack.c.bf16 %v815_v29, %v807_v28  ;;  %v816_v44 = vld [vmem:[#allocation7 + $0x10d0] sm:$0xff]  ;;  %v823_v46 = vld [vmem:[#allocation7 + $0x1108] sm:$0xff] }
 0x125   :  { %v3451_v43 = vpack.c.bf16 %v817_v19, %v809_v31  ;;  %v831_v48 = vld [vmem:[#allocation7 + $0x1148] sm:$0xff]  ;;  %v3463_v24 = vpack.c.bf16 %v865_v6, %v857_v5  ;;  %v873_v31 = vld [vmem:[#allocation7 + $0x1298] sm:$0xff] }
 0x126   :  { %v871_v28 = vld [vmem:[#allocation7 + $0x1288] sm:$0xff]  ;;  %v881_v19 = vld [vmem:[#allocation7 + $0x12d8] sm:$0xff] }
 0x127   :  { %3170 = vmatpush1.bf16.msra.mxu0 %v3169_v60  ;;  %3426 = vmatpush1.bf16.msra.mxu1 %v3425_v40  ;;  %v3185_v60 = vpack.c.bf16 %v766_v45, %v758_v51  ;;  %v3441_v40 = vpack.c.bf16 %v768_v54, %v760_v53  ;;  %v3199_v51 = vpack.c.bf16 %v831_v48, %v823_v46  ;;  %v822_v45 = vld [vmem:[#allocation7 + $0x1100] sm:$0xff]  ;;  %v832_v54 = vld [vmem:[#allocation7 + $0x1150] sm:$0xff]  ;;  %v879_v29 = vld [vmem:[#allocation7 + $0x12c8] sm:$0xff] }
 0x128   :  { %3172 = vmatprep.subr.bf16.mxu0 %v3171_v63  ;;  %3428 = vmatprep.subr.bf16.mxu1 %v3427_v0  ;;  %v3187_v63 = vpack.c.bf16 %v783_v56, %v775_v55  ;;  %v3443_v0 = vpack.c.bf16 %v785_v58, %v777_v57  ;;  %v839_v55 = vld [vmem:[#allocation7 + $0x1188] sm:$0xff]  ;;  %v841_v57 = vld [vmem:[#allocation7 + $0x1198] sm:$0xff] }
 0x129   :  { %v847_v56 = vld [vmem:[#allocation7 + $0x11c8] sm:$0xff]  ;;  %v849_v58 = vld [vmem:[#allocation7 + $0x11d8] sm:$0xff] }
 0x12a   :  { %v887_v46 = vld [vmem:[#allocation7 + $0x1308] sm:$0xff]  ;;  %v921_v5 = vld [vmem:[#allocation7 + $0x1418] sm:$0xff] }
 0x12b   :  { %3174 = vmatpush1.bf16.msra.mxu0 %v3173_v7  ;;  %3430 = vmatpush1.bf16.msra.mxu1 %v3429_v9  ;;  %v3189_v7 = vpack.c.bf16 %v782_v62, %v774_v61  ;;  %v3445_v9 = vpack.c.bf16 %v784_v2, %v776_v1  ;;  %v3203_v61 = vpack.c.bf16 %v847_v56, %v839_v55  ;;  %v838_v62 = vld [vmem:[#allocation7 + $0x1180] sm:$0xff]  ;;  %v848_v2 = vld [vmem:[#allocation7 + $0x11d0] sm:$0xff]  ;;  %v895_v48 = vld [vmem:[#allocation7 + $0x1348] sm:$0xff] }
 0x12c   :  { %3176 = vmatprep.subr.bf16.mxu0 %v3175_v21  ;;  %3432 = vmatprep.subr.bf16.mxu1 %v3431_v23  ;;  %v790_v21 = vld [vmem:[#allocation7 + $0x1000] sm:$0xff]  ;;  %v3459_v1 = vpack.c.bf16 %v849_v58, %v841_v57  ;;  %v903_v55 = vld [vmem:[#allocation7 + $0x1388] sm:$0xff]  ;;  %v905_v57 = vld [vmem:[#allocation7 + $0x1398] sm:$0xff] }
 0x12d   :  { %v798_v23 = vld [vmem:[#allocation7 + $0x1040] sm:$0xff]  ;;  %v911_v56 = vld [vmem:[#allocation7 + $0x13c8] sm:$0xff]  ;;  %v913_v58 = vld [vmem:[#allocation7 + $0x13d8] sm:$0xff] }
 0x12e   :  { %v929_v6 = vld [vmem:[#allocation7 + $0x1458] sm:$0xff] }
 0x12f   :  { %3178 = vmatpush1.bf16.msra.mxu0 %v3177_v32  ;;  %3434 = vmatpush1.bf16.msra.mxu1 %v3433_v33  ;;  %v3193_v32 = vpack.c.bf16 %v798_v23, %v790_v21  ;;  %v4647_v33 = vmax.f32 %v4615_v8, 0.0  ;;  %v825_v8 = vld [vmem:[#allocation7 + $0x1118] sm:$0xff]  ;;  %v862_v21 = vld [vmem:[#allocation7 + $0x1240] sm:$0xff]  ;;  %v856_v23 = vld [vmem:[#allocation7 + $0x1210] sm:$0xff] }
 0x130   :  { %3180 = vmatprep.subr.bf16.mxu0 %v3179_v36  ;;  %3436 = vmatprep.subr.bf16.mxu1 %v3435_v39  ;;  %v814_v36 = vld [vmem:[#allocation7 + $0x10c0] sm:$0xff]  ;;  %v808_v39 = vld [vmem:[#allocation7 + $0x1090] sm:$0xff] }
 0x131   :  { %v3453_v22 = vpack.c.bf16 %v816_v44, %v808_v39  ;;  %v878_v39 = vld [vmem:[#allocation7 + $0x12c0] sm:$0xff]  ;;  %v880_v44 = vld [vmem:[#allocation7 + $0x12d0] sm:$0xff] }
 0x133   :  { %3182 = vmatpush1.bf16.msra.mxu0 %v3181_v49  ;;  %3438 = vmatpush1.bf16.msra.mxu1 %v3437_v50  ;;  %v833_v49 = vld [vmem:[#allocation7 + $0x1158] sm:$0xff]  ;;  %v3197_v50 = vpack.c.bf16 %v814_v36, %v806_v35  ;;  %v3211_v35 = vpack.c.bf16 %v879_v29, %v871_v28  ;;  %v870_v36 = vld [vmem:[#allocation7 + $0x1280] sm:$0xff]  ;;  %v935_v28 = vld [vmem:[#allocation7 + $0x1488] sm:$0xff] }
 0x134   :  { %3184 = vmatprep.subr.bf16.mxu0 %v3183_v30  ;;  %3440 = vmatprep.subr.bf16.mxu1 %v3439_v52  ;;  %v830_v30 = vld [vmem:[#allocation7 + $0x1140] sm:$0xff]  ;;  %v824_v52 = vld [vmem:[#allocation7 + $0x1110] sm:$0xff]  ;;  %v3455_v53 = vpack.c.bf16 %v833_v49, %v825_v8  ;;  %v889_v8 = vld [vmem:[#allocation7 + $0x1318] sm:$0xff] }
 0x135   :  { %v897_v49 = vld [vmem:[#allocation7 + $0x1358] sm:$0xff]  ;;  %v943_v29 = vld [vmem:[#allocation7 + $0x14c8] sm:$0xff] }
 0x137   :  { %3186 = vmatpush1.bf16.msra.mxu0 %v3185_v60  ;;  %3442 = vmatpush1.bf16.msra.mxu1 %v3441_v40  ;;  %v3201_v60 = vpack.c.bf16 %v830_v30, %v822_v45  ;;  %v3457_v40 = vpack.c.bf16 %v832_v54, %v824_v52  ;;  %v886_v45 = vld [vmem:[#allocation7 + $0x1300] sm:$0xff]  ;;  %v888_v52 = vld [vmem:[#allocation7 + $0x1310] sm:$0xff] }
 0x138   :  { %3188 = vmatprep.subr.bf16.mxu0 %v3187_v63  ;;  %3444 = vmatprep.subr.bf16.mxu1 %v3443_v0  ;;  %v846_v63 = vld [vmem:[#allocation7 + $0x11c0] sm:$0xff]  ;;  %v840_v0 = vld [vmem:[#allocation7 + $0x1190] sm:$0xff] }
 0x139   :  { %v894_v30 = vld [vmem:[#allocation7 + $0x1340] sm:$0xff]  ;;  %v896_v54 = vld [vmem:[#allocation7 + $0x1350] sm:$0xff] }
 0x13b   :  { %3190 = vmatpush1.bf16.msra.mxu0 %v3189_v7  ;;  %3446 = vmatpush1.bf16.msra.mxu1 %v3445_v9  ;;  %v3205_v7 = vpack.c.bf16 %v846_v63, %v838_v62  ;;  %v3461_v9 = vpack.c.bf16 %v848_v2, %v840_v0  ;;  %v902_v62 = vld [vmem:[#allocation7 + $0x1380] sm:$0xff]  ;;  %v904_v0 = vld [vmem:[#allocation7 + $0x1390] sm:$0xff] }
 0x13c   :  { %3192 = vmatprep.subr.bf16.mxu0 %v3191_v10  ;;  %3448 = vmatprep.subr.bf16.mxu1 %v3447_v12  ;;  %v3207_v10 = vpack.c.bf16 %v863_v4, %v855_v3  ;;  %v854_v12 = vld [vmem:[#allocation7 + $0x1200] sm:$0xff]  ;;  %v912_v2 = vld [vmem:[#allocation7 + $0x13d0] sm:$0xff]  ;;  %v919_v3 = vld [vmem:[#allocation7 + $0x1408] sm:$0xff] }
 0x13d   :  { %v910_v63 = vld [vmem:[#allocation7 + $0x13c0] sm:$0xff]  ;;  %v927_v4 = vld [vmem:[#allocation7 + $0x1448] sm:$0xff] }
 0x13e   :  { %1480 = vmatmul.mubr.f32.vlgmr.msra.gmra.mrb[0].mxu0 %v4647_v33  ;;  %1764 = vmatmul.mubr.f32.vlgmr.msra.gmra.mrb[0].mxu1 %v4647_v33 }
 0x13f   :  { %3194 = vmatpush1.bf16.msra.mxu0 %v3193_v32  ;;  %1550 = vmatprep.mubr.f32.mxu0 %v4650_v41  ;;  %v3209_v32 = vpack.c.bf16 %v862_v21, %v854_v12  ;;  %v918_v12 = vld [vmem:[#allocation7 + $0x1400] sm:$0xff] }
 0x140   :  { %3450 = vmatpush1.bf16.msra.mxu1 %v3449_v34  ;;  %1834 = vmatprep.mubr.f32.mxu1 %v4650_v41  ;;  %v3465_v34 = vpack.c.bf16 %v864_v27, %v856_v23  ;;  %v926_v21 = vld [vmem:[#allocation7 + $0x1440] sm:$0xff]  ;;  %v920_v23 = vld [vmem:[#allocation7 + $0x1410] sm:$0xff] }
 0x141   :  { %3196 = vmatprep.subr.bf16.mxu0 %v3195_v42  ;;  %3452 = vmatprep.subr.bf16.mxu1 %v3451_v43  ;;  %v872_v42 = vld [vmem:[#allocation7 + $0x1290] sm:$0xff]  ;;  %v3467_v43 = vpack.c.bf16 %v881_v19, %v873_v31  ;;  %v937_v31 = vld [vmem:[#allocation7 + $0x1498] sm:$0xff] }
 0x142   :  { %v928_v27 = vld [vmem:[#allocation7 + $0x1450] sm:$0xff]  ;;  %v945_v19 = vld [vmem:[#allocation7 + $0x14d8] sm:$0xff] }
 0x143   :  { %3198 = vmatpush1.bf16.msra.mxu0 %v3197_v50  ;;  %v3213_v50 = vpack.c.bf16 %v878_v39, %v870_v36  ;;  %v934_v36 = vld [vmem:[#allocation7 + $0x1480] sm:$0xff] }
 0x144   :  { %3454 = vmatpush1.bf16.msra.mxu1 %v3453_v22  ;;  %3200 = vmatprep.subr.bf16.mxu0 %v3199_v51  ;;  %v3469_v22 = vpack.c.bf16 %v880_v44, %v872_v42  ;;  %v3215_v51 = vpack.c.bf16 %v895_v48, %v887_v46  ;;  %v942_v39 = vld [vmem:[#allocation7 + $0x14c0] sm:$0xff]  ;;  %v936_v42 = vld [vmem:[#allocation7 + $0x1490] sm:$0xff]  ;;  %v951_v46 = vld [vmem:[#allocation7 + $0x1508] sm:$0xff] }
 0x145   :  { %3456 = vmatprep.subr.bf16.mxu1 %v3455_v53  ;;  %v3471_v53 = vpack.c.bf16 %v897_v49, %v889_v8  ;;  %v944_v44 = vld [vmem:[#allocation7 + $0x14d0] sm:$0xff]  ;;  %v959_v48 = vld [vmem:[#allocation7 + $0x1548] sm:$0xff]  ;;  %v953_v8 = vld [vmem:[#allocation7 + $0x1518] sm:$0xff] }
 0x146   :  { %v961_v49 = vld [vmem:[#allocation7 + $0x1558] sm:$0xff] }
 0x147   :  { %3202 = vmatpush1.bf16.msra.mxu0 %v3201_v60  ;;  %v3217_v60 = vpack.c.bf16 %v894_v30, %v886_v45  ;;  %v950_v45 = vld [vmem:[#allocation7 + $0x1500] sm:$0xff] }
 0x148   :  { %3458 = vmatpush1.bf16.msra.mxu1 %v3457_v40  ;;  %3204 = vmatprep.subr.bf16.mxu0 %v3203_v61  ;;  %v3473_v40 = vpack.c.bf16 %v896_v54, %v888_v52  ;;  %v3219_v61 = vpack.c.bf16 %v911_v56, %v903_v55  ;;  %v958_v30 = vld [vmem:[#allocation7 + $0x1540] sm:$0xff]  ;;  %v952_v52 = vld [vmem:[#allocation7 + $0x1510] sm:$0xff]  ;;  %v967_v55 = vld [vmem:[#allocation7 + $0x1588] sm:$0xff] }
 0x149   :  { %3460 = vmatprep.subr.bf16.mxu1 %v3459_v1  ;;  %v3475_v1 = vpack.c.bf16 %v913_v58, %v905_v57  ;;  %v960_v54 = vld [vmem:[#allocation7 + $0x1550] sm:$0xff]  ;;  %v975_v56 = vld [vmem:[#allocation7 + $0x15c8] sm:$0xff]  ;;  %v969_v57 = vld [vmem:[#allocation7 + $0x1598] sm:$0xff] }
 0x14a   :  { %v977_v58 = vld [vmem:[#allocation7 + $0x15d8] sm:$0xff] }
 0x14b   :  { %3206 = vmatpush1.bf16.msra.mxu0 %v3205_v7  ;;  %v3221_v7 = vpack.c.bf16 %v910_v63, %v902_v62  ;;  %v966_v62 = vld [vmem:[#allocation7 + $0x1580] sm:$0xff] }
 0x14c   :  { %3462 = vmatpush1.bf16.msra.mxu1 %v3461_v9  ;;  %3208 = vmatprep.subr.bf16.mxu0 %v3207_v10  ;;  %v3477_v9 = vpack.c.bf16 %v912_v2, %v904_v0  ;;  %v3223_v10 = vpack.c.bf16 %v927_v4, %v919_v3  ;;  %v974_v63 = vld [vmem:[#allocation7 + $0x15c0] sm:$0xff]  ;;  %v968_v0 = vld [vmem:[#allocation7 + $0x1590] sm:$0xff]  ;;  %v983_v3 = vld [vmem:[#allocation7 + $0x1608] sm:$0xff] }
 0x14d   :  { %3464 = vmatprep.subr.bf16.mxu1 %v3463_v24  ;;  %v3479_v24 = vpack.c.bf16 %v929_v6, %v921_v5  ;;  %v976_v2 = vld [vmem:[#allocation7 + $0x15d0] sm:$0xff]  ;;  %v991_v4 = vld [vmem:[#allocation7 + $0x1648] sm:$0xff]  ;;  %v985_v5 = vld [vmem:[#allocation7 + $0x1618] sm:$0xff] }
 0x14e   :  { %v993_v6 = vld [vmem:[#allocation7 + $0x1658] sm:$0xff] }
 0x14f   :  { %3210 = vmatpush1.bf16.msra.mxu0 %v3209_v32  ;;  %v3225_v32 = vpack.c.bf16 %v926_v21, %v918_v12  ;;  %v982_v12 = vld [vmem:[#allocation7 + $0x1600] sm:$0xff] }
 0x150   :  { %3466 = vmatpush1.bf16.msra.mxu1 %v3465_v34  ;;  %3212 = vmatprep.subr.bf16.mxu0 %v3211_v35  ;;  %v3481_v34 = vpack.c.bf16 %v928_v27, %v920_v23  ;;  %v3227_v35 = vpack.c.bf16 %v943_v29, %v935_v28  ;;  %v990_v21 = vld [vmem:[#allocation7 + $0x1640] sm:$0xff]  ;;  %v984_v23 = vld [vmem:[#allocation7 + $0x1610] sm:$0xff]  ;;  %v999_v28 = vld [vmem:[#allocation7 + $0x1688] sm:$0xff] }
 0x151   :  { %3468 = vmatprep.subr.bf16.mxu1 %v3467_v43  ;;  %v3483_v43 = vpack.c.bf16 %v945_v19, %v937_v31  ;;  %v992_v27 = vld [vmem:[#allocation7 + $0x1650] sm:$0xff]  ;;  %v1007_v29 = vld [vmem:[#allocation7 + $0x16c8] sm:$0xff]  ;;  %v1001_v31 = vld [vmem:[#allocation7 + $0x1698] sm:$0xff] }
 0x152   :  { %v1009_v19 = vld [vmem:[#allocation7 + $0x16d8] sm:$0xff] }
 0x153   :  { %3214 = vmatpush1.bf16.msra.mxu0 %v3213_v50  ;;  %v3229_v50 = vpack.c.bf16 %v942_v39, %v934_v36  ;;  %v998_v36 = vld [vmem:[#allocation7 + $0x1680] sm:$0xff] }
 0x154   :  { %3470 = vmatpush1.bf16.msra.mxu1 %v3469_v22  ;;  %3216 = vmatprep.subr.bf16.mxu0 %v3215_v51  ;;  %v3485_v22 = vpack.c.bf16 %v944_v44, %v936_v42  ;;  %v3231_v51 = vpack.c.bf16 %v959_v48, %v951_v46  ;;  %v1006_v39 = vld [vmem:[#allocation7 + $0x16c0] sm:$0xff]  ;;  %v1000_v42 = vld [vmem:[#allocation7 + $0x1690] sm:$0xff]  ;;  %v1015_v46 = vld [vmem:[#allocation7 + $0x1708] sm:$0xff] }
 0x155   :  { %3472 = vmatprep.subr.bf16.mxu1 %v3471_v53  ;;  %v3487_v53 = vpack.c.bf16 %v961_v49, %v953_v8  ;;  %v1008_v44 = vld [vmem:[#allocation7 + $0x16d0] sm:$0xff]  ;;  %v1023_v48 = vld [vmem:[#allocation7 + $0x1748] sm:$0xff]  ;;  %v1017_v8 = vld [vmem:[#allocation7 + $0x1718] sm:$0xff] }
 0x156   :  { %v1025_v49 = vld [vmem:[#allocation7 + $0x1758] sm:$0xff] }
 0x157   :  { %3218 = vmatpush1.bf16.msra.mxu0 %v3217_v60  ;;  %v3233_v60 = vpack.c.bf16 %v958_v30, %v950_v45  ;;  %v1014_v45 = vld [vmem:[#allocation7 + $0x1700] sm:$0xff] }
 0x158   :  { %3474 = vmatpush1.bf16.msra.mxu1 %v3473_v40  ;;  %3220 = vmatprep.subr.bf16.mxu0 %v3219_v61  ;;  %v3489_v40 = vpack.c.bf16 %v960_v54, %v952_v52  ;;  %v3235_v61 = vpack.c.bf16 %v975_v56, %v967_v55  ;;  %v1022_v30 = vld [vmem:[#allocation7 + $0x1740] sm:$0xff]  ;;  %v1016_v52 = vld [vmem:[#allocation7 + $0x1710] sm:$0xff]  ;;  %v1031_v55 = vld [vmem:[#allocation7 + $0x1788] sm:$0xff] }
 0x159   :  { %3476 = vmatprep.subr.bf16.mxu1 %v3475_v1  ;;  %v3491_v1 = vpack.c.bf16 %v977_v58, %v969_v57  ;;  %v1024_v54 = vld [vmem:[#allocation7 + $0x1750] sm:$0xff]  ;;  %v1039_v56 = vld [vmem:[#allocation7 + $0x17c8] sm:$0xff]  ;;  %v1033_v57 = vld [vmem:[#allocation7 + $0x1798] sm:$0xff] }
 0x15a   :  { %v1041_v58 = vld [vmem:[#allocation7 + $0x17d8] sm:$0xff] }
 0x15b   :  { %3222 = vmatpush1.bf16.msra.mxu0 %v3221_v7  ;;  %v3237_v7 = vpack.c.bf16 %v974_v63, %v966_v62  ;;  %v1030_v62 = vld [vmem:[#allocation7 + $0x1780] sm:$0xff] }
 0x15c   :  { %3478 = vmatpush1.bf16.msra.mxu1 %v3477_v9  ;;  %3224 = vmatprep.subr.bf16.mxu0 %v3223_v10  ;;  %v3493_v9 = vpack.c.bf16 %v976_v2, %v968_v0  ;;  %v3239_v10 = vpack.c.bf16 %v991_v4, %v983_v3  ;;  %v1038_v63 = vld [vmem:[#allocation7 + $0x17c0] sm:$0xff]  ;;  %v1032_v0 = vld [vmem:[#allocation7 + $0x1790] sm:$0xff]  ;;  %v1047_v3 = vld [vmem:[#allocation7 + $0x1808] sm:$0xff] }
 0x15d   :  { %3480 = vmatprep.subr.bf16.mxu1 %v3479_v24  ;;  %v3495_v24 = vpack.c.bf16 %v993_v6, %v985_v5  ;;  %v1040_v2 = vld [vmem:[#allocation7 + $0x17d0] sm:$0xff]  ;;  %v1055_v4 = vld [vmem:[#allocation7 + $0x1848] sm:$0xff]  ;;  %v1049_v5 = vld [vmem:[#allocation7 + $0x1818] sm:$0xff] }
 0x15e   :  { %v1057_v6 = vld [vmem:[#allocation7 + $0x1858] sm:$0xff] }
 0x15f   :  { %3226 = vmatpush1.bf16.msra.mxu0 %v3225_v32  ;;  %v3241_v32 = vpack.c.bf16 %v990_v21, %v982_v12  ;;  %v1046_v12 = vld [vmem:[#allocation7 + $0x1800] sm:$0xff] }
 0x160   :  { %3482 = vmatpush1.bf16.msra.mxu1 %v3481_v34  ;;  %3228 = vmatprep.subr.bf16.mxu0 %v3227_v35  ;;  %v3497_v34 = vpack.c.bf16 %v992_v27, %v984_v23  ;;  %v3243_v35 = vpack.c.bf16 %v1007_v29, %v999_v28  ;;  %v1054_v21 = vld [vmem:[#allocation7 + $0x1840] sm:$0xff]  ;;  %v3511_v23 = vpack.c.bf16 %v1057_v6, %v1049_v5  ;;  %v1056_v27 = vld [vmem:[#allocation7 + $0x1850] sm:$0xff]  ;;  %v1063_v28 = vld [vmem:[#allocation7 + $0x1888] sm:$0xff] }
 0x161   :  { %3484 = vmatprep.subr.bf16.mxu1 %v3483_v43  ;;  %v3499_v43 = vpack.c.bf16 %v1009_v19, %v1001_v31  ;;  %v1071_v29 = vld [vmem:[#allocation7 + $0x18c8] sm:$0xff]  ;;  %v3257_v31 = vpack.c.bf16 %v1054_v21, %v1046_v12  ;;  %v1065_v19 = vld [vmem:[#allocation7 + $0x1898] sm:$0xff]  ;;  %v1110_v12 = vld [vmem:[#allocation7 + $0x1a00] sm:$0xff] }
 0x162   :  { %v1113_v5 = vld [vmem:[#allocation7 + $0x1a18] sm:$0xff]  ;;  %v1118_v21 = vld [vmem:[#allocation7 + $0x1a40] sm:$0xff] }
 0x163   :  { %3230 = vmatpush1.bf16.msra.mxu0 %v3229_v50  ;;  %v3245_v50 = vpack.c.bf16 %v1006_v39, %v998_v36  ;;  %v1062_v36 = vld [vmem:[#allocation7 + $0x1880] sm:$0xff]  ;;  %v1121_v6 = vld [vmem:[#allocation7 + $0x1a58] sm:$0xff] }
 0x164   :  { %3486 = vmatpush1.bf16.msra.mxu1 %v3485_v22  ;;  %3232 = vmatprep.subr.bf16.mxu0 %v3231_v51  ;;  %v3501_v22 = vpack.c.bf16 %v1008_v44, %v1000_v42  ;;  %v3247_v51 = vpack.c.bf16 %v1023_v48, %v1015_v46  ;;  %v1070_v39 = vld [vmem:[#allocation7 + $0x18c0] sm:$0xff]  ;;  %v1064_v42 = vld [vmem:[#allocation7 + $0x1890] sm:$0xff]  ;;  %v1079_v46 = vld [vmem:[#allocation7 + $0x1908] sm:$0xff] }
 0x165   :  { %3488 = vmatprep.subr.bf16.mxu1 %v3487_v53  ;;  %v3503_v53 = vpack.c.bf16 %v1025_v49, %v1017_v8  ;;  %v1072_v44 = vld [vmem:[#allocation7 + $0x18d0] sm:$0xff]  ;;  %v1087_v48 = vld [vmem:[#allocation7 + $0x1948] sm:$0xff]  ;;  %v4661_v8 = vmax.f32 %v4639_v38, 0.0 }
 0x167   :  { %3234 = vmatpush1.bf16.msra.mxu0 %v3233_v60  ;;  %v3249_v60 = vpack.c.bf16 %v1022_v30, %v1014_v45  ;;  %v3263_v45 = vpack.c.bf16 %v1087_v48, %v1079_v46  ;;  %v1078_v30 = vld [vmem:[#allocation7 + $0x1900] sm:$0xff]  ;;  %v1136_v46 = vld [vmem:[#allocation7 + $0x1ad0] sm:$0xff]  ;;  %v1143_v48 = vld [vmem:[#allocation7 + $0x1b08] sm:$0xff] }
 0x168   :  { %3490 = vmatpush1.bf16.msra.mxu1 %v3489_v40  ;;  %3236 = vmatprep.subr.bf16.mxu0 %v3235_v61  ;;  %v3505_v40 = vpack.c.bf16 %v1024_v54, %v1016_v52  ;;  %v3251_v61 = vpack.c.bf16 %v1039_v56, %v1031_v55  ;;  %v1086_v52 = vld [vmem:[#allocation7 + $0x1940] sm:$0xff]  ;;  %v1088_v54 = vld [vmem:[#allocation7 + $0x1950] sm:$0xff]  ;;  %v1095_v55 = vld [vmem:[#allocation7 + $0x1988] sm:$0xff] }
 0x169   :  { %3492 = vmatprep.subr.bf16.mxu1 %v3491_v1  ;;  %v3507_v1 = vpack.c.bf16 %v1041_v58, %v1033_v57  ;;  %v1103_v56 = vld [vmem:[#allocation7 + $0x19c8] sm:$0xff]  ;;  %v1097_v57 = vld [vmem:[#allocation7 + $0x1998] sm:$0xff] }
 0x16a   :  { %v1105_v58 = vld [vmem:[#allocation7 + $0x19d8] sm:$0xff] }
 0x16b   :  { %3238 = vmatpush1.bf16.msra.mxu0 %v3237_v7  ;;  %v3253_v7 = vpack.c.bf16 %v1038_v63, %v1030_v62  ;;  %v1094_v62 = vld [vmem:[#allocation7 + $0x1980] sm:$0xff] }
 0x16c   :  { %3494 = vmatpush1.bf16.msra.mxu1 %v3493_v9  ;;  %3240 = vmatprep.subr.bf16.mxu0 %v3239_v10  ;;  %v3509_v9 = vpack.c.bf16 %v1040_v2, %v1032_v0  ;;  %v3255_v10 = vpack.c.bf16 %v1055_v4, %v1047_v3  ;;  %v1102_v63 = vld [vmem:[#allocation7 + $0x19c0] sm:$0xff]  ;;  %v1096_v0 = vld [vmem:[#allocation7 + $0x1990] sm:$0xff]  ;;  %v1111_v3 = vld [vmem:[#allocation7 + $0x1a08] sm:$0xff] }
 0x16d   :  { %3496 = vmatprep.subr.bf16.mxu1 %v3495_v24  ;;  %v1048_v24 = vld [vmem:[#allocation7 + $0x1810] sm:$0xff]  ;;  %v1119_v4 = vld [vmem:[#allocation7 + $0x1a48] sm:$0xff] }
 0x16e   :  { %v1104_v2 = vld [vmem:[#allocation7 + $0x19d0] sm:$0xff] }
 0x16f   :  { %3242 = vmatpush1.bf16.msra.mxu0 %v3241_v32  ;;  %v1073_v32 = vld [vmem:[#allocation7 + $0x18d8] sm:$0xff] }
 0x170   :  { %3498 = vmatpush1.bf16.msra.mxu1 %v3497_v34  ;;  %3244 = vmatprep.subr.bf16.mxu0 %v3243_v35  ;;  %v4657_v34 = vmax.f32 %v4637_v37, 0.0  ;;  %v3513_v35 = vpack.c.bf16 %v1056_v27, %v1048_v24  ;;  %v3515_v49 = vpack.c.bf16 %v1073_v32, %v1065_v19  ;;  %v3261_v37 = vpack.c.bf16 %v1070_v39, %v1062_v36  ;;  %v1120_v27 = vld [vmem:[#allocation7 + $0x1a50] sm:$0xff]  ;;  %v1137_v19 = vld [vmem:[#allocation7 + $0x1ad8] sm:$0xff]  ;;  %v1126_v39 = vld [vmem:[#allocation7 + $0x1a80] sm:$0xff] }
 0x171   :  { %3500 = vmatprep.subr.bf16.mxu1 %v3499_v43  ;;  %v3259_v43 = vpack.c.bf16 %v1071_v29, %v1063_v28  ;;  %v3527_v24 = vpack.c.bf16 %v1121_v6, %v1113_v5  ;;  %v1127_v28 = vld [vmem:[#allocation7 + $0x1a88] sm:$0xff]  ;;  %v3273_v32 = vpack.c.bf16 %v1118_v21, %v1110_v12  ;;  %v1177_v5 = vld [vmem:[#allocation7 + $0x1c18] sm:$0xff]  ;;  %v1174_v12 = vld [vmem:[#allocation7 + $0x1c00] sm:$0xff] }
 0x172   :  { %v1135_v29 = vld [vmem:[#allocation7 + $0x1ac8] sm:$0xff]  ;;  %v1185_v6 = vld [vmem:[#allocation7 + $0x1c58] sm:$0xff]  ;;  %v1182_v21 = vld [vmem:[#allocation7 + $0x1c40] sm:$0xff] }
 0x173   :  { %3246 = vmatpush1.bf16.msra.mxu0 %v3245_v50  ;;  %v1081_v50 = vld [vmem:[#allocation7 + $0x1918] sm:$0xff]  ;;  %v3275_v36 = vpack.c.bf16 %v1135_v29, %v1127_v28  ;;  %v1191_v28 = vld [vmem:[#allocation7 + $0x1c88] sm:$0xff] }
 0x174   :  { %3502 = vmatpush1.bf16.msra.mxu1 %v3501_v22  ;;  %3248 = vmatprep.subr.bf16.mxu0 %v3247_v51  ;;  %v1089_v22 = vld [vmem:[#allocation7 + $0x1958] sm:$0xff]  ;;  %v3517_v51 = vpack.c.bf16 %v1072_v44, %v1064_v42  ;;  %v1134_v42 = vld [vmem:[#allocation7 + $0x1ac0] sm:$0xff]  ;;  %v1199_v29 = vld [vmem:[#allocation7 + $0x1cc8] sm:$0xff] }
 0x175   :  { %3504 = vmatprep.subr.bf16.mxu1 %v3503_v53  ;;  %v1080_v53 = vld [vmem:[#allocation7 + $0x1910] sm:$0xff]  ;;  %v3519_v38 = vpack.c.bf16 %v1089_v22, %v1081_v50  ;;  %v1145_v50 = vld [vmem:[#allocation7 + $0x1b18] sm:$0xff] }
 0x176   :  { %v1153_v22 = vld [vmem:[#allocation7 + $0x1b58] sm:$0xff] }
 0x177   :  { %3250 = vmatpush1.bf16.msra.mxu0 %v3249_v60  ;;  %v3265_v60 = vpack.c.bf16 %v1086_v52, %v1078_v30  ;;  %v1142_v30 = vld [vmem:[#allocation7 + $0x1b00] sm:$0xff] }
 0x178   :  { %3506 = vmatpush1.bf16.msra.mxu1 %v3505_v40  ;;  %3252 = vmatprep.subr.bf16.mxu0 %v3251_v61  ;;  %v3521_v40 = vpack.c.bf16 %v1088_v54, %v1080_v53  ;;  %v3267_v61 = vpack.c.bf16 %v1103_v56, %v1095_v55  ;;  %v1150_v52 = vld [vmem:[#allocation7 + $0x1b40] sm:$0xff]  ;;  %v1144_v53 = vld [vmem:[#allocation7 + $0x1b10] sm:$0xff]  ;;  %v1159_v55 = vld [vmem:[#allocation7 + $0x1b88] sm:$0xff] }
 0x179   :  { %3508 = vmatprep.subr.bf16.mxu1 %v3507_v1  ;;  %v3523_v1 = vpack.c.bf16 %v1105_v58, %v1097_v57  ;;  %v1152_v54 = vld [vmem:[#allocation7 + $0x1b50] sm:$0xff]  ;;  %v1167_v56 = vld [vmem:[#allocation7 + $0x1bc8] sm:$0xff]  ;;  %v1161_v57 = vld [vmem:[#allocation7 + $0x1b98] sm:$0xff] }
 0x17a   :  { %v1169_v58 = vld [vmem:[#allocation7 + $0x1bd8] sm:$0xff] }
 0x17b   :  { %3254 = vmatpush1.bf16.msra.mxu0 %v3253_v7  ;;  %v3269_v7 = vpack.c.bf16 %v1102_v63, %v1094_v62  ;;  %v1158_v62 = vld [vmem:[#allocation7 + $0x1b80] sm:$0xff] }
 0x17c   :  { %3510 = vmatpush1.bf16.msra.mxu1 %v3509_v9  ;;  %3256 = vmatprep.subr.bf16.mxu0 %v3255_v10  ;;  %v3525_v9 = vpack.c.bf16 %v1104_v2, %v1096_v0  ;;  %v3271_v10 = vpack.c.bf16 %v1119_v4, %v1111_v3  ;;  %v1166_v63 = vld [vmem:[#allocation7 + $0x1bc0] sm:$0xff]  ;;  %v1160_v0 = vld [vmem:[#allocation7 + $0x1b90] sm:$0xff]  ;;  %v1175_v3 = vld [vmem:[#allocation7 + $0x1c08] sm:$0xff] }
 0x17d   :  { %3512 = vmatprep.subr.bf16.mxu1 %v3511_v23  ;;  %v1112_v23 = vld [vmem:[#allocation7 + $0x1a10] sm:$0xff]  ;;  %v1183_v4 = vld [vmem:[#allocation7 + $0x1c48] sm:$0xff] }
 0x17e   :  { %1551 = vmatmul.mubr.f32.vlgmr.msra.gmra.mrb[0].mxu0 %v4657_v34  ;;  %v1168_v2 = vld [vmem:[#allocation7 + $0x1bd0] sm:$0xff] }
 0x17f   :  { %1835 = vmatmul.mubr.f32.vlgmr.msra.gmra.mrb[0].mxu1 %v4657_v34  ;;  %3258 = vmatpush1.bf16.msra.mxu0 %v3257_v31  ;;  %v1129_v31 = vld [vmem:[#allocation7 + $0x1a98] sm:$0xff] }
 0x180   :  { %1621 = vmatprep.mubr.f32.mxu0 %v4661_v8  ;;  %3514 = vmatpush1.bf16.msra.mxu1 %v3513_v35  ;;  %v3529_v35 = vpack.c.bf16 %v1120_v27, %v1112_v23  ;;  %v3531_v44 = vpack.c.bf16 %v1137_v19, %v1129_v31  ;;  %v1176_v23 = vld [vmem:[#allocation7 + $0x1c10] sm:$0xff]  ;;  %v1193_v31 = vld [vmem:[#allocation7 + $0x1c98] sm:$0xff] }
 0x181   :  { %1905 = vmatprep.mubr.f32.mxu1 %v4661_v8  ;;  %3260 = vmatprep.subr.bf16.mxu0 %v3259_v43  ;;  %v1128_v43 = vld [vmem:[#allocation7 + $0x1a90] sm:$0xff]  ;;  %v1201_v19 = vld [vmem:[#allocation7 + $0x1cd8] sm:$0xff] }
 0x182   :  { %3516 = vmatprep.subr.bf16.mxu1 %v3515_v49  ;;  %v1151_v49 = vld [vmem:[#allocation7 + $0x1b48] sm:$0xff]  ;;  %v1184_v27 = vld [vmem:[#allocation7 + $0x1c50] sm:$0xff] }
 0x183   :  { %3262 = vmatpush1.bf16.msra.mxu0 %v3261_v37  ;;  %v3277_v37 = vpack.c.bf16 %v1134_v42, %v1126_v39  ;;  %v1190_v39 = vld [vmem:[#allocation7 + $0x1c80] sm:$0xff] }
 0x184   :  { %3518 = vmatpush1.bf16.msra.mxu1 %v3517_v51  ;;  %3264 = vmatprep.subr.bf16.mxu0 %v3263_v45  ;;  %v3533_v51 = vpack.c.bf16 %v1136_v46, %v1128_v43  ;;  %v3279_v45 = vpack.c.bf16 %v1151_v49, %v1143_v48  ;;  %v1198_v42 = vld [vmem:[#allocation7 + $0x1cc0] sm:$0xff]  ;;  %v1192_v43 = vld [vmem:[#allocation7 + $0x1c90] sm:$0xff]  ;;  %v1207_v48 = vld [vmem:[#allocation7 + $0x1d08] sm:$0xff] }
 0x185   :  { %3520 = vmatprep.subr.bf16.mxu1 %v3519_v38  ;;  %v3535_v38 = vpack.c.bf16 %v1153_v22, %v1145_v50  ;;  %v1200_v46 = vld [vmem:[#allocation7 + $0x1cd0] sm:$0xff]  ;;  %v1215_v49 = vld [vmem:[#allocation7 + $0x1d48] sm:$0xff]  ;;  %v1209_v50 = vld [vmem:[#allocation7 + $0x1d18] sm:$0xff] }
 0x186   :  { %v1217_v22 = vld [vmem:[#allocation7 + $0x1d58] sm:$0xff] }
 0x187   :  { %3266 = vmatpush1.bf16.msra.mxu0 %v3265_v60  ;;  %v3281_v60 = vpack.c.bf16 %v1150_v52, %v1142_v30  ;;  %v1206_v30 = vld [vmem:[#allocation7 + $0x1d00] sm:$0xff] }
 0x188   :  { %3522 = vmatpush1.bf16.msra.mxu1 %v3521_v40  ;;  %3268 = vmatprep.subr.bf16.mxu0 %v3267_v61  ;;  %v3537_v40 = vpack.c.bf16 %v1152_v54, %v1144_v53  ;;  %v3283_v61 = vpack.c.bf16 %v1167_v56, %v1159_v55  ;;  %v1214_v52 = vld [vmem:[#allocation7 + $0x1d40] sm:$0xff]  ;;  %v1208_v53 = vld [vmem:[#allocation7 + $0x1d10] sm:$0xff]  ;;  %v1223_v55 = vld [vmem:[#allocation7 + $0x1d88] sm:$0xff] }
 0x189   :  { %3524 = vmatprep.subr.bf16.mxu1 %v3523_v1  ;;  %v3539_v1 = vpack.c.bf16 %v1169_v58, %v1161_v57  ;;  %v1216_v54 = vld [vmem:[#allocation7 + $0x1d50] sm:$0xff]  ;;  %v1231_v56 = vld [vmem:[#allocation7 + $0x1dc8] sm:$0xff]  ;;  %v1225_v57 = vld [vmem:[#allocation7 + $0x1d98] sm:$0xff] }
 0x18a   :  { %v1233_v58 = vld [vmem:[#allocation7 + $0x1dd8] sm:$0xff] }
 0x18b   :  { %3270 = vmatpush1.bf16.msra.mxu0 %v3269_v7  ;;  %v3285_v7 = vpack.c.bf16 %v1166_v63, %v1158_v62  ;;  %v1222_v62 = vld [vmem:[#allocation7 + $0x1d80] sm:$0xff] }
 0x18c   :  { %3526 = vmatpush1.bf16.msra.mxu1 %v3525_v9  ;;  %3272 = vmatprep.subr.bf16.mxu0 %v3271_v10  ;;  %v3541_v9 = vpack.c.bf16 %v1168_v2, %v1160_v0  ;;  %v3287_v10 = vpack.c.bf16 %v1183_v4, %v1175_v3  ;;  %v1230_v63 = vld [vmem:[#allocation7 + $0x1dc0] sm:$0xff]  ;;  %v1224_v0 = vld [vmem:[#allocation7 + $0x1d90] sm:$0xff]  ;;  %v1239_v3 = vld [vmem:[#allocation7 + $0x1e08] sm:$0xff] }
 0x18d   :  { %3528 = vmatprep.subr.bf16.mxu1 %v3527_v24  ;;  %v3543_v24 = vpack.c.bf16 %v1185_v6, %v1177_v5  ;;  %v1232_v2 = vld [vmem:[#allocation7 + $0x1dd0] sm:$0xff]  ;;  %v1247_v4 = vld [vmem:[#allocation7 + $0x1e48] sm:$0xff]  ;;  %v1241_v5 = vld [vmem:[#allocation7 + $0x1e18] sm:$0xff] }
 0x18e   :  { %v1249_v6 = vld [vmem:[#allocation7 + $0x1e58] sm:$0xff] }
 0x18f   :  { %3274 = vmatpush1.bf16.msra.mxu0 %v3273_v32  ;;  %v3289_v32 = vpack.c.bf16 %v1182_v21, %v1174_v12  ;;  %v1238_v12 = vld [vmem:[#allocation7 + $0x1e00] sm:$0xff] }
 0x190   :  { %3530 = vmatpush1.bf16.msra.mxu1 %v3529_v35  ;;  %3276 = vmatprep.subr.bf16.mxu0 %v3275_v36  ;;  %v3545_v35 = vpack.c.bf16 %v1184_v27, %v1176_v23  ;;  %v3291_v36 = vpack.c.bf16 %v1199_v29, %v1191_v28  ;;  %v1246_v21 = vld [vmem:[#allocation7 + $0x1e40] sm:$0xff]  ;;  %v1240_v23 = vld [vmem:[#allocation7 + $0x1e10] sm:$0xff]  ;;  %v1255_v28 = vld [vmem:[#allocation7 + $0x1e88] sm:$0xff] }
 0x191   :  { %3532 = vmatprep.subr.bf16.mxu1 %v3531_v44  ;;  %v3547_v44 = vpack.c.bf16 %v1201_v19, %v1193_v31  ;;  %v1248_v27 = vld [vmem:[#allocation7 + $0x1e50] sm:$0xff]  ;;  %v1263_v29 = vld [vmem:[#allocation7 + $0x1ec8] sm:$0xff]  ;;  %v1257_v31 = vld [vmem:[#allocation7 + $0x1e98] sm:$0xff] }
 0x192   :  { %v1265_v19 = vld [vmem:[#allocation7 + $0x1ed8] sm:$0xff] }
 0x193   :  { %3278 = vmatpush1.bf16.msra.mxu0 %v3277_v37  ;;  %v3293_v37 = vpack.c.bf16 %v1198_v42, %v1190_v39  ;;  %v1254_v39 = vld [vmem:[#allocation7 + $0x1e80] sm:$0xff] }
 0x194   :  { %3534 = vmatpush1.bf16.msra.mxu1 %v3533_v51  ;;  %3280 = vmatprep.subr.bf16.mxu0 %v3279_v45  ;;  %v3549_v51 = vpack.c.bf16 %v1200_v46, %v1192_v43  ;;  %v3295_v45 = vpack.c.bf16 %v1215_v49, %v1207_v48  ;;  %v1262_v42 = vld [vmem:[#allocation7 + $0x1ec0] sm:$0xff]  ;;  %v1256_v43 = vld [vmem:[#allocation7 + $0x1e90] sm:$0xff]  ;;  %v1271_v48 = vld [vmem:[#allocation7 + $0x1f08] sm:$0xff] }
 0x195   :  { %3536 = vmatprep.subr.bf16.mxu1 %v3535_v38  ;;  %v3551_v38 = vpack.c.bf16 %v1217_v22, %v1209_v50  ;;  %v1264_v46 = vld [vmem:[#allocation7 + $0x1ed0] sm:$0xff]  ;;  %v1279_v49 = vld [vmem:[#allocation7 + $0x1f48] sm:$0xff]  ;;  %v1273_v50 = vld [vmem:[#allocation7 + $0x1f18] sm:$0xff] }
 0x196   :  { %v1281_v22 = vld [vmem:[#allocation7 + $0x1f58] sm:$0xff] }
 0x197   :  { %3282 = vmatpush1.bf16.msra.mxu0 %v3281_v60  ;;  %v3297_v60 = vpack.c.bf16 %v1214_v52, %v1206_v30  ;;  %v1270_v30 = vld [vmem:[#allocation7 + $0x1f00] sm:$0xff] }
 0x198   :  { %3538 = vmatpush1.bf16.msra.mxu1 %v3537_v40  ;;  %3284 = vmatprep.subr.bf16.mxu0 %v3283_v61  ;;  %v3553_v40 = vpack.c.bf16 %v1216_v54, %v1208_v53  ;;  %v3299_v61 = vpack.c.bf16 %v1231_v56, %v1223_v55  ;;  %v1278_v52 = vld [vmem:[#allocation7 + $0x1f40] sm:$0xff]  ;;  %v1272_v53 = vld [vmem:[#allocation7 + $0x1f10] sm:$0xff]  ;;  %v1287_v55 = vld [vmem:[#allocation7 + $0x1f88] sm:$0xff] }
 0x199   :  { %3540 = vmatprep.subr.bf16.mxu1 %v3539_v1  ;;  %v3555_v1 = vpack.c.bf16 %v1233_v58, %v1225_v57  ;;  %v1280_v54 = vld [vmem:[#allocation7 + $0x1f50] sm:$0xff]  ;;  %v1295_v56 = vld [vmem:[#allocation7 + $0x1fc8] sm:$0xff]  ;;  %v1289_v57 = vld [vmem:[#allocation7 + $0x1f98] sm:$0xff] }
 0x19a   :  { %v1297_v58 = vld [vmem:[#allocation7 + $0x1fd8] sm:$0xff] }
 0x19b   :  { %3286 = vmatpush1.bf16.msra.mxu0 %v3285_v7  ;;  %v3301_v7 = vpack.c.bf16 %v1230_v63, %v1222_v62  ;;  %v1286_v62 = vld [vmem:[#allocation7 + $0x1f80] sm:$0xff] }
 0x19c   :  { %3542 = vmatpush1.bf16.msra.mxu1 %v3541_v9  ;;  %3288 = vmatprep.subr.bf16.mxu0 %v3287_v10  ;;  %v3557_v9 = vpack.c.bf16 %v1232_v2, %v1224_v0  ;;  %v3303_v10 = vpack.c.bf16 %v1247_v4, %v1239_v3  ;;  %v1294_v63 = vld [vmem:[#allocation7 + $0x1fc0] sm:$0xff]  ;;  %v1288_v0 = vld [vmem:[#allocation7 + $0x1f90] sm:$0xff]  ;;  %v283_v3 = vld [vmem:[#allocation7 + $0x28] sm:$0xff] }
 0x19d   :  { %3544 = vmatprep.subr.bf16.mxu1 %v3543_v24  ;;  %v3559_v24 = vpack.c.bf16 %v1249_v6, %v1241_v5  ;;  %v1296_v2 = vld [vmem:[#allocation7 + $0x1fd0] sm:$0xff]  ;;  %v291_v4 = vld [vmem:[#allocation7 + $0x68] sm:$0xff]  ;;  %v285_v5 = vld [vmem:[#allocation7 + $0x38] sm:$0xff] }
 0x19e   :  { %v293_v6 = vld [vmem:[#allocation7 + $0x78] sm:$0xff] }
 0x19f   :  { %3290 = vmatpush1.bf16.msra.mxu0 %v3289_v32  ;;  %v3305_v32 = vpack.c.bf16 %v1246_v21, %v1238_v12  ;;  %v282_v12 = vld [vmem:[#allocation7 + $0x20] sm:$0xff] }
 0x1a0   :  { %3546 = vmatpush1.bf16.msra.mxu1 %v3545_v35  ;;  %3292 = vmatprep.subr.bf16.mxu0 %v3291_v36  ;;  %v3561_v35 = vpack.c.bf16 %v1248_v27, %v1240_v23  ;;  %v3307_v36 = vpack.c.bf16 %v1263_v29, %v1255_v28  ;;  %v290_v21 = vld [vmem:[#allocation7 + $0x60] sm:$0xff]  ;;  %v3831_v23 = vpack.c.bf16 %v293_v6, %v285_v5  ;;  %v292_v27 = vld [vmem:[#allocation7 + $0x70] sm:$0xff]  ;;  %v299_v28 = vld [vmem:[#allocation7 + $0xa8] sm:$0xff] }
 0x1a1   :  { %3548 = vmatprep.subr.bf16.mxu1 %v3547_v44  ;;  %v3563_v44 = vpack.c.bf16 %v1265_v19, %v1257_v31  ;;  %v307_v29 = vld [vmem:[#allocation7 + $0xe8] sm:$0xff]  ;;  %v3577_v31 = vpack.c.bf16 %v290_v21, %v282_v12  ;;  %v301_v19 = vld [vmem:[#allocation7 + $0xb8] sm:$0xff]  ;;  %v354_v12 = vld [vmem:[#allocation7 + $0x260] sm:$0xff] }
 0x1a2   :  { %v357_v5 = vld [vmem:[#allocation7 + $0x278] sm:$0xff]  ;;  %v348_v21 = vld [vmem:[#allocation7 + $0x230] sm:$0xff] }
 0x1a3   :  { %3294 = vmatpush1.bf16.msra.mxu0 %v3293_v37  ;;  %v3309_v37 = vpack.c.bf16 %v1262_v42, %v1254_v39  ;;  %v298_v39 = vld [vmem:[#allocation7 + $0xa0] sm:$0xff] }
 0x1a4   :  { %3550 = vmatpush1.bf16.msra.mxu1 %v3549_v51  ;;  %3296 = vmatprep.subr.bf16.mxu0 %v3295_v45  ;;  %v3565_v51 = vpack.c.bf16 %v1264_v46, %v1256_v43  ;;  %v3311_v45 = vpack.c.bf16 %v1279_v49, %v1271_v48  ;;  %v306_v42 = vld [vmem:[#allocation7 + $0xe0] sm:$0xff]  ;;  %v300_v43 = vld [vmem:[#allocation7 + $0xb0] sm:$0xff]  ;;  %v315_v48 = vld [vmem:[#allocation7 + $0x128] sm:$0xff] }
 0x1a5   :  { %3552 = vmatprep.subr.bf16.mxu1 %v3551_v38  ;;  %v3567_v38 = vpack.c.bf16 %v1281_v22, %v1273_v50  ;;  %v308_v46 = vld [vmem:[#allocation7 + $0xf0] sm:$0xff]  ;;  %v323_v49 = vld [vmem:[#allocation7 + $0x168] sm:$0xff]  ;;  %v317_v22 = vld [vmem:[#allocation7 + $0x138] sm:$0xff] }
 0x1a7   :  { %3298 = vmatpush1.bf16.msra.mxu0 %v3297_v60  ;;  %v3313_v60 = vpack.c.bf16 %v1278_v52, %v1270_v30  ;;  %v314_v30 = vld [vmem:[#allocation7 + $0x120] sm:$0xff] }
 0x1a8   :  { %3554 = vmatpush1.bf16.msra.mxu1 %v3553_v40  ;;  %3300 = vmatprep.subr.bf16.mxu0 %v3299_v61  ;;  %v3569_v40 = vpack.c.bf16 %v1280_v54, %v1272_v53  ;;  %v3315_v61 = vpack.c.bf16 %v1295_v56, %v1287_v55  ;;  %v322_v52 = vld [vmem:[#allocation7 + $0x160] sm:$0xff]  ;;  %v316_v53 = vld [vmem:[#allocation7 + $0x130] sm:$0xff]  ;;  %v331_v55 = vld [vmem:[#allocation7 + $0x1a8] sm:$0xff] }
 0x1a9   :  { %3556 = vmatprep.subr.bf16.mxu1 %v3555_v1  ;;  %v3571_v1 = vpack.c.bf16 %v1297_v58, %v1289_v57  ;;  %v324_v54 = vld [vmem:[#allocation7 + $0x170] sm:$0xff]  ;;  %v339_v56 = vld [vmem:[#allocation7 + $0x1e8] sm:$0xff]  ;;  %v333_v57 = vld [vmem:[#allocation7 + $0x1b8] sm:$0xff] }
 0x1aa   :  { %v341_v58 = vld [vmem:[#allocation7 + $0x1f8] sm:$0xff] }
 0x1ab   :  { %3302 = vmatpush1.bf16.msra.mxu0 %v3301_v7  ;;  %v3317_v7 = vpack.c.bf16 %v1294_v63, %v1286_v62  ;;  %v330_v62 = vld [vmem:[#allocation7 + $0x1a0] sm:$0xff] }
 0x1ac   :  { %3558 = vmatpush1.bf16.msra.mxu1 %v3557_v9  ;;  %3304 = vmatprep.subr.bf16.mxu0 %v3303_v10  ;;  %v3573_v9 = vpack.c.bf16 %v1296_v2, %v1288_v0  ;;  %v3575_v10 = vpack.c.bf16 %v291_v4, %v283_v3  ;;  %v338_v63 = vld [vmem:[#allocation7 + $0x1e0] sm:$0xff]  ;;  %v332_v0 = vld [vmem:[#allocation7 + $0x1b0] sm:$0xff]  ;;  %v347_v2 = vld [vmem:[#allocation7 + $0x228] sm:$0xff] }
 0x1ad   :  { %3560 = vmatprep.subr.bf16.mxu1 %v3559_v24  ;;  %v284_v24 = vld [vmem:[#allocation7 + $0x30] sm:$0xff]  ;;  %v355_v3 = vld [vmem:[#allocation7 + $0x268] sm:$0xff]  ;;  %v349_v4 = vld [vmem:[#allocation7 + $0x238] sm:$0xff]  ;;  %v3589_v6 = vpack.c.bf16 %v338_v63, %v330_v62 }
 0x1ae   :  { %v402_v62 = vld [vmem:[#allocation7 + $0x3e0] sm:$0xff]  ;;  %v396_v63 = vld [vmem:[#allocation7 + $0x3b0] sm:$0xff] }
 0x1af   :  { %3306 = vmatpush1.bf16.msra.mxu0 %v3305_v32  ;;  %v309_v32 = vld [vmem:[#allocation7 + $0xf8] sm:$0xff] }
 0x1b0   :  { %3562 = vmatpush1.bf16.msra.mxu1 %v3561_v35  ;;  %3308 = vmatprep.subr.bf16.mxu0 %v3307_v36  ;;  %v4667_v35 = vmax.f32 %v4644_v59, 0.0  ;;  %v3833_v36 = vpack.c.bf16 %v292_v27, %v284_v24  ;;  %v3835_v50 = vpack.c.bf16 %v309_v32, %v301_v19  ;;  %v3581_v59 = vpack.c.bf16 %v306_v42, %v298_v39  ;;  %v356_v24 = vld [vmem:[#allocation7 + $0x270] sm:$0xff]  ;;  %v363_v27 = vld [vmem:[#allocation7 + $0x2a8] sm:$0xff]  ;;  %v362_v39 = vld [vmem:[#allocation7 + $0x2a0] sm:$0xff] }
 0x1b1   :  { %3564 = vmatprep.subr.bf16.mxu1 %v3563_v44  ;;  %v3579_v44 = vpack.c.bf16 %v307_v29, %v299_v28  ;;  %v371_v28 = vld [vmem:[#allocation7 + $0x2e8] sm:$0xff]  ;;  %v365_v29 = vld [vmem:[#allocation7 + $0x2b8] sm:$0xff]  ;;  %v3849_v32 = vpack.c.bf16 %v356_v24, %v348_v21  ;;  %v370_v42 = vld [vmem:[#allocation7 + $0x2e0] sm:$0xff] }
 0x1b2   :  { %v427_v24 = vld [vmem:[#allocation7 + $0x4a8] sm:$0xff] }
 0x1b3   :  { %3310 = vmatpush1.bf16.msra.mxu0 %v3309_v37  ;;  %v325_v37 = vld [vmem:[#allocation7 + $0x178] sm:$0xff] }
 0x1b4   :  { %3566 = vmatpush1.bf16.msra.mxu1 %v3565_v51  ;;  %3312 = vmatprep.subr.bf16.mxu0 %v3311_v45  ;;  %v3837_v51 = vpack.c.bf16 %v308_v46, %v300_v43  ;;  %v3583_v45 = vpack.c.bf16 %v323_v49, %v315_v48  ;;  %v364_v43 = vld [vmem:[#allocation7 + $0x2b0] sm:$0xff]  ;;  %v379_v48 = vld [vmem:[#allocation7 + $0x328] sm:$0xff] }
 0x1b5   :  { %3568 = vmatprep.subr.bf16.mxu1 %v3567_v38  ;;  %v3839_v38 = vpack.c.bf16 %v325_v37, %v317_v22  ;;  %v372_v46 = vld [vmem:[#allocation7 + $0x2f0] sm:$0xff]  ;;  %v387_v49 = vld [vmem:[#allocation7 + $0x368] sm:$0xff]  ;;  %v389_v22 = vld [vmem:[#allocation7 + $0x378] sm:$0xff]  ;;  %v3597_v37 = vpack.c.bf16 %v370_v42, %v362_v39 }
 0x1b6   :  { %v434_v39 = vld [vmem:[#allocation7 + $0x4e0] sm:$0xff]  ;;  %v428_v42 = vld [vmem:[#allocation7 + $0x4b0] sm:$0xff] }
 0x1b7   :  { %3314 = vmatpush1.bf16.msra.mxu0 %v3313_v60  ;;  %v3585_v60 = vpack.c.bf16 %v322_v52, %v314_v30  ;;  %v386_v30 = vld [vmem:[#allocation7 + $0x360] sm:$0xff]  ;;  %v380_v52 = vld [vmem:[#allocation7 + $0x330] sm:$0xff] }
 0x1b8   :  { %3570 = vmatpush1.bf16.msra.mxu1 %v3569_v40  ;;  %3316 = vmatprep.subr.bf16.mxu0 %v3315_v61  ;;  %v3841_v40 = vpack.c.bf16 %v324_v54, %v316_v53  ;;  %v3587_v61 = vpack.c.bf16 %v339_v56, %v331_v55  ;;  %v395_v54 = vld [vmem:[#allocation7 + $0x3a8] sm:$0xff]  ;;  %v397_v56 = vld [vmem:[#allocation7 + $0x3b8] sm:$0xff] }
 0x1b9   :  { %3572 = vmatprep.subr.bf16.mxu1 %v3571_v1  ;;  %v3843_v1 = vpack.c.bf16 %v341_v58, %v333_v57  ;;  %v403_v55 = vld [vmem:[#allocation7 + $0x3e8] sm:$0xff]  ;;  %v405_v57 = vld [vmem:[#allocation7 + $0x3f8] sm:$0xff] }
 0x1bb   :  { %3318 = vmatpush1.bf16.msra.mxu0 %v3317_v7 }
 0x1bc   :  { %3574 = vmatpush1.bf16.msra.mxu1 %v3573_v9  ;;  %3576 = vmatprep.subr.bf16.mxu0 %v3575_v10  ;;  %v3591_v9 = vpack.c.bf16 %v355_v3, %v347_v2  ;;  %v346_v10 = vld [vmem:[#allocation7 + $0x220] sm:$0xff]  ;;  %v419_v2 = vld [vmem:[#allocation7 + $0x468] sm:$0xff]  ;;  %v413_v3 = vld [vmem:[#allocation7 + $0x438] sm:$0xff] }
 0x1bd   :  { %3832 = vmatprep.subr.bf16.mxu1 %v3831_v23  ;;  %v3847_v23 = vpack.c.bf16 %v357_v5, %v349_v4  ;;  %v3593_v19 = vpack.c.bf16 %v354_v12, %v346_v10  ;;  %v421_v4 = vld [vmem:[#allocation7 + $0x478] sm:$0xff]  ;;  %v418_v10 = vld [vmem:[#allocation7 + $0x460] sm:$0xff]  ;;  %v412_v12 = vld [vmem:[#allocation7 + $0x430] sm:$0xff] }
 0x1be   :  { %1622 = vmatmul.mubr.f32.vlgmr.msra.gmra.mrb[0].mxu0 %v4667_v35  ;;  %v3863_v21 = vpack.c.bf16 %v421_v4, %v413_v3  ;;  %v485_v3 = vld [vmem:[#allocation7 + $0x678] sm:$0xff] }
 0x1bf   :  { %1906 = vmatmul.mubr.f32.vlgmr.msra.gmra.mrb[0].mxu1 %v4667_v35  ;;  %3578 = vmatpush1.bf16.msra.mxu0 %v3577_v31  ;;  %v373_v31 = vld [vmem:[#allocation7 + $0x2f8] sm:$0xff] }
 0x1c0   :  { %1976 = vmatprep.mubr.f32.mxu0 %v4625_v25  ;;  %3834 = vmatpush1.bf16.msra.mxu1 %v3833_v36  ;;  %v3595_v36 = vpack.c.bf16 %v371_v28, %v363_v27  ;;  %v435_v27 = vld [vmem:[#allocation7 + $0x4e8] sm:$0xff]  ;;  %v429_v28 = vld [vmem:[#allocation7 + $0x4b8] sm:$0xff] }
 0x1c1   :  { %2260 = vmatprep.mubr.f32.mxu1 %v4625_v25  ;;  %3580 = vmatprep.subr.bf16.mxu0 %v3579_v44  ;;  %v340_v25 = vld [vmem:[#allocation7 + $0x1f0] sm:$0xff]  ;;  %v3851_v44 = vpack.c.bf16 %v373_v31, %v365_v29  ;;  %v437_v29 = vld [vmem:[#allocation7 + $0x4f8] sm:$0xff] }
 0x1c2   :  { %3836 = vmatprep.subr.bf16.mxu1 %v3835_v50  ;;  %v3845_v7 = vpack.c.bf16 %v340_v25, %v332_v0  ;;  %v381_v50 = vld [vmem:[#allocation7 + $0x338] sm:$0xff]  ;;  %v3859_v0 = vpack.c.bf16 %v405_v57, %v397_v56  ;;  %v411_v25 = vld [vmem:[#allocation7 + $0x428] sm:$0xff] }
 0x1c3   :  { %3582 = vmatpush1.bf16.msra.mxu0 %v3581_v59  ;;  %v3853_v59 = vpack.c.bf16 %v372_v46, %v364_v43  ;;  %v3855_v53 = vpack.c.bf16 %v389_v22, %v381_v50  ;;  %v3867_v43 = vpack.c.bf16 %v437_v29, %v429_v28  ;;  %v443_v46 = vld [vmem:[#allocation7 + $0x528] sm:$0xff]  ;;  %v453_v50 = vld [vmem:[#allocation7 + $0x578] sm:$0xff] }
 0x1c4   :  { %3838 = vmatpush1.bf16.msra.mxu1 %v3837_v51  ;;  %3584 = vmatprep.subr.bf16.mxu0 %v3583_v45  ;;  %v3599_v51 = vpack.c.bf16 %v387_v49, %v379_v48  ;;  %v378_v45 = vld [vmem:[#allocation7 + $0x320] sm:$0xff]  ;;  %v451_v48 = vld [vmem:[#allocation7 + $0x568] sm:$0xff]  ;;  %v445_v49 = vld [vmem:[#allocation7 + $0x538] sm:$0xff] }
 0x1c5   :  { %3840 = vmatprep.subr.bf16.mxu1 %v3839_v38  ;;  %v388_v38 = vld [vmem:[#allocation7 + $0x370] sm:$0xff]  ;;  %v3601_v58 = vpack.c.bf16 %v386_v30, %v378_v45  ;;  %v450_v45 = vld [vmem:[#allocation7 + $0x560] sm:$0xff]  ;;  %v469_v56 = vld [vmem:[#allocation7 + $0x5f8] sm:$0xff] }
 0x1c6   :  { %v444_v30 = vld [vmem:[#allocation7 + $0x530] sm:$0xff]  ;;  %v501_v28 = vld [vmem:[#allocation7 + $0x6f8] sm:$0xff] }
 0x1c7   :  { %3586 = vmatpush1.bf16.msra.mxu0 %v3585_v60  ;;  %v3857_v60 = vpack.c.bf16 %v388_v38, %v380_v52  ;;  %v3871_v52 = vpack.c.bf16 %v453_v50, %v445_v49  ;;  %v459_v38 = vld [vmem:[#allocation7 + $0x5a8] sm:$0xff]  ;;  %v517_v49 = vld [vmem:[#allocation7 + $0x778] sm:$0xff] }
 0x1c8   :  { %3842 = vmatpush1.bf16.msra.mxu1 %v3841_v40  ;;  %3588 = vmatprep.subr.bf16.mxu0 %v3587_v61  ;;  %v3603_v40 = vpack.c.bf16 %v403_v55, %v395_v54  ;;  %v394_v61 = vld [vmem:[#allocation7 + $0x3a0] sm:$0xff]  ;;  %v467_v54 = vld [vmem:[#allocation7 + $0x5e8] sm:$0xff]  ;;  %v461_v55 = vld [vmem:[#allocation7 + $0x5b8] sm:$0xff] }
 0x1c9   :  { %3844 = vmatprep.subr.bf16.mxu1 %v3843_v1  ;;  %v404_v1 = vld [vmem:[#allocation7 + $0x3f0] sm:$0xff]  ;;  %v3605_v5 = vpack.c.bf16 %v402_v62, %v394_v61  ;;  %v466_v61 = vld [vmem:[#allocation7 + $0x5e0] sm:$0xff] }
 0x1ca   :  { %v460_v62 = vld [vmem:[#allocation7 + $0x5b0] sm:$0xff] }
 0x1cb   :  { %3590 = vmatpush1.bf16.msra.mxu0 %v3589_v6  ;;  %v3861_v6 = vpack.c.bf16 %v404_v1, %v396_v63  ;;  %v3875_v63 = vpack.c.bf16 %v469_v56, %v461_v55  ;;  %v475_v1 = vld [vmem:[#allocation7 + $0x628] sm:$0xff]  ;;  %v533_v55 = vld [vmem:[#allocation7 + $0x7f8] sm:$0xff] }
 0x1cc   :  { %3846 = vmatpush1.bf16.msra.mxu1 %v3845_v7  ;;  %3592 = vmatprep.subr.bf16.mxu0 %v3591_v9  ;;  %v3607_v7 = vpack.c.bf16 %v419_v2, %v411_v25  ;;  %v410_v9 = vld [vmem:[#allocation7 + $0x420] sm:$0xff]  ;;  %v483_v25 = vld [vmem:[#allocation7 + $0x668] sm:$0xff]  ;;  %v477_v2 = vld [vmem:[#allocation7 + $0x638] sm:$0xff] }
 0x1cd   :  { %3848 = vmatprep.subr.bf16.mxu1 %v3847_v23  ;;  %v420_v23 = vld [vmem:[#allocation7 + $0x470] sm:$0xff]  ;;  %v3609_v31 = vpack.c.bf16 %v418_v10, %v410_v9  ;;  %v482_v9 = vld [vmem:[#allocation7 + $0x660] sm:$0xff] }
 0x1ce   :  { %v476_v10 = vld [vmem:[#allocation7 + $0x630] sm:$0xff] }
 0x1cf   :  { %3594 = vmatpush1.bf16.msra.mxu0 %v3593_v19  ;;  %v3865_v19 = vpack.c.bf16 %v420_v23, %v412_v12  ;;  %v3879_v12 = vpack.c.bf16 %v485_v3, %v477_v2  ;;  %v491_v23 = vld [vmem:[#allocation7 + $0x6a8] sm:$0xff]  ;;  %v549_v2 = vld [vmem:[#allocation7 + $0x878] sm:$0xff] }
 0x1d0   :  { %3850 = vmatpush1.bf16.msra.mxu1 %v3849_v32  ;;  %3596 = vmatprep.subr.bf16.mxu0 %v3595_v36  ;;  %v3611_v32 = vpack.c.bf16 %v435_v27, %v427_v24  ;;  %v426_v36 = vld [vmem:[#allocation7 + $0x4a0] sm:$0xff]  ;;  %v499_v24 = vld [vmem:[#allocation7 + $0x6e8] sm:$0xff]  ;;  %v493_v27 = vld [vmem:[#allocation7 + $0x6b8] sm:$0xff] }
 0x1d1   :  { %3852 = vmatprep.subr.bf16.mxu1 %v3851_v44  ;;  %v436_v44 = vld [vmem:[#allocation7 + $0x4f0] sm:$0xff]  ;;  %v3613_v22 = vpack.c.bf16 %v434_v39, %v426_v36  ;;  %v498_v36 = vld [vmem:[#allocation7 + $0x6e0] sm:$0xff] }
 0x1d2   :  { %v492_v39 = vld [vmem:[#allocation7 + $0x6b0] sm:$0xff] }
 0x1d3   :  { %3598 = vmatpush1.bf16.msra.mxu0 %v3597_v37  ;;  %v3869_v37 = vpack.c.bf16 %v436_v44, %v428_v42  ;;  %v3883_v42 = vpack.c.bf16 %v501_v28, %v493_v27  ;;  %v507_v44 = vld [vmem:[#allocation7 + $0x728] sm:$0xff]  ;;  %v557_v27 = vld [vmem:[#allocation7 + $0x8b8] sm:$0xff] }
 0x1d4   :  { %3854 = vmatpush1.bf16.msra.mxu1 %v3853_v59  ;;  %3600 = vmatprep.subr.bf16.mxu0 %v3599_v51  ;;  %v3615_v59 = vpack.c.bf16 %v451_v48, %v443_v46  ;;  %v442_v51 = vld [vmem:[#allocation7 + $0x520] sm:$0xff]  ;;  %v515_v46 = vld [vmem:[#allocation7 + $0x768] sm:$0xff]  ;;  %v509_v48 = vld [vmem:[#allocation7 + $0x738] sm:$0xff] }
 0x1d5   :  { %3856 = vmatprep.subr.bf16.mxu1 %v3855_v53  ;;  %v452_v53 = vld [vmem:[#allocation7 + $0x570] sm:$0xff]  ;;  %v3617_v57 = vpack.c.bf16 %v450_v45, %v442_v51  ;;  %v514_v51 = vld [vmem:[#allocation7 + $0x760] sm:$0xff]  ;;  %v565_v28 = vld [vmem:[#allocation7 + $0x8f8] sm:$0xff] }
 0x1d6   :  { %v508_v45 = vld [vmem:[#allocation7 + $0x730] sm:$0xff] }
 0x1d7   :  { %3602 = vmatpush1.bf16.msra.mxu0 %v3601_v58  ;;  %v3873_v58 = vpack.c.bf16 %v452_v53, %v444_v30  ;;  %v3887_v30 = vpack.c.bf16 %v517_v49, %v509_v48  ;;  %v523_v53 = vld [vmem:[#allocation7 + $0x7a8] sm:$0xff]  ;;  %v581_v48 = vld [vmem:[#allocation7 + $0x978] sm:$0xff] }
 0x1d8   :  { %3858 = vmatpush1.bf16.msra.mxu1 %v3857_v60  ;;  %3604 = vmatprep.subr.bf16.mxu0 %v3603_v40  ;;  %v3619_v60 = vpack.c.bf16 %v467_v54, %v459_v38  ;;  %v458_v40 = vld [vmem:[#allocation7 + $0x5a0] sm:$0xff]  ;;  %v531_v38 = vld [vmem:[#allocation7 + $0x7e8] sm:$0xff]  ;;  %v525_v54 = vld [vmem:[#allocation7 + $0x7b8] sm:$0xff] }
 0x1d9   :  { %3860 = vmatprep.subr.bf16.mxu1 %v3859_v0  ;;  %v468_v0 = vld [vmem:[#allocation7 + $0x5f0] sm:$0xff]  ;;  %v3621_v4 = vpack.c.bf16 %v466_v61, %v458_v40  ;;  %v530_v40 = vld [vmem:[#allocation7 + $0x7e0] sm:$0xff] }
 0x1da   :  { %v524_v61 = vld [vmem:[#allocation7 + $0x7b0] sm:$0xff] }
 0x1db   :  { %3606 = vmatpush1.bf16.msra.mxu0 %v3605_v5  ;;  %v3877_v5 = vpack.c.bf16 %v468_v0, %v460_v62  ;;  %v3891_v62 = vpack.c.bf16 %v533_v55, %v525_v54  ;;  %v539_v0 = vld [vmem:[#allocation7 + $0x828] sm:$0xff] }
 0x1dc   :  { %3862 = vmatpush1.bf16.msra.mxu1 %v3861_v6  ;;  %3608 = vmatprep.subr.bf16.mxu0 %v3607_v7  ;;  %v3623_v6 = vpack.c.bf16 %v483_v25, %v475_v1  ;;  %v474_v7 = vld [vmem:[#allocation7 + $0x620] sm:$0xff]  ;;  %v547_v1 = vld [vmem:[#allocation7 + $0x868] sm:$0xff]  ;;  %v541_v25 = vld [vmem:[#allocation7 + $0x838] sm:$0xff] }
 0x1dd   :  { %3864 = vmatprep.subr.bf16.mxu1 %v3863_v21  ;;  %v484_v21 = vld [vmem:[#allocation7 + $0x670] sm:$0xff]  ;;  %v3625_v29 = vpack.c.bf16 %v482_v9, %v474_v7  ;;  %v546_v7 = vld [vmem:[#allocation7 + $0x860] sm:$0xff]  ;;  %v3895_v9 = vpack.c.bf16 %v549_v2, %v541_v25 }
 0x1df   :  { %3610 = vmatpush1.bf16.msra.mxu0 %v3609_v31  ;;  %v3881_v31 = vpack.c.bf16 %v484_v21, %v476_v10  ;;  %v540_v10 = vld [vmem:[#allocation7 + $0x830] sm:$0xff]  ;;  %v555_v21 = vld [vmem:[#allocation7 + $0x8a8] sm:$0xff] }
 0x1e0   :  { %3866 = vmatpush1.bf16.msra.mxu1 %v3865_v19  ;;  %3612 = vmatprep.subr.bf16.mxu0 %v3611_v32  ;;  %v3627_v19 = vpack.c.bf16 %v499_v24, %v491_v23  ;;  %v490_v32 = vld [vmem:[#allocation7 + $0x6a0] sm:$0xff]  ;;  %v563_v23 = vld [vmem:[#allocation7 + $0x8e8] sm:$0xff] }
 0x1e1   :  { %3868 = vmatprep.subr.bf16.mxu1 %v3867_v43  ;;  %v500_v43 = vld [vmem:[#allocation7 + $0x6f0] sm:$0xff]  ;;  %v3629_v50 = vpack.c.bf16 %v498_v36, %v490_v32  ;;  %v3643_v36 = vpack.c.bf16 %v563_v23, %v555_v21  ;;  %v629_v21 = vld [vmem:[#allocation7 + $0xaf8] sm:$0xff] }
 0x1e2   :  { %v556_v32 = vld [vmem:[#allocation7 + $0x8b0] sm:$0xff] }
 0x1e3   :  { %3614 = vmatpush1.bf16.msra.mxu0 %v3613_v22  ;;  %v3885_v22 = vpack.c.bf16 %v500_v43, %v492_v39  ;;  %v564_v39 = vld [vmem:[#allocation7 + $0x8f0] sm:$0xff]  ;;  %v579_v43 = vld [vmem:[#allocation7 + $0x968] sm:$0xff] }
 0x1e4   :  { %3870 = vmatpush1.bf16.msra.mxu1 %v3869_v37  ;;  %3616 = vmatprep.subr.bf16.mxu0 %v3615_v59  ;;  %v3631_v37 = vpack.c.bf16 %v515_v46, %v507_v44  ;;  %v506_v59 = vld [vmem:[#allocation7 + $0x720] sm:$0xff]  ;;  %v3899_v44 = vpack.c.bf16 %v565_v28, %v557_v27  ;;  %v573_v46 = vld [vmem:[#allocation7 + $0x938] sm:$0xff] }
 0x1e5   :  { %3872 = vmatprep.subr.bf16.mxu1 %v3871_v52  ;;  %v516_v52 = vld [vmem:[#allocation7 + $0x770] sm:$0xff]  ;;  %v3633_v56 = vpack.c.bf16 %v514_v51, %v506_v59  ;;  %v578_v59 = vld [vmem:[#allocation7 + $0x960] sm:$0xff] }
 0x1e6   :  { %v572_v51 = vld [vmem:[#allocation7 + $0x930] sm:$0xff]  ;;  %v618_v28 = vld [vmem:[#allocation7 + $0xaa0] sm:$0xff] }
 0x1e7   :  { %3618 = vmatpush1.bf16.msra.mxu0 %v3617_v57  ;;  %v3889_v57 = vpack.c.bf16 %v516_v52, %v508_v45  ;;  %v3903_v45 = vpack.c.bf16 %v581_v48, %v573_v46  ;;  %v587_v52 = vld [vmem:[#allocation7 + $0x9a8] sm:$0xff] }
 0x1e8   :  { %3874 = vmatpush1.bf16.msra.mxu1 %v3873_v58  ;;  %3620 = vmatprep.subr.bf16.mxu0 %v3619_v60  ;;  %v3635_v58 = vpack.c.bf16 %v531_v38, %v523_v53  ;;  %v522_v60 = vld [vmem:[#allocation7 + $0x7a0] sm:$0xff]  ;;  %v595_v53 = vld [vmem:[#allocation7 + $0x9e8] sm:$0xff]  ;;  %v589_v38 = vld [vmem:[#allocation7 + $0x9b8] sm:$0xff] }
 0x1e9   :  { %3876 = vmatprep.subr.bf16.mxu1 %v3875_v63  ;;  %v532_v63 = vld [vmem:[#allocation7 + $0x7f0] sm:$0xff]  ;;  %v3637_v3 = vpack.c.bf16 %v530_v40, %v522_v60 }
 0x1ea   :  { %v588_v60 = vld [vmem:[#allocation7 + $0x9b0] sm:$0xff] }
 0x1eb   :  { %3622 = vmatpush1.bf16.msra.mxu0 %v3621_v4  ;;  %v3893_v4 = vpack.c.bf16 %v532_v63, %v524_v61  ;;  %v603_v61 = vld [vmem:[#allocation7 + $0xa28] sm:$0xff]  ;;  %v605_v63 = vld [vmem:[#allocation7 + $0xa38] sm:$0xff] }
 0x1ec   :  { %3878 = vmatpush1.bf16.msra.mxu1 %v3877_v5  ;;  %3624 = vmatprep.subr.bf16.mxu0 %v3623_v6  ;;  %v3639_v5 = vpack.c.bf16 %v547_v1, %v539_v0  ;;  %v538_v6 = vld [vmem:[#allocation7 + $0x820] sm:$0xff]  ;;  %v613_v0 = vld [vmem:[#allocation7 + $0xa78] sm:$0xff] }
 0x1ed   :  { %3880 = vmatprep.subr.bf16.mxu1 %v3879_v12  ;;  %v548_v12 = vld [vmem:[#allocation7 + $0x870] sm:$0xff]  ;;  %v3641_v24 = vpack.c.bf16 %v546_v7, %v538_v6  ;;  %v3911_v6 = vpack.c.bf16 %v613_v0, %v605_v63 }
 0x1ee   :  { %v612_v7 = vld [vmem:[#allocation7 + $0xa70] sm:$0xff] }
 0x1ef   :  { %3626 = vmatpush1.bf16.msra.mxu0 %v3625_v29  ;;  %v3897_v29 = vpack.c.bf16 %v548_v12, %v540_v10  ;;  %v627_v10 = vld [vmem:[#allocation7 + $0xae8] sm:$0xff]  ;;  %v621_v12 = vld [vmem:[#allocation7 + $0xab8] sm:$0xff] }
 0x1f0   :  { %3882 = vmatpush1.bf16.msra.mxu1 %v3881_v31  ;;  %3628 = vmatprep.subr.bf16.mxu0 %v3627_v19  ;;  %v554_v31 = vld [vmem:[#allocation7 + $0x8a0] sm:$0xff] }
 0x1f1   :  { %3884 = vmatprep.subr.bf16.mxu1 %v3883_v42  ;;  %v562_v19 = vld [vmem:[#allocation7 + $0x8e0] sm:$0xff]  ;;  %v571_v42 = vld [vmem:[#allocation7 + $0x928] sm:$0xff] }
 0x1f2   :  { %v3645_v49 = vpack.c.bf16 %v562_v19, %v554_v31  ;;  %v620_v31 = vld [vmem:[#allocation7 + $0xab0] sm:$0xff]  ;;  %v3915_v19 = vpack.c.bf16 %v629_v21, %v621_v12 }
 0x1f3   :  { %3630 = vmatpush1.bf16.msra.mxu0 %v3629_v50  ;;  %v3901_v50 = vpack.c.bf16 %v564_v39, %v556_v32  ;;  %v628_v32 = vld [vmem:[#allocation7 + $0xaf0] sm:$0xff]  ;;  %v643_v39 = vld [vmem:[#allocation7 + $0xb68] sm:$0xff] }
 0x1f4   :  { %3886 = vmatpush1.bf16.msra.mxu1 %v3885_v22  ;;  %3632 = vmatprep.subr.bf16.mxu0 %v3631_v37  ;;  %v3647_v22 = vpack.c.bf16 %v579_v43, %v571_v42  ;;  %v570_v37 = vld [vmem:[#allocation7 + $0x920] sm:$0xff]  ;;  %v637_v42 = vld [vmem:[#allocation7 + $0xb38] sm:$0xff]  ;;  %v3917_v46 = vpack.c.bf16 %v628_v32, %v620_v31  ;;  %v699_v31 = vld [vmem:[#allocation7 + $0xd28] sm:$0xff] }
 0x1f5   :  { %3888 = vmatprep.subr.bf16.mxu1 %v3887_v30  ;;  %v580_v30 = vld [vmem:[#allocation7 + $0x970] sm:$0xff]  ;;  %v3649_v54 = vpack.c.bf16 %v578_v59, %v570_v37  ;;  %v645_v43 = vld [vmem:[#allocation7 + $0xb78] sm:$0xff] }
 0x1f6   :  { %v3905_v55 = vpack.c.bf16 %v580_v30, %v572_v51  ;;  %v3919_v37 = vpack.c.bf16 %v645_v43, %v637_v42  ;;  %v644_v59 = vld [vmem:[#allocation7 + $0xb70] sm:$0xff]  ;;  %v651_v51 = vld [vmem:[#allocation7 + $0xba8] sm:$0xff]  ;;  %v653_v30 = vld [vmem:[#allocation7 + $0xbb8] sm:$0xff] }
 0x1f7   :  { %3634 = vmatpush1.bf16.msra.mxu0 %v3633_v56  ;;  %v3651_v56 = vpack.c.bf16 %v595_v53, %v587_v52  ;;  %v661_v52 = vld [vmem:[#allocation7 + $0xbf8] sm:$0xff] }
 0x1f8   :  { %3890 = vmatpush1.bf16.msra.mxu1 %v3889_v57  ;;  %3636 = vmatprep.subr.bf16.mxu0 %v3635_v58  ;;  %v586_v57 = vld [vmem:[#allocation7 + $0x9a0] sm:$0xff]  ;;  %v701_v32 = vld [vmem:[#allocation7 + $0xd38] sm:$0xff] }
 0x1f9   :  { %3892 = vmatprep.subr.bf16.mxu1 %v3891_v62  ;;  %v594_v58 = vld [vmem:[#allocation7 + $0x9e0] sm:$0xff]  ;;  %v611_v62 = vld [vmem:[#allocation7 + $0xa68] sm:$0xff] }
 0x1fa   :  { %v3653_v1 = vpack.c.bf16 %v594_v58, %v586_v57  ;;  %v3655_v2 = vpack.c.bf16 %v611_v62, %v603_v61  ;;  %v3923_v57 = vpack.c.bf16 %v661_v52, %v653_v30  ;;  %v660_v58 = vld [vmem:[#allocation7 + $0xbf0] sm:$0xff]  ;;  %v677_v61 = vld [vmem:[#allocation7 + $0xc78] sm:$0xff] }
 0x1fb   :  { %3638 = vmatpush1.bf16.msra.mxu0 %v3637_v3  ;;  %v602_v3 = vld [vmem:[#allocation7 + $0xa20] sm:$0xff] }
 0x1fc   :  { %3894 = vmatpush1.bf16.msra.mxu1 %v3893_v4  ;;  %3640 = vmatprep.subr.bf16.mxu0 %v3639_v5  ;;  %v610_v4 = vld [vmem:[#allocation7 + $0xa60] sm:$0xff]  ;;  %v604_v5 = vld [vmem:[#allocation7 + $0xa30] sm:$0xff] }
 0x1fd   :  { %3896 = vmatprep.subr.bf16.mxu1 %v3895_v9  ;;  %v619_v9 = vld [vmem:[#allocation7 + $0xaa8] sm:$0xff]  ;;  %v3657_v23 = vpack.c.bf16 %v610_v4, %v602_v3  ;;  %v676_v4 = vld [vmem:[#allocation7 + $0xc70] sm:$0xff] }
 0x1fe   :  { %1977 = vmatmul.mubr.f32.vlgmr.msra.gmra.mrb[2].mxu0 %v4627_v26  ;;  %v3659_v27 = vpack.c.bf16 %v627_v10, %v619_v9  ;;  %v693_v9 = vld [vmem:[#allocation7 + $0xcf8] sm:$0xff] }
 0x1ff   :  { %2261 = vmatmul.mubr.f32.vlgmr.msra.gmra.mrb[2].mxu1 %v4627_v26  ;;  %3642 = vmatpush1.bf16.msra.mxu0 %v3641_v24  ;;  %v597_v26 = vld [vmem:[#allocation7 + $0x9f8] sm:$0xff]  ;;  %v3913_v24 = vpack.c.bf16 %v612_v7, %v604_v5  ;;  %v683_v5 = vld [vmem:[#allocation7 + $0xca8] sm:$0xff] }
 0x200   :  { %2047 = vmatprep.mubr.f32.mxu0 %v4635_v47  ;;  %3898 = vmatpush1.bf16.msra.mxu1 %v3897_v29  ;;  %v3907_v40 = vpack.c.bf16 %v597_v26, %v589_v38  ;;  %v626_v29 = vld [vmem:[#allocation7 + $0xae0] sm:$0xff]  ;;  %v685_v7 = vld [vmem:[#allocation7 + $0xcb8] sm:$0xff] }
 0x201   :  { %2331 = vmatprep.mubr.f32.mxu1 %v4635_v47  ;;  %3644 = vmatprep.subr.bf16.mxu0 %v3643_v36  ;;  %v596_v47 = vld [vmem:[#allocation7 + $0x9f0] sm:$0xff]  ;;  %v635_v36 = vld [vmem:[#allocation7 + $0xb28] sm:$0xff] }
 0x202   :  { %3900 = vmatprep.subr.bf16.mxu1 %v3899_v44  ;;  %v3909_v25 = vpack.c.bf16 %v596_v47, %v588_v60  ;;  %v3661_v44 = vpack.c.bf16 %v626_v29, %v618_v28  ;;  %v3663_v48 = vpack.c.bf16 %v643_v39, %v635_v36  ;;  %v667_v60 = vld [vmem:[#allocation7 + $0xc28] sm:$0xff]  ;;  %v669_v47 = vld [vmem:[#allocation7 + $0xc38] sm:$0xff]  ;;  %v3931_v28 = vpack.c.bf16 %v693_v9, %v685_v7  ;;  %v692_v29 = vld [vmem:[#allocation7 + $0xcf0] sm:$0xff] }
 0x203   :  { %3646 = vmatpush1.bf16.msra.mxu0 %v3645_v49  ;;  %v634_v49 = vld [vmem:[#allocation7 + $0xb20] sm:$0xff]  ;;  %v3927_v3 = vpack.c.bf16 %v677_v61, %v669_v47  ;;  %v709_v36 = vld [vmem:[#allocation7 + $0xd78] sm:$0xff] }
 0x204   :  { %3902 = vmatpush1.bf16.msra.mxu1 %v3901_v50  ;;  %3648 = vmatprep.subr.bf16.mxu0 %v3647_v22  ;;  %v642_v50 = vld [vmem:[#allocation7 + $0xb60] sm:$0xff]  ;;  %v636_v22 = vld [vmem:[#allocation7 + $0xb30] sm:$0xff] }
 0x205   :  { %3904 = vmatprep.subr.bf16.mxu1 %v3903_v45  ;;  %v659_v45 = vld [vmem:[#allocation7 + $0xbe8] sm:$0xff]  ;;  %v3665_v53 = vpack.c.bf16 %v642_v50, %v634_v49  ;;  %v3921_v38 = vpack.c.bf16 %v644_v59, %v636_v22  ;;  %v3935_v49 = vpack.c.bf16 %v709_v36, %v701_v32  ;;  %v708_v50 = vld [vmem:[#allocation7 + $0xd70] sm:$0xff]  ;;  %v717_v59 = vld [vmem:[#allocation7 + $0xdb8] sm:$0xff] }
 0x206   :  { %v3667_v26 = vpack.c.bf16 %v659_v45, %v651_v51  ;;  %v715_v22 = vld [vmem:[#allocation7 + $0xda8] sm:$0xff]  ;;  %v725_v51 = vld [vmem:[#allocation7 + $0xdf8] sm:$0xff] }
 0x207   :  { %3650 = vmatpush1.bf16.msra.mxu0 %v3649_v54  ;;  %v650_v54 = vld [vmem:[#allocation7 + $0xba0] sm:$0xff] }
 0x208   :  { %3906 = vmatpush1.bf16.msra.mxu1 %v3905_v55  ;;  %3652 = vmatprep.subr.bf16.mxu0 %v3651_v56  ;;  %v658_v55 = vld [vmem:[#allocation7 + $0xbe0] sm:$0xff]  ;;  %v652_v56 = vld [vmem:[#allocation7 + $0xbb0] sm:$0xff] }
 0x209   :  { %3908 = vmatprep.subr.bf16.mxu1 %v3907_v40  ;;  %v675_v40 = vld [vmem:[#allocation7 + $0xc68] sm:$0xff]  ;;  %v3669_v62 = vpack.c.bf16 %v658_v55, %v650_v54  ;;  %v3925_v63 = vpack.c.bf16 %v660_v58, %v652_v56  ;;  %v3939_v54 = vpack.c.bf16 %v725_v51, %v717_v59  ;;  %v724_v55 = vld [vmem:[#allocation7 + $0xdf0] sm:$0xff]  ;;  %v733_v58 = vld [vmem:[#allocation7 + $0xe38] sm:$0xff] }
 0x20a   :  { %v3671_v0 = vpack.c.bf16 %v675_v40, %v667_v60  ;;  %v731_v56 = vld [vmem:[#allocation7 + $0xe28] sm:$0xff]  ;;  %v741_v60 = vld [vmem:[#allocation7 + $0xe78] sm:$0xff] }
 0x20b   :  { %3654 = vmatpush1.bf16.msra.mxu0 %v3653_v1  ;;  %v666_v1 = vld [vmem:[#allocation7 + $0xc20] sm:$0xff] }
 0x20c   :  { %3910 = vmatpush1.bf16.msra.mxu1 %v3909_v25  ;;  %3656 = vmatprep.subr.bf16.mxu0 %v3655_v2  ;;  %v674_v25 = vld [vmem:[#allocation7 + $0xc60] sm:$0xff]  ;;  %v668_v2 = vld [vmem:[#allocation7 + $0xc30] sm:$0xff] }
 0x20d   :  { %3912 = vmatprep.subr.bf16.mxu1 %v3911_v6  ;;  %v691_v6 = vld [vmem:[#allocation7 + $0xce8] sm:$0xff]  ;;  %v3673_v10 = vpack.c.bf16 %v674_v25, %v666_v1  ;;  %v3929_v12 = vpack.c.bf16 %v676_v4, %v668_v2  ;;  %v3943_v1 = vpack.c.bf16 %v741_v60, %v733_v58  ;;  %v740_v25 = vld [vmem:[#allocation7 + $0xe70] sm:$0xff]  ;;  %v749_v4 = vld [vmem:[#allocation7 + $0xeb8] sm:$0xff] }
 0x20e   :  { %v3675_v21 = vpack.c.bf16 %v691_v6, %v683_v5  ;;  %v747_v2 = vld [vmem:[#allocation7 + $0xea8] sm:$0xff]  ;;  %v757_v5 = vld [vmem:[#allocation7 + $0xef8] sm:$0xff] }
 0x20f   :  { %3658 = vmatpush1.bf16.msra.mxu0 %v3657_v23  ;;  %v682_v23 = vld [vmem:[#allocation7 + $0xca0] sm:$0xff] }
 0x210   :  { %3914 = vmatpush1.bf16.msra.mxu1 %v3913_v24  ;;  %3660 = vmatprep.subr.bf16.mxu0 %v3659_v27  ;;  %v690_v24 = vld [vmem:[#allocation7 + $0xce0] sm:$0xff]  ;;  %v684_v27 = vld [vmem:[#allocation7 + $0xcb0] sm:$0xff] }
 0x211   :  { %3916 = vmatprep.subr.bf16.mxu1 %v3915_v19  ;;  %v707_v19 = vld [vmem:[#allocation7 + $0xd68] sm:$0xff]  ;;  %v3677_v39 = vpack.c.bf16 %v690_v24, %v682_v23  ;;  %v3933_v42 = vpack.c.bf16 %v692_v29, %v684_v27  ;;  %v3947_v23 = vpack.c.bf16 %v757_v5, %v749_v4  ;;  %v756_v24 = vld [vmem:[#allocation7 + $0xef0] sm:$0xff]  ;;  %v765_v29 = vld [vmem:[#allocation7 + $0xf38] sm:$0xff] }
 0x212   :  { %v3679_v43 = vpack.c.bf16 %v707_v19, %v699_v31  ;;  %v763_v27 = vld [vmem:[#allocation7 + $0xf28] sm:$0xff]  ;;  %v773_v31 = vld [vmem:[#allocation7 + $0xf78] sm:$0xff]  ;;  %v810_v5 = vld [vmem:[#allocation7 + $0x10a0] sm:$0xff] }
 0x213   :  { %3662 = vmatpush1.bf16.msra.mxu0 %v3661_v44  ;;  %v698_v44 = vld [vmem:[#allocation7 + $0xd20] sm:$0xff] }
 0x214   :  { %3918 = vmatpush1.bf16.msra.mxu1 %v3917_v46  ;;  %3664 = vmatprep.subr.bf16.mxu0 %v3663_v48  ;;  %v706_v46 = vld [vmem:[#allocation7 + $0xd60] sm:$0xff]  ;;  %v700_v48 = vld [vmem:[#allocation7 + $0xd30] sm:$0xff] }
 0x215   :  { %3920 = vmatprep.subr.bf16.mxu1 %v3919_v37  ;;  %v723_v37 = vld [vmem:[#allocation7 + $0xde8] sm:$0xff]  ;;  %v3681_v45 = vpack.c.bf16 %v706_v46, %v698_v44  ;;  %v3937_v30 = vpack.c.bf16 %v708_v50, %v700_v48  ;;  %v3951_v44 = vpack.c.bf16 %v773_v31, %v765_v29  ;;  %v772_v46 = vld [vmem:[#allocation7 + $0xf70] sm:$0xff]  ;;  %v781_v50 = vld [vmem:[#allocation7 + $0xfb8] sm:$0xff] }
 0x216   :  { %v3683_v52 = vpack.c.bf16 %v723_v37, %v715_v22  ;;  %v779_v48 = vld [vmem:[#allocation7 + $0xfa8] sm:$0xff]  ;;  %v789_v22 = vld [vmem:[#allocation7 + $0xff8] sm:$0xff] }
 0x217   :  { %3666 = vmatpush1.bf16.msra.mxu0 %v3665_v53  ;;  %v714_v53 = vld [vmem:[#allocation7 + $0xda0] sm:$0xff] }
 0x218   :  { %3922 = vmatpush1.bf16.msra.mxu1 %v3921_v38  ;;  %3668 = vmatprep.subr.bf16.mxu0 %v3667_v26  ;;  %v722_v38 = vld [vmem:[#allocation7 + $0xde0] sm:$0xff]  ;;  %v716_v26 = vld [vmem:[#allocation7 + $0xdb0] sm:$0xff] }
 0x219   :  { %3924 = vmatprep.subr.bf16.mxu1 %v3923_v57  ;;  %v739_v57 = vld [vmem:[#allocation7 + $0xe68] sm:$0xff]  ;;  %v3685_v40 = vpack.c.bf16 %v722_v38, %v714_v53  ;;  %v3941_v47 = vpack.c.bf16 %v724_v55, %v716_v26  ;;  %v3955_v53 = vpack.c.bf16 %v789_v22, %v781_v50  ;;  %v788_v38 = vld [vmem:[#allocation7 + $0xff0] sm:$0xff]  ;;  %v797_v55 = vld [vmem:[#allocation7 + $0x1038] sm:$0xff] }
 0x21a   :  { %v3687_v61 = vpack.c.bf16 %v739_v57, %v731_v56  ;;  %v795_v26 = vld [vmem:[#allocation7 + $0x1028] sm:$0xff]  ;;  %v805_v56 = vld [vmem:[#allocation7 + $0x1078] sm:$0xff]  ;;  %v842_v22 = vld [vmem:[#allocation7 + $0x11a0] sm:$0xff] }
 0x21b   :  { %3670 = vmatpush1.bf16.msra.mxu0 %v3669_v62  ;;  %v730_v62 = vld [vmem:[#allocation7 + $0xe20] sm:$0xff] }
 0x21c   :  { %3926 = vmatpush1.bf16.msra.mxu1 %v3925_v63  ;;  %3672 = vmatprep.subr.bf16.mxu0 %v3671_v0  ;;  %v738_v63 = vld [vmem:[#allocation7 + $0xe60] sm:$0xff]  ;;  %v732_v0 = vld [vmem:[#allocation7 + $0xe30] sm:$0xff] }
 0x21d   :  { %3928 = vmatprep.subr.bf16.mxu1 %v3927_v3  ;;  %v755_v3 = vld [vmem:[#allocation7 + $0xee8] sm:$0xff]  ;;  %v3689_v6 = vpack.c.bf16 %v738_v63, %v730_v62  ;;  %v3945_v7 = vpack.c.bf16 %v740_v25, %v732_v0  ;;  %v796_v62 = vld [vmem:[#allocation7 + $0x1030] sm:$0xff] }
 0x21e   :  { %v3691_v9 = vpack.c.bf16 %v755_v3, %v747_v2  ;;  %v804_v63 = vld [vmem:[#allocation7 + $0x1070] sm:$0xff]  ;;  %v811_v0 = vld [vmem:[#allocation7 + $0x10a8] sm:$0xff]  ;;  %v813_v2 = vld [vmem:[#allocation7 + $0x10b8] sm:$0xff] }
 0x21f   :  { %3674 = vmatpush1.bf16.msra.mxu0 %v3673_v10  ;;  %v746_v10 = vld [vmem:[#allocation7 + $0xea0] sm:$0xff]  ;;  %v821_v3 = vld [vmem:[#allocation7 + $0x10f8] sm:$0xff]  ;;  %v3961_v4 = vpack.c.bf16 %v804_v63, %v796_v62 }
 0x220   :  { %3930 = vmatpush1.bf16.msra.mxu1 %v3929_v12  ;;  %3676 = vmatprep.subr.bf16.mxu0 %v3675_v21  ;;  %v754_v12 = vld [vmem:[#allocation7 + $0xee0] sm:$0xff]  ;;  %v748_v21 = vld [vmem:[#allocation7 + $0xeb0] sm:$0xff]  ;;  %v885_v62 = vld [vmem:[#allocation7 + $0x12f8] sm:$0xff] }
 0x221   :  { %3932 = vmatprep.subr.bf16.mxu1 %v3931_v28  ;;  %v771_v28 = vld [vmem:[#allocation7 + $0xf68] sm:$0xff]  ;;  %v3693_v19 = vpack.c.bf16 %v754_v12, %v746_v10  ;;  %v3949_v32 = vpack.c.bf16 %v756_v24, %v748_v21  ;;  %v820_v10 = vld [vmem:[#allocation7 + $0x10f0] sm:$0xff]  ;;  %v829_v24 = vld [vmem:[#allocation7 + $0x1138] sm:$0xff] }
 0x222   :  { %v3695_v36 = vpack.c.bf16 %v771_v28, %v763_v27  ;;  %v827_v12 = vld [vmem:[#allocation7 + $0x1128] sm:$0xff]  ;;  %v837_v27 = vld [vmem:[#allocation7 + $0x1178] sm:$0xff] }
 0x223   :  { %3678 = vmatpush1.bf16.msra.mxu0 %v3677_v39  ;;  %v762_v39 = vld [vmem:[#allocation7 + $0xf20] sm:$0xff]  ;;  %v835_v21 = vld [vmem:[#allocation7 + $0x1168] sm:$0xff] }
 0x224   :  { %3934 = vmatpush1.bf16.msra.mxu1 %v3933_v42  ;;  %3680 = vmatprep.subr.bf16.mxu0 %v3679_v43  ;;  %v770_v42 = vld [vmem:[#allocation7 + $0xf60] sm:$0xff]  ;;  %v764_v43 = vld [vmem:[#allocation7 + $0xf30] sm:$0xff]  ;;  %v3711_v31 = vpack.c.bf16 %v835_v21, %v827_v12 }
 0x225   :  { %3936 = vmatprep.subr.bf16.mxu1 %v3935_v49  ;;  %v787_v49 = vld [vmem:[#allocation7 + $0xfe8] sm:$0xff]  ;;  %v3697_v37 = vpack.c.bf16 %v770_v42, %v762_v39  ;;  %v3953_v59 = vpack.c.bf16 %v772_v46, %v764_v43  ;;  %v3967_v39 = vpack.c.bf16 %v837_v27, %v829_v24  ;;  %v836_v42 = vld [vmem:[#allocation7 + $0x1170] sm:$0xff]  ;;  %v845_v46 = vld [vmem:[#allocation7 + $0x11b8] sm:$0xff] }
 0x226   :  { %v3699_v51 = vpack.c.bf16 %v787_v49, %v779_v48  ;;  %v843_v43 = vld [vmem:[#allocation7 + $0x11a8] sm:$0xff]  ;;  %v890_v24 = vld [vmem:[#allocation7 + $0x1320] sm:$0xff] }
 0x227   :  { %3682 = vmatpush1.bf16.msra.mxu0 %v3681_v45  ;;  %v778_v45 = vld [vmem:[#allocation7 + $0xfa0] sm:$0xff] }
 0x228   :  { %3938 = vmatpush1.bf16.msra.mxu1 %v3937_v30  ;;  %3684 = vmatprep.subr.bf16.mxu0 %v3683_v52  ;;  %v786_v30 = vld [vmem:[#allocation7 + $0xfe0] sm:$0xff]  ;;  %v780_v52 = vld [vmem:[#allocation7 + $0xfb0] sm:$0xff] }
 0x229   :  { %3940 = vmatprep.subr.bf16.mxu1 %v3939_v54  ;;  %v803_v54 = vld [vmem:[#allocation7 + $0x1068] sm:$0xff]  ;;  %v3701_v57 = vpack.c.bf16 %v786_v30, %v778_v45  ;;  %v3957_v58 = vpack.c.bf16 %v788_v38, %v780_v52  ;;  %v861_v52 = vld [vmem:[#allocation7 + $0x1238] sm:$0xff]  ;;  %v898_v27 = vld [vmem:[#allocation7 + $0x1360] sm:$0xff] }
 0x22a   :  { %v3703_v60 = vpack.c.bf16 %v803_v54, %v795_v26  ;;  %v859_v45 = vld [vmem:[#allocation7 + $0x1228] sm:$0xff] }
 0x22b   :  { %3686 = vmatpush1.bf16.msra.mxu0 %v3685_v40  ;;  %v794_v40 = vld [vmem:[#allocation7 + $0x1020] sm:$0xff]  ;;  %v867_v30 = vld [vmem:[#allocation7 + $0x1268] sm:$0xff] }
 0x22c   :  { %3942 = vmatpush1.bf16.msra.mxu1 %v3941_v47  ;;  %3688 = vmatprep.subr.bf16.mxu0 %v3687_v61  ;;  %v802_v47 = vld [vmem:[#allocation7 + $0x1060] sm:$0xff]  ;;  %v3959_v61 = vpack.c.bf16 %v805_v56, %v797_v55  ;;  %v3719_v54 = vpack.c.bf16 %v867_v30, %v859_v45 }
 0x22d   :  { %3944 = vmatprep.subr.bf16.mxu1 %v3943_v1  ;;  %v819_v1 = vld [vmem:[#allocation7 + $0x10e8] sm:$0xff]  ;;  %v3705_v25 = vpack.c.bf16 %v802_v47, %v794_v40  ;;  %v858_v55 = vld [vmem:[#allocation7 + $0x1220] sm:$0xff] }
 0x22e   :  { %v866_v56 = vld [vmem:[#allocation7 + $0x1260] sm:$0xff]  ;;  %v875_v40 = vld [vmem:[#allocation7 + $0x12a8] sm:$0xff] }
 0x22f   :  { %3690 = vmatpush1.bf16.msra.mxu0 %v3689_v6  ;;  %v818_v6 = vld [vmem:[#allocation7 + $0x10e0] sm:$0xff]  ;;  %v883_v47 = vld [vmem:[#allocation7 + $0x12e8] sm:$0xff]  ;;  %v3721_v63 = vpack.c.bf16 %v866_v56, %v858_v55 }
 0x230   :  { %3946 = vmatpush1.bf16.msra.mxu1 %v3945_v7  ;;  %3692 = vmatprep.subr.bf16.mxu0 %v3691_v9  ;;  %v812_v7 = vld [vmem:[#allocation7 + $0x10b0] sm:$0xff]  ;;  %v3707_v9 = vpack.c.bf16 %v819_v1, %v811_v0  ;;  %v3709_v28 = vpack.c.bf16 %v818_v6, %v810_v5  ;;  %v3723_v1 = vpack.c.bf16 %v883_v47, %v875_v40  ;;  %v891_v6 = vld [vmem:[#allocation7 + $0x1328] sm:$0xff] }
 0x231   :  { %3948 = vmatprep.subr.bf16.mxu1 %v3947_v23  ;;  %v3963_v23 = vpack.c.bf16 %v821_v3, %v813_v2  ;;  %v3965_v29 = vpack.c.bf16 %v820_v10, %v812_v7  ;;  %v882_v2 = vld [vmem:[#allocation7 + $0x12e0] sm:$0xff]  ;;  %v876_v3 = vld [vmem:[#allocation7 + $0x12b0] sm:$0xff]  ;;  %v899_v7 = vld [vmem:[#allocation7 + $0x1368] sm:$0xff] }
 0x232   :  { %v884_v5 = vld [vmem:[#allocation7 + $0x12f0] sm:$0xff]  ;;  %v901_v10 = vld [vmem:[#allocation7 + $0x1378] sm:$0xff]  ;;  %v939_v55 = vld [vmem:[#allocation7 + $0x14a8] sm:$0xff] }
 0x233   :  { %3694 = vmatpush1.bf16.msra.mxu0 %v3693_v19  ;;  %v826_v19 = vld [vmem:[#allocation7 + $0x1120] sm:$0xff]  ;;  %v3981_v21 = vpack.c.bf16 %v884_v5, %v876_v3  ;;  %v947_v56 = vld [vmem:[#allocation7 + $0x14e8] sm:$0xff]  ;;  %v957_v3 = vld [vmem:[#allocation7 + $0x1538] sm:$0xff] }
 0x234   :  { %3950 = vmatpush1.bf16.msra.mxu1 %v3949_v32  ;;  %3696 = vmatprep.subr.bf16.mxu0 %v3695_v36  ;;  %v834_v32 = vld [vmem:[#allocation7 + $0x1160] sm:$0xff]  ;;  %v828_v36 = vld [vmem:[#allocation7 + $0x1130] sm:$0xff]  ;;  %v3739_v47 = vpack.c.bf16 %v947_v56, %v939_v55 }
 0x235   :  { %3952 = vmatprep.subr.bf16.mxu1 %v3951_v44  ;;  %v851_v44 = vld [vmem:[#allocation7 + $0x11e8] sm:$0xff]  ;;  %v3713_v48 = vpack.c.bf16 %v834_v32, %v826_v19  ;;  %v3969_v49 = vpack.c.bf16 %v836_v42, %v828_v36  ;;  %v909_v36 = vld [vmem:[#allocation7 + $0x13b8] sm:$0xff]  ;;  %v3729_v42 = vpack.c.bf16 %v898_v27, %v890_v24 }
 0x236   :  { %v3715_v50 = vpack.c.bf16 %v851_v44, %v843_v43  ;;  %v907_v19 = vld [vmem:[#allocation7 + $0x13a8] sm:$0xff] }
 0x237   :  { %3698 = vmatpush1.bf16.msra.mxu0 %v3697_v37  ;;  %v850_v37 = vld [vmem:[#allocation7 + $0x11e0] sm:$0xff]  ;;  %v915_v32 = vld [vmem:[#allocation7 + $0x13e8] sm:$0xff] }
 0x238   :  { %3954 = vmatpush1.bf16.msra.mxu1 %v3953_v59  ;;  %3700 = vmatprep.subr.bf16.mxu0 %v3699_v51  ;;  %v844_v59 = vld [vmem:[#allocation7 + $0x11b0] sm:$0xff]  ;;  %v3717_v38 = vpack.c.bf16 %v850_v37, %v842_v22  ;;  %v3731_v44 = vpack.c.bf16 %v915_v32, %v907_v19  ;;  %v923_v22 = vld [vmem:[#allocation7 + $0x1428] sm:$0xff] }
 0x239   :  { %3956 = vmatprep.subr.bf16.mxu1 %v3955_v53  ;;  %v869_v53 = vld [vmem:[#allocation7 + $0x1278] sm:$0xff]  ;;  %v931_v37 = vld [vmem:[#allocation7 + $0x1468] sm:$0xff] }
 0x23a   :  { %v3735_v30 = vpack.c.bf16 %v931_v37, %v923_v22  ;;  %v971_v24 = vld [vmem:[#allocation7 + $0x15a8] sm:$0xff] }
 0x23b   :  { %3702 = vmatpush1.bf16.msra.mxu0 %v3701_v57  ;;  %v860_v57 = vld [vmem:[#allocation7 + $0x1230] sm:$0xff]  ;;  %v979_v27 = vld [vmem:[#allocation7 + $0x15e8] sm:$0xff] }
 0x23c   :  { %3958 = vmatpush1.bf16.msra.mxu1 %v3957_v58  ;;  %3704 = vmatprep.subr.bf16.mxu0 %v3703_v60  ;;  %v3975_v58 = vpack.c.bf16 %v869_v53, %v861_v52  ;;  %v868_v60 = vld [vmem:[#allocation7 + $0x1270] sm:$0xff]  ;;  %v922_v52 = vld [vmem:[#allocation7 + $0x1420] sm:$0xff]  ;;  %v3747_v32 = vpack.c.bf16 %v979_v27, %v971_v24 }
 0x23d   :  { %3960 = vmatprep.subr.bf16.mxu1 %v3959_v61  ;;  %v877_v61 = vld [vmem:[#allocation7 + $0x12b8] sm:$0xff]  ;;  %v3977_v0 = vpack.c.bf16 %v868_v60, %v860_v57  ;;  %v930_v53 = vld [vmem:[#allocation7 + $0x1460] sm:$0xff] }
 0x23e   :  { %2048 = vmatmul.mubr.f32.vlgmr.msra.gmra.mrb[2].mxu0 %v4647_v33  ;;  %v941_v57 = vld [vmem:[#allocation7 + $0x14b8] sm:$0xff]  ;;  %v3737_v60 = vpack.c.bf16 %v930_v53, %v922_v52  ;;  %v1003_v52 = vld [vmem:[#allocation7 + $0x16a8] sm:$0xff] }
 0x23f   :  { %2332 = vmatmul.mubr.f32.vlgmr.msra.gmra.mrb[2].mxu1 %v4647_v33  ;;  %3706 = vmatpush1.bf16.msra.mxu0 %v3705_v25  ;;  %v853_v33 = vld [vmem:[#allocation7 + $0x11f8] sm:$0xff]  ;;  %v874_v25 = vld [vmem:[#allocation7 + $0x12a0] sm:$0xff]  ;;  %v1011_v53 = vld [vmem:[#allocation7 + $0x16e8] sm:$0xff] }
 0x240   :  { %2118 = vmatprep.mubr.f32.mxu0 %v4650_v41  ;;  %3962 = vmatpush1.bf16.msra.mxu1 %v3961_v4  ;;  %v3971_v51 = vpack.c.bf16 %v853_v33, %v845_v46  ;;  %v3979_v4 = vpack.c.bf16 %v885_v62, %v877_v61  ;;  %v3725_v12 = vpack.c.bf16 %v882_v2, %v874_v25  ;;  %v906_v46 = vld [vmem:[#allocation7 + $0x13a0] sm:$0xff]  ;;  %v955_v25 = vld [vmem:[#allocation7 + $0x1528] sm:$0xff] }
 0x241   :  { %2402 = vmatprep.mubr.f32.mxu1 %v4650_v41  ;;  %3708 = vmatprep.subr.bf16.mxu0 %v3707_v9  ;;  %v852_v41 = vld [vmem:[#allocation7 + $0x11f0] sm:$0xff]  ;;  %v893_v9 = vld [vmem:[#allocation7 + $0x1338] sm:$0xff]  ;;  %v914_v33 = vld [vmem:[#allocation7 + $0x13e0] sm:$0xff]  ;;  %v3755_v56 = vpack.c.bf16 %v1011_v53, %v1003_v52 }
 0x242   :  { %3964 = vmatprep.subr.bf16.mxu1 %v3963_v23  ;;  %v3973_v26 = vpack.c.bf16 %v852_v41, %v844_v59  ;;  %v3727_v23 = vpack.c.bf16 %v899_v7, %v891_v6  ;;  %v925_v59 = vld [vmem:[#allocation7 + $0x1438] sm:$0xff]  ;;  %v3733_v41 = vpack.c.bf16 %v914_v33, %v906_v46  ;;  %v938_v61 = vld [vmem:[#allocation7 + $0x14a0] sm:$0xff]  ;;  %v963_v2 = vld [vmem:[#allocation7 + $0x1568] sm:$0xff] }
 0x243   :  { %3710 = vmatpush1.bf16.msra.mxu0 %v3709_v28  ;;  %v892_v28 = vld [vmem:[#allocation7 + $0x1330] sm:$0xff]  ;;  %v946_v62 = vld [vmem:[#allocation7 + $0x14e0] sm:$0xff]  ;;  %v3743_v7 = vpack.c.bf16 %v963_v2, %v955_v25  ;;  %v987_v46 = vld [vmem:[#allocation7 + $0x1628] sm:$0xff] }
 0x244   :  { %3966 = vmatpush1.bf16.msra.mxu1 %v3965_v29  ;;  %3712 = vmatprep.subr.bf16.mxu0 %v3711_v31  ;;  %v3983_v29 = vpack.c.bf16 %v901_v10, %v893_v9  ;;  %v900_v31 = vld [vmem:[#allocation7 + $0x1370] sm:$0xff]  ;;  %v3741_v5 = vpack.c.bf16 %v946_v62, %v938_v61  ;;  %v954_v9 = vld [vmem:[#allocation7 + $0x1520] sm:$0xff]  ;;  %v995_v33 = vld [vmem:[#allocation7 + $0x1668] sm:$0xff] }
 0x245   :  { %3968 = vmatprep.subr.bf16.mxu1 %v3967_v39  ;;  %v917_v39 = vld [vmem:[#allocation7 + $0x13f8] sm:$0xff]  ;;  %v3985_v43 = vpack.c.bf16 %v900_v31, %v892_v28  ;;  %v962_v10 = vld [vmem:[#allocation7 + $0x1560] sm:$0xff]  ;;  %v3751_v37 = vpack.c.bf16 %v995_v33, %v987_v46  ;;  %v1019_v61 = vld [vmem:[#allocation7 + $0x1728] sm:$0xff] }
 0x246   :  { %v973_v28 = vld [vmem:[#allocation7 + $0x15b8] sm:$0xff]  ;;  %v3745_v31 = vpack.c.bf16 %v962_v10, %v954_v9  ;;  %v1027_v62 = vld [vmem:[#allocation7 + $0x1768] sm:$0xff]  ;;  %v1066_v53 = vld [vmem:[#allocation7 + $0x18a0] sm:$0xff] }
 0x247   :  { %3714 = vmatpush1.bf16.msra.mxu0 %v3713_v48  ;;  %v908_v48 = vld [vmem:[#allocation7 + $0x13b0] sm:$0xff]  ;;  %v3759_v2 = vpack.c.bf16 %v1027_v62, %v1019_v61  ;;  %v1035_v9 = vld [vmem:[#allocation7 + $0x17a8] sm:$0xff] }
 0x248   :  { %3970 = vmatpush1.bf16.msra.mxu1 %v3969_v49  ;;  %3716 = vmatprep.subr.bf16.mxu0 %v3715_v50  ;;  %v3987_v49 = vpack.c.bf16 %v917_v39, %v909_v36  ;;  %v916_v50 = vld [vmem:[#allocation7 + $0x13f0] sm:$0xff]  ;;  %v970_v36 = vld [vmem:[#allocation7 + $0x15a0] sm:$0xff]  ;;  %v1043_v10 = vld [vmem:[#allocation7 + $0x17e8] sm:$0xff] }
 0x249   :  { %3972 = vmatprep.subr.bf16.mxu1 %v3971_v51  ;;  %v933_v51 = vld [vmem:[#allocation7 + $0x1478] sm:$0xff]  ;;  %v3989_v45 = vpack.c.bf16 %v916_v50, %v908_v48  ;;  %v978_v39 = vld [vmem:[#allocation7 + $0x15e0] sm:$0xff]  ;;  %v3763_v27 = vpack.c.bf16 %v1043_v10, %v1035_v9 }
 0x24a   :  { %v989_v48 = vld [vmem:[#allocation7 + $0x1638] sm:$0xff]  ;;  %v3749_v50 = vpack.c.bf16 %v978_v39, %v970_v36  ;;  %v1051_v36 = vld [vmem:[#allocation7 + $0x1828] sm:$0xff]  ;;  %v1098_v10 = vld [vmem:[#allocation7 + $0x19a0] sm:$0xff] }
 0x24b   :  { %3718 = vmatpush1.bf16.msra.mxu0 %v3717_v38  ;;  %v924_v38 = vld [vmem:[#allocation7 + $0x1430] sm:$0xff]  ;;  %v1059_v39 = vld [vmem:[#allocation7 + $0x1868] sm:$0xff] }
 0x24c   :  { %3974 = vmatpush1.bf16.msra.mxu1 %v3973_v26  ;;  %3720 = vmatprep.subr.bf16.mxu0 %v3719_v54  ;;  %v3991_v26 = vpack.c.bf16 %v933_v51, %v925_v59  ;;  %v932_v54 = vld [vmem:[#allocation7 + $0x1470] sm:$0xff]  ;;  %v986_v59 = vld [vmem:[#allocation7 + $0x1620] sm:$0xff]  ;;  %v3767_v33 = vpack.c.bf16 %v1059_v39, %v1051_v36 }
 0x24d   :  { %3976 = vmatprep.subr.bf16.mxu1 %v3975_v58  ;;  %v949_v58 = vld [vmem:[#allocation7 + $0x14f8] sm:$0xff]  ;;  %v3993_v40 = vpack.c.bf16 %v932_v54, %v924_v38  ;;  %v994_v51 = vld [vmem:[#allocation7 + $0x1660] sm:$0xff] }
 0x24e   :  { %v1005_v38 = vld [vmem:[#allocation7 + $0x16b8] sm:$0xff]  ;;  %v3753_v54 = vpack.c.bf16 %v994_v51, %v986_v59  ;;  %v1067_v59 = vld [vmem:[#allocation7 + $0x18a8] sm:$0xff]  ;;  %v1114_v36 = vld [vmem:[#allocation7 + $0x1a20] sm:$0xff] }
 0x24f   :  { %3722 = vmatpush1.bf16.msra.mxu0 %v3721_v63  ;;  %v940_v63 = vld [vmem:[#allocation7 + $0x14b0] sm:$0xff]  ;;  %v1075_v51 = vld [vmem:[#allocation7 + $0x18e8] sm:$0xff]  ;;  %v1122_v39 = vld [vmem:[#allocation7 + $0x1a60] sm:$0xff] }
 0x250   :  { %3978 = vmatpush1.bf16.msra.mxu1 %v3977_v0  ;;  %3724 = vmatprep.subr.bf16.mxu0 %v3723_v1  ;;  %v3995_v0 = vpack.c.bf16 %v949_v58, %v941_v57  ;;  %v948_v1 = vld [vmem:[#allocation7 + $0x14f0] sm:$0xff]  ;;  %v1002_v57 = vld [vmem:[#allocation7 + $0x16a0] sm:$0xff] }
 0x251   :  { %3980 = vmatprep.subr.bf16.mxu1 %v3979_v4  ;;  %v965_v4 = vld [vmem:[#allocation7 + $0x1578] sm:$0xff]  ;;  %v3997_v6 = vpack.c.bf16 %v948_v1, %v940_v63  ;;  %v1010_v58 = vld [vmem:[#allocation7 + $0x16e0] sm:$0xff] }
 0x252   :  { %v1021_v63 = vld [vmem:[#allocation7 + $0x1738] sm:$0xff]  ;;  %v3757_v1 = vpack.c.bf16 %v1010_v58, %v1002_v57  ;;  %v1091_v57 = vld [vmem:[#allocation7 + $0x1968] sm:$0xff] }
 0x253   :  { %3726 = vmatpush1.bf16.msra.mxu0 %v3725_v12  ;;  %v956_v12 = vld [vmem:[#allocation7 + $0x1530] sm:$0xff] }
 0x254   :  { %3982 = vmatpush1.bf16.msra.mxu1 %v3981_v21  ;;  %3728 = vmatprep.subr.bf16.mxu0 %v3727_v23  ;;  %v3999_v21 = vpack.c.bf16 %v965_v4, %v957_v3  ;;  %v964_v23 = vld [vmem:[#allocation7 + $0x1570] sm:$0xff]  ;;  %v1018_v3 = vld [vmem:[#allocation7 + $0x1720] sm:$0xff] }
 0x255   :  { %3984 = vmatprep.subr.bf16.mxu1 %v3983_v29  ;;  %v981_v29 = vld [vmem:[#allocation7 + $0x15f8] sm:$0xff]  ;;  %v4001_v19 = vpack.c.bf16 %v964_v23, %v956_v12  ;;  %v1026_v4 = vld [vmem:[#allocation7 + $0x1760] sm:$0xff] }
 0x256   :  { %v1037_v12 = vld [vmem:[#allocation7 + $0x17b8] sm:$0xff]  ;;  %v3761_v23 = vpack.c.bf16 %v1026_v4, %v1018_v3  ;;  %v1099_v3 = vld [vmem:[#allocation7 + $0x19a8] sm:$0xff] }
 0x257   :  { %3730 = vmatpush1.bf16.msra.mxu0 %v3729_v42  ;;  %v972_v42 = vld [vmem:[#allocation7 + $0x15b0] sm:$0xff]  ;;  %v1107_v4 = vld [vmem:[#allocation7 + $0x19e8] sm:$0xff] }
 0x258   :  { %3986 = vmatpush1.bf16.msra.mxu1 %v3985_v43  ;;  %3732 = vmatprep.subr.bf16.mxu0 %v3731_v44  ;;  %v4003_v43 = vpack.c.bf16 %v981_v29, %v973_v28  ;;  %v980_v44 = vld [vmem:[#allocation7 + $0x15f0] sm:$0xff]  ;;  %v1034_v28 = vld [vmem:[#allocation7 + $0x17a0] sm:$0xff]  ;;  %v3779_v9 = vpack.c.bf16 %v1107_v4, %v1099_v3 }
 0x259   :  { %3988 = vmatprep.subr.bf16.mxu1 %v3987_v49  ;;  %v997_v49 = vld [vmem:[#allocation7 + $0x1678] sm:$0xff]  ;;  %v4005_v22 = vpack.c.bf16 %v980_v44, %v972_v42  ;;  %v1042_v29 = vld [vmem:[#allocation7 + $0x17e0] sm:$0xff] }
 0x25a   :  { %v1053_v42 = vld [vmem:[#allocation7 + $0x1838] sm:$0xff]  ;;  %v3765_v44 = vpack.c.bf16 %v1042_v29, %v1034_v28 }
 0x25b   :  { %3734 = vmatpush1.bf16.msra.mxu0 %v3733_v41  ;;  %v988_v41 = vld [vmem:[#allocation7 + $0x1630] sm:$0xff]  ;;  %v1117_v28 = vld [vmem:[#allocation7 + $0x1a38] sm:$0xff] }
 0x25c   :  { %3990 = vmatpush1.bf16.msra.mxu1 %v3989_v45  ;;  %3736 = vmatprep.subr.bf16.mxu0 %v3735_v30  ;;  %v4007_v45 = vpack.c.bf16 %v997_v49, %v989_v48  ;;  %v996_v30 = vld [vmem:[#allocation7 + $0x1670] sm:$0xff]  ;;  %v1050_v48 = vld [vmem:[#allocation7 + $0x1820] sm:$0xff]  ;;  %v1125_v29 = vld [vmem:[#allocation7 + $0x1a78] sm:$0xff] }
 0x25d   :  { %3992 = vmatprep.subr.bf16.mxu1 %v3991_v26  ;;  %v1013_v26 = vld [vmem:[#allocation7 + $0x16f8] sm:$0xff]  ;;  %v4009_v55 = vpack.c.bf16 %v996_v30, %v988_v41  ;;  %v1058_v49 = vld [vmem:[#allocation7 + $0x1860] sm:$0xff] }
 0x25e   :  { %v3769_v41 = vpack.c.bf16 %v1058_v49, %v1050_v48  ;;  %v1077_v30 = vld [vmem:[#allocation7 + $0x18f8] sm:$0xff] }
 0x25f   :  { %3738 = vmatpush1.bf16.msra.mxu0 %v3737_v60  ;;  %v1004_v60 = vld [vmem:[#allocation7 + $0x16b0] sm:$0xff]  ;;  %v1133_v48 = vld [vmem:[#allocation7 + $0x1ab8] sm:$0xff] }
 0x260   :  { %3994 = vmatpush1.bf16.msra.mxu1 %v3993_v40  ;;  %3740 = vmatprep.subr.bf16.mxu0 %v3739_v47  ;;  %v4011_v40 = vpack.c.bf16 %v1013_v26, %v1005_v38  ;;  %v1012_v47 = vld [vmem:[#allocation7 + $0x16f0] sm:$0xff]  ;;  %v1074_v38 = vld [vmem:[#allocation7 + $0x18e0] sm:$0xff]  ;;  %v1141_v49 = vld [vmem:[#allocation7 + $0x1af8] sm:$0xff] }
 0x261   :  { %3996 = vmatprep.subr.bf16.mxu1 %v3995_v0  ;;  %v1029_v0 = vld [vmem:[#allocation7 + $0x1778] sm:$0xff]  ;;  %v4013_v25 = vpack.c.bf16 %v1012_v47, %v1004_v60  ;;  %v1068_v26 = vld [vmem:[#allocation7 + $0x18b0] sm:$0xff]  ;;  %v3773_v47 = vpack.c.bf16 %v1074_v38, %v1066_v53  ;;  %v1155_v53 = vld [vmem:[#allocation7 + $0x1b68] sm:$0xff] }
 0x262   :  { %v1085_v60 = vld [vmem:[#allocation7 + $0x1938] sm:$0xff] }
 0x263   :  { %3742 = vmatpush1.bf16.msra.mxu0 %v3741_v5  ;;  %v1020_v5 = vld [vmem:[#allocation7 + $0x1730] sm:$0xff]  ;;  %v1149_v38 = vld [vmem:[#allocation7 + $0x1b38] sm:$0xff] }
 0x264   :  { %3998 = vmatpush1.bf16.msra.mxu1 %v3997_v6  ;;  %3744 = vmatprep.subr.bf16.mxu0 %v3743_v7  ;;  %v4015_v6 = vpack.c.bf16 %v1029_v0, %v1021_v63  ;;  %v1028_v7 = vld [vmem:[#allocation7 + $0x1770] sm:$0xff]  ;;  %v1082_v63 = vld [vmem:[#allocation7 + $0x1920] sm:$0xff] }
 0x265   :  { %4000 = vmatprep.subr.bf16.mxu1 %v3999_v21  ;;  %v1045_v21 = vld [vmem:[#allocation7 + $0x17f8] sm:$0xff]  ;;  %v4017_v24 = vpack.c.bf16 %v1028_v7, %v1020_v5  ;;  %v1090_v0 = vld [vmem:[#allocation7 + $0x1960] sm:$0xff] }
 0x266   :  { %v1101_v5 = vld [vmem:[#allocation7 + $0x19b8] sm:$0xff] }
 0x267   :  { %3746 = vmatpush1.bf16.msra.mxu0 %v3745_v31  ;;  %v1036_v31 = vld [vmem:[#allocation7 + $0x17b0] sm:$0xff] }
 0x268   :  { %4002 = vmatpush1.bf16.msra.mxu1 %v4001_v19  ;;  %3748 = vmatprep.subr.bf16.mxu0 %v3747_v32  ;;  %v4019_v19 = vpack.c.bf16 %v1045_v21, %v1037_v12  ;;  %v1044_v32 = vld [vmem:[#allocation7 + $0x17f0] sm:$0xff]  ;;  %v1106_v12 = vld [vmem:[#allocation7 + $0x19e0] sm:$0xff] }
 0x269   :  { %4004 = vmatprep.subr.bf16.mxu1 %v4003_v43  ;;  %v1061_v43 = vld [vmem:[#allocation7 + $0x1878] sm:$0xff]  ;;  %v4021_v46 = vpack.c.bf16 %v1044_v32, %v1036_v31  ;;  %v1100_v21 = vld [vmem:[#allocation7 + $0x19b0] sm:$0xff]  ;;  %v3781_v31 = vpack.c.bf16 %v1106_v12, %v1098_v10 }
 0x26a   :  { %v1172_v12 = vld [vmem:[#allocation7 + $0x1bf0] sm:$0xff] }
 0x26b   :  { %3750 = vmatpush1.bf16.msra.mxu0 %v3749_v50  ;;  %v4023_v50 = vpack.c.bf16 %v1061_v43, %v1053_v42  ;;  %v1116_v42 = vld [vmem:[#allocation7 + $0x1a30] sm:$0xff]  ;;  %v4039_v43 = vpack.c.bf16 %v1125_v29, %v1117_v28 }
 0x26c   :  { %4006 = vmatpush1.bf16.msra.mxu1 %v4005_v22  ;;  %3752 = vmatprep.subr.bf16.mxu0 %v3751_v37  ;;  %v1052_v22 = vld [vmem:[#allocation7 + $0x1830] sm:$0xff] }
 0x26d   :  { %4008 = vmatprep.subr.bf16.mxu1 %v4007_v45  ;;  %v1060_v37 = vld [vmem:[#allocation7 + $0x1870] sm:$0xff]  ;;  %v1069_v45 = vld [vmem:[#allocation7 + $0x18b8] sm:$0xff] }
 0x26e   :  { %v4025_v52 = vpack.c.bf16 %v1060_v37, %v1052_v22  ;;  %v4027_v58 = vpack.c.bf16 %v1077_v30, %v1069_v45  ;;  %v4043_v45 = vpack.c.bf16 %v1141_v49, %v1133_v48  ;;  %v1140_v30 = vld [vmem:[#allocation7 + $0x1af0] sm:$0xff] }
 0x26f   :  { %3754 = vmatpush1.bf16.msra.mxu0 %v3753_v54  ;;  %v3771_v54 = vpack.c.bf16 %v1075_v51, %v1067_v59  ;;  %v1130_v59 = vld [vmem:[#allocation7 + $0x1aa0] sm:$0xff] }
 0x270   :  { %4010 = vmatpush1.bf16.msra.mxu1 %v4009_v55  ;;  %3756 = vmatprep.subr.bf16.mxu0 %v3755_v56  ;;  %v1076_v55 = vld [vmem:[#allocation7 + $0x18f0] sm:$0xff]  ;;  %v1083_v56 = vld [vmem:[#allocation7 + $0x1928] sm:$0xff]  ;;  %v1138_v51 = vld [vmem:[#allocation7 + $0x1ae0] sm:$0xff] }
 0x271   :  { %4012 = vmatprep.subr.bf16.mxu1 %v4011_v40  ;;  %v1093_v40 = vld [vmem:[#allocation7 + $0x1978] sm:$0xff]  ;;  %v4029_v61 = vpack.c.bf16 %v1076_v55, %v1068_v26  ;;  %v3775_v62 = vpack.c.bf16 %v1091_v57, %v1083_v56  ;;  %v1146_v57 = vld [vmem:[#allocation7 + $0x1b20] sm:$0xff] }
 0x272   :  { %v1157_v26 = vld [vmem:[#allocation7 + $0x1b78] sm:$0xff] }
 0x273   :  { %3758 = vmatpush1.bf16.msra.mxu0 %v3757_v1  ;;  %v1084_v1 = vld [vmem:[#allocation7 + $0x1930] sm:$0xff] }
 0x274   :  { %4014 = vmatpush1.bf16.msra.mxu1 %v4013_v25  ;;  %3760 = vmatprep.subr.bf16.mxu0 %v3759_v2  ;;  %v4031_v25 = vpack.c.bf16 %v1093_v40, %v1085_v60  ;;  %v1092_v2 = vld [vmem:[#allocation7 + $0x1970] sm:$0xff] }
 0x275   :  { %4016 = vmatprep.subr.bf16.mxu1 %v4015_v6  ;;  %v3777_v6 = vpack.c.bf16 %v1090_v0, %v1082_v63  ;;  %v4033_v7 = vpack.c.bf16 %v1092_v2, %v1084_v1  ;;  %v1148_v60 = vld [vmem:[#allocation7 + $0x1b30] sm:$0xff]  ;;  %v1171_v63 = vld [vmem:[#allocation7 + $0x1be8] sm:$0xff]  ;;  %v1173_v2 = vld [vmem:[#allocation7 + $0x1bf8] sm:$0xff] }
 0x277   :  { %3762 = vmatpush1.bf16.msra.mxu0 %v3761_v23 }
 0x278   :  { %4018 = vmatpush1.bf16.msra.mxu1 %v4017_v24  ;;  %3764 = vmatprep.subr.bf16.mxu0 %v3763_v27  ;;  %v1115_v24 = vld [vmem:[#allocation7 + $0x1a28] sm:$0xff] }
 0x279   :  { %4020 = vmatprep.subr.bf16.mxu1 %v4019_v19  ;;  %v1123_v27 = vld [vmem:[#allocation7 + $0x1a68] sm:$0xff] }
 0x27a   :  { %v3783_v32 = vpack.c.bf16 %v1123_v27, %v1115_v24  ;;  %v1189_v24 = vld [vmem:[#allocation7 + $0x1c78] sm:$0xff] }
 0x27b   :  { %3766 = vmatpush1.bf16.msra.mxu0 %v3765_v44  ;;  %v1124_v44 = vld [vmem:[#allocation7 + $0x1a70] sm:$0xff] }
 0x27c   :  { %4022 = vmatpush1.bf16.msra.mxu1 %v4021_v46  ;;  %3768 = vmatprep.subr.bf16.mxu0 %v3767_v33  ;;  %v1131_v46 = vld [vmem:[#allocation7 + $0x1aa8] sm:$0xff]  ;;  %v4041_v22 = vpack.c.bf16 %v1124_v44, %v1116_v42  ;;  %v1197_v44 = vld [vmem:[#allocation7 + $0x1cb8] sm:$0xff] }
 0x27d   :  { %4024 = vmatprep.subr.bf16.mxu1 %v4023_v50  ;;  %v1139_v33 = vld [vmem:[#allocation7 + $0x1ae8] sm:$0xff]  ;;  %v3785_v50 = vpack.c.bf16 %v1122_v39, %v1114_v36  ;;  %v1188_v39 = vld [vmem:[#allocation7 + $0x1c70] sm:$0xff] }
 0x27e   :  { %2119 = vmatmul.mubr.f32.vlgmr.msra.gmra.mrb[2].mxu0 %v4657_v34  ;;  %v3787_v37 = vpack.c.bf16 %v1139_v33, %v1131_v46  ;;  %v1195_v42 = vld [vmem:[#allocation7 + $0x1ca8] sm:$0xff]  ;;  %v1205_v46 = vld [vmem:[#allocation7 + $0x1cf8] sm:$0xff] }
 0x27f   :  { %2403 = vmatmul.mubr.f32.vlgmr.msra.gmra.mrb[2].mxu1 %v4657_v34  ;;  %3770 = vmatpush1.bf16.msra.mxu0 %v3769_v41  ;;  %v1109_v34 = vld [vmem:[#allocation7 + $0x19f8] sm:$0xff]  ;;  %v1132_v41 = vld [vmem:[#allocation7 + $0x1ab0] sm:$0xff] }
 0x280   :  { %2189 = vmatprep.mubr.f32.mxu0 %v4661_v8  ;;  %4026 = vmatpush1.bf16.msra.mxu1 %v4025_v52  ;;  %v4035_v23 = vpack.c.bf16 %v1109_v34, %v1101_v5  ;;  %v1147_v52 = vld [vmem:[#allocation7 + $0x1b28] sm:$0xff]  ;;  %v4045_v55 = vpack.c.bf16 %v1140_v30, %v1132_v41  ;;  %v1213_v30 = vld [vmem:[#allocation7 + $0x1d38] sm:$0xff] }
 0x281   :  { %2473 = vmatprep.mubr.f32.mxu1 %v4661_v8  ;;  %3772 = vmatprep.subr.bf16.mxu0 %v3771_v54  ;;  %v1108_v8 = vld [vmem:[#allocation7 + $0x19f0] sm:$0xff]  ;;  %v3789_v54 = vpack.c.bf16 %v1138_v51, %v1130_v59  ;;  %v3791_v56 = vpack.c.bf16 %v1155_v53, %v1147_v52  ;;  %v4059_v59 = vpack.c.bf16 %v1205_v46, %v1197_v44  ;;  %v1211_v41 = vld [vmem:[#allocation7 + $0x1d28] sm:$0xff]  ;;  %v1221_v52 = vld [vmem:[#allocation7 + $0x1d78] sm:$0xff] }
 0x282   :  { %4028 = vmatprep.subr.bf16.mxu1 %v4027_v58  ;;  %v4037_v19 = vpack.c.bf16 %v1108_v8, %v1100_v21  ;;  %v1154_v58 = vld [vmem:[#allocation7 + $0x1b60] sm:$0xff]  ;;  %v1179_v21 = vld [vmem:[#allocation7 + $0x1c28] sm:$0xff]  ;;  %v1181_v8 = vld [vmem:[#allocation7 + $0x1c38] sm:$0xff] }
 0x283   :  { %3774 = vmatpush1.bf16.msra.mxu0 %v3773_v47  ;;  %v4047_v47 = vpack.c.bf16 %v1157_v26, %v1149_v38  ;;  %v3793_v4 = vpack.c.bf16 %v1154_v58, %v1146_v57  ;;  %v4055_v36 = vpack.c.bf16 %v1189_v24, %v1181_v8  ;;  %v1204_v51 = vld [vmem:[#allocation7 + $0x1cf0] sm:$0xff]  ;;  %v4063_v57 = vpack.c.bf16 %v1221_v52, %v1213_v30 }
 0x284   :  { %4030 = vmatpush1.bf16.msra.mxu1 %v4029_v61  ;;  %3776 = vmatprep.subr.bf16.mxu0 %v3775_v62  ;;  %v1156_v61 = vld [vmem:[#allocation7 + $0x1b70] sm:$0xff]  ;;  %v1163_v62 = vld [vmem:[#allocation7 + $0x1ba8] sm:$0xff] }
 0x285   :  { %4032 = vmatprep.subr.bf16.mxu1 %v4031_v25  ;;  %v1165_v25 = vld [vmem:[#allocation7 + $0x1bb8] sm:$0xff]  ;;  %v4049_v5 = vpack.c.bf16 %v1156_v61, %v1148_v60  ;;  %v3795_v34 = vpack.c.bf16 %v1171_v63, %v1163_v62  ;;  %v1220_v58 = vld [vmem:[#allocation7 + $0x1d70] sm:$0xff]  ;;  %v1227_v60 = vld [vmem:[#allocation7 + $0x1da8] sm:$0xff] }
 0x286   :  { %v4051_v10 = vpack.c.bf16 %v1173_v2, %v1165_v25  ;;  %v1229_v61 = vld [vmem:[#allocation7 + $0x1db8] sm:$0xff] }
 0x287   :  { %3778 = vmatpush1.bf16.msra.mxu0 %v3777_v6  ;;  %v1162_v6 = vld [vmem:[#allocation7 + $0x1ba0] sm:$0xff]  ;;  %v1237_v62 = vld [vmem:[#allocation7 + $0x1df8] sm:$0xff] }
 0x288   :  { %4034 = vmatpush1.bf16.msra.mxu1 %v4033_v7  ;;  %3780 = vmatprep.subr.bf16.mxu0 %v3779_v9  ;;  %v1170_v7 = vld [vmem:[#allocation7 + $0x1be0] sm:$0xff]  ;;  %v1164_v9 = vld [vmem:[#allocation7 + $0x1bb0] sm:$0xff] }
 0x289   :  { %4036 = vmatprep.subr.bf16.mxu1 %v4035_v23  ;;  %v1187_v23 = vld [vmem:[#allocation7 + $0x1c68] sm:$0xff]  ;;  %v3797_v27 = vpack.c.bf16 %v1170_v7, %v1162_v6  ;;  %v4053_v28 = vpack.c.bf16 %v1172_v12, %v1164_v9  ;;  %v4067_v6 = vpack.c.bf16 %v1237_v62, %v1229_v61  ;;  %v1236_v7 = vld [vmem:[#allocation7 + $0x1df0] sm:$0xff]  ;;  %v1245_v12 = vld [vmem:[#allocation7 + $0x1e38] sm:$0xff] }
 0x28a   :  { %v3799_v29 = vpack.c.bf16 %v1187_v23, %v1179_v21  ;;  %v1243_v9 = vld [vmem:[#allocation7 + $0x1e28] sm:$0xff]  ;;  %v1253_v21 = vld [vmem:[#allocation7 + $0x1e78] sm:$0xff] }
 0x28b   :  { %3782 = vmatpush1.bf16.msra.mxu0 %v3781_v31  ;;  %v1178_v31 = vld [vmem:[#allocation7 + $0x1c20] sm:$0xff] }
 0x28c   :  { %4038 = vmatpush1.bf16.msra.mxu1 %v4037_v19  ;;  %3784 = vmatprep.subr.bf16.mxu0 %v3783_v32  ;;  %v1186_v19 = vld [vmem:[#allocation7 + $0x1c60] sm:$0xff]  ;;  %v1180_v32 = vld [vmem:[#allocation7 + $0x1c30] sm:$0xff] }
 0x28d   :  { %4040 = vmatprep.subr.bf16.mxu1 %v4039_v43  ;;  %v1203_v43 = vld [vmem:[#allocation7 + $0x1ce8] sm:$0xff]  ;;  %v3801_v33 = vpack.c.bf16 %v1186_v19, %v1178_v31  ;;  %v4057_v48 = vpack.c.bf16 %v1188_v39, %v1180_v32  ;;  %v4071_v31 = vpack.c.bf16 %v1253_v21, %v1245_v12  ;;  %v1252_v19 = vld [vmem:[#allocation7 + $0x1e70] sm:$0xff]  ;;  %v1261_v39 = vld [vmem:[#allocation7 + $0x1eb8] sm:$0xff] }
 0x28e   :  { %v3803_v49 = vpack.c.bf16 %v1203_v43, %v1195_v42  ;;  %v1259_v32 = vld [vmem:[#allocation7 + $0x1ea8] sm:$0xff]  ;;  %v1269_v42 = vld [vmem:[#allocation7 + $0x1ef8] sm:$0xff]  ;;  %v2537_v12 = vld [vmem:[#allocation10 + $0x188] sm:$0xff] }
 0x28f   :  { %3786 = vmatpush1.bf16.msra.mxu0 %v3785_v50  ;;  %v1194_v50 = vld [vmem:[#allocation7 + $0x1ca0] sm:$0xff] }
 0x290   :  { %4042 = vmatpush1.bf16.msra.mxu1 %v4041_v22  ;;  %3788 = vmatprep.subr.bf16.mxu0 %v3787_v37  ;;  %v1202_v22 = vld [vmem:[#allocation7 + $0x1ce0] sm:$0xff]  ;;  %v1196_v37 = vld [vmem:[#allocation7 + $0x1cb0] sm:$0xff] }
 0x291   :  { %v4685_v40 = vpop.f32.mrb[0].mxu0  ;;  %4044 = vmatprep.subr.bf16.mxu1 %v4043_v45  ;;  %v1219_v45 = vld [vmem:[#allocation7 + $0x1d68] sm:$0xff]  ;;  %v3805_v53 = vpack.c.bf16 %v1202_v22, %v1194_v50  ;;  %v4061_v38 = vpack.c.bf16 %v1204_v51, %v1196_v37  ;;  %v4075_v50 = vpack.c.bf16 %v1269_v42, %v1261_v39  ;;  %v1268_v22 = vld [vmem:[#allocation7 + $0x1ef0] sm:$0xff]  ;;  %v1277_v51 = vld [vmem:[#allocation7 + $0x1f38] sm:$0xff] }
 0x292   :  { %v4687_v0 = vpop.f32.mrb[0].mxu1  ;;  %v4689_v1 = vpop.f32.mrb[1].mxu0  ;;  %v3807_v26 = vpack.c.bf16 %v1219_v45, %v1211_v41  ;;  %v1275_v37 = vld [vmem:[#allocation7 + $0x1f28] sm:$0xff]  ;;  %v1285_v41 = vld [vmem:[#allocation7 + $0x1f78] sm:$0xff] }
 0x293   :  { %v4691_v3 = vpop.f32.mrb[1].mxu1  ;;  %3790 = vmatpush1.bf16.msra.mxu0 %v3789_v54  ;;  %v1210_v54 = vld [vmem:[#allocation7 + $0x1d20] sm:$0xff]  ;;  %v2538_v42 = vld [vmem:[#allocation10 + $0x190] sm:$0xff] }
 0x294   :  { %4046 = vmatpush1.bf16.msra.mxu1 %v4045_v55  ;;  %3792 = vmatprep.subr.bf16.mxu0 %v3791_v56  ;;  %v1218_v55 = vld [vmem:[#allocation7 + $0x1d60] sm:$0xff]  ;;  %v1212_v56 = vld [vmem:[#allocation7 + $0x1d30] sm:$0xff] }
 0x295   :  { %4048 = vmatprep.subr.bf16.mxu1 %v4047_v47  ;;  %v1235_v47 = vld [vmem:[#allocation7 + $0x1de8] sm:$0xff]  ;;  %v3809_v63 = vpack.c.bf16 %v1218_v55, %v1210_v54  ;;  %v4065_v25 = vpack.c.bf16 %v1220_v58, %v1212_v56  ;;  %v4079_v54 = vpack.c.bf16 %v1285_v41, %v1277_v51  ;;  %v1284_v55 = vld [vmem:[#allocation7 + $0x1f70] sm:$0xff]  ;;  %v1293_v58 = vld [vmem:[#allocation7 + $0x1fb8] sm:$0xff] }
 0x296   :  { %v3811_v2 = vpack.c.bf16 %v1235_v47, %v1227_v60  ;;  %v1291_v56 = vld [vmem:[#allocation7 + $0x1fa8] sm:$0xff]  ;;  %v1301_v60 = vld [vmem:[#allocation7 + $0x1ff8] sm:$0xff]  ;;  %v4693_v47 = vld [vmem:[#allocation8] sm:$0xff] }
 0x297   :  { %3794 = vmatpush1.bf16.msra.mxu0 %v3793_v4  ;;  %v1226_v4 = vld [vmem:[#allocation7 + $0x1da0] sm:$0xff]  ;;  %v1319_v21 = vrot.slane %v4693_v47, %v4577_v20  ;;  %v2541_v51 = vld [vmem:[#allocation10 + $0x1a8] sm:$0xff] }
 0x298   :  { %4050 = vmatpush1.bf16.msra.mxu1 %v4049_v5  ;;  %3796 = vmatprep.subr.bf16.mxu0 %v3795_v34  ;;  %v1234_v5 = vld [vmem:[#allocation7 + $0x1de0] sm:$0xff]  ;;  %v1228_v34 = vld [vmem:[#allocation7 + $0x1db0] sm:$0xff] }
 0x299   :  { %4052 = vmatprep.subr.bf16.mxu1 %v4051_v10  ;;  %v1251_v10 = vld [vmem:[#allocation7 + $0x1e68] sm:$0xff]  ;;  %v3813_v23 = vpack.c.bf16 %v1234_v5, %v1226_v4  ;;  %v4069_v8 = vpack.c.bf16 %v1236_v7, %v1228_v34  ;;  %v1292_v4 = vld [vmem:[#allocation7 + $0x1fb0] sm:$0xff]  ;;  %v4083_v5 = vpack.c.bf16 %v1301_v60, %v1293_v58  ;;  %v4218_v39 = vadd.f32 %v4691_v3, %v1319_v21  ;;  %v2542_v58 = vld [vmem:[#allocation10 + $0x1b0] sm:$0xff] }
 0x29a   :  { %v3815_v24 = vpack.c.bf16 %v1251_v10, %v1243_v9  ;;  %v1300_v34 = vld [vmem:[#allocation7 + $0x1ff0] sm:$0xff]  ;;  %v1311_v9 = vrot.slane %v4693_v47, %v4571_v17  ;;  %v2536_v10 = vld [vmem:[#allocation10 + $0x180] sm:$0xff]  ;;  %v2506_v17 = vld [vmem:[#allocation10 + $0x90] sm:$0xff] }
 0x29b   :  { %3798 = vmatpush1.bf16.msra.mxu0 %v3797_v27  ;;  %v1242_v27 = vld [vmem:[#allocation7 + $0x1e20] sm:$0xff]  ;;  %v2505_v7 = vld [vmem:[#allocation10 + $0x88] sm:$0xff]  ;;  %v2540_v3 = vld [vmem:[#allocation10 + $0x1a0] sm:$0xff]  ;;  %v2483_v41 = vmax.f32 %v4218_v39, 0.0 }
 0x29c   :  { %4054 = vmatpush1.bf16.msra.mxu1 %v4053_v28  ;;  %3800 = vmatprep.subr.bf16.mxu0 %v3799_v29  ;;  %v1250_v28 = vld [vmem:[#allocation7 + $0x1e60] sm:$0xff]  ;;  %v1244_v29 = vld [vmem:[#allocation7 + $0x1e30] sm:$0xff] }
 0x29d   :  { %4056 = vmatprep.subr.bf16.mxu1 %v4055_v36  ;;  %v1267_v36 = vld [vmem:[#allocation7 + $0x1ee8] sm:$0xff]  ;;  %v3817_v43 = vpack.c.bf16 %v1250_v28, %v1242_v27  ;;  %v4073_v44 = vpack.c.bf16 %v1252_v19, %v1244_v29  ;;  %v2489_v28 = vld [vmem:[#allocation10 + $0x8] sm:$0xff]  ;;  %v4119_v29 = vpack.c.bf16 %v2537_v12, %v2536_v10  ;;  %v2543_v60 = vld [vmem:[#allocation10 + $0x1b8] sm:$0xff] }
 0x29e   :  { %v3819_v46 = vpack.c.bf16 %v1267_v36, %v1259_v32  ;;  %v2488_v27 = vld [vmem:[#allocation10] sm:$0xff]  ;;  %v2521_v19 = vld [vmem:[#allocation10 + $0x108] sm:$0xff]  ;;  %v4216_v32 = vadd.f32 %v4689_v1, %v1311_v9  ;;  %v2507_v36 = vld [vmem:[#allocation10 + $0x98] sm:$0xff] }
 0x29f   :  { %3802 = vmatpush1.bf16.msra.mxu0 %v3801_v33  ;;  %v1258_v33 = vld [vmem:[#allocation7 + $0x1ea0] sm:$0xff]  ;;  %v4089_v20 = vpack.c.bf16 %v2489_v28, %v2488_v27  ;;  %v2545_v9 = vld [vmem:[#allocation10 + $0x1c8] sm:$0xff] }
 0x2a0   :  { %4058 = vmatpush1.bf16.msra.mxu1 %v4057_v48  ;;  %3804 = vmatprep.subr.bf16.mxu0 %v3803_v49  ;;  %v1266_v48 = vld [vmem:[#allocation7 + $0x1ee0] sm:$0xff]  ;;  %v1260_v49 = vld [vmem:[#allocation7 + $0x1eb0] sm:$0xff]  ;;  %v2481_v1 = vmax.f32 %v4216_v32, 0.0 }
 0x2a1   :  { %4060 = vmatprep.subr.bf16.mxu1 %v4059_v59  ;;  %v1283_v59 = vld [vmem:[#allocation7 + $0x1f68] sm:$0xff]  ;;  %v3821_v45 = vpack.c.bf16 %v1266_v48, %v1258_v33  ;;  %v4077_v30 = vpack.c.bf16 %v1268_v22, %v1260_v49  ;;  %v2491_v33 = vld [vmem:[#allocation10 + $0x18] sm:$0xff]  ;;  %v2522_v48 = vld [vmem:[#allocation10 + $0x110] sm:$0xff]  ;;  %v4091_v49 = vpack.c.bf16 %v2507_v36, %v2506_v17 }
 0x2a2   :  { %v3823_v52 = vpack.c.bf16 %v1283_v59, %v1275_v37  ;;  %v2508_v22 = vld [vmem:[#allocation10 + $0xa0] sm:$0xff]  ;;  %v2509_v37 = vld [vmem:[#allocation10 + $0xa8] sm:$0xff]  ;;  %v2547_v32 = vld [vmem:[#allocation10 + $0x1d8] sm:$0xff] }
 0x2a3   :  { %3806 = vmatpush1.bf16.msra.mxu0 %v3805_v53  ;;  %v1274_v53 = vld [vmem:[#allocation7 + $0x1f20] sm:$0xff]  ;;  %v2529_v28 = vld [vmem:[#allocation10 + $0x148] sm:$0xff] }
 0x2a4   :  { %4062 = vmatpush1.bf16.msra.mxu1 %v4061_v38  ;;  %3808 = vmatprep.subr.bf16.mxu0 %v3807_v26  ;;  %v1282_v38 = vld [vmem:[#allocation7 + $0x1f60] sm:$0xff]  ;;  %v1276_v26 = vld [vmem:[#allocation7 + $0x1f30] sm:$0xff] }
 0x2a5   :  { %4064 = vmatprep.subr.bf16.mxu1 %v4063_v57  ;;  %v1299_v57 = vld [vmem:[#allocation7 + $0x1fe8] sm:$0xff]  ;;  %v3825_v61 = vpack.c.bf16 %v1282_v38, %v1274_v53  ;;  %v4081_v62 = vpack.c.bf16 %v1284_v55, %v1276_v26  ;;  %v2493_v38 = vld [vmem:[#allocation10 + $0x28] sm:$0xff] }
 0x2a6   :  { %v2492_v53 = vld [vmem:[#allocation10 + $0x20] sm:$0xff]  ;;  %v2525_v55 = vld [vmem:[#allocation10 + $0x128] sm:$0xff] }
 0x2a7   :  { %3810 = vmatpush1.bf16.msra.mxu0 %v3809_v63  ;;  %v3827_v63 = vpack.c.bf16 %v1299_v57, %v1291_v56  ;;  %v2524_v26 = vld [vmem:[#allocation10 + $0x120] sm:$0xff]  ;;  %v2510_v56 = vld [vmem:[#allocation10 + $0xb0] sm:$0xff]  ;;  %v2511_v57 = vld [vmem:[#allocation10 + $0xb8] sm:$0xff] }
 0x2a8   :  { %4066 = vmatpush1.bf16.msra.mxu1 %v4065_v25  ;;  %3812 = vmatprep.subr.bf16.mxu0 %v3811_v2  ;;  %v1290_v25 = vld [vmem:[#allocation7 + $0x1fa0] sm:$0xff] }
 0x2a9   :  { %4068 = vmatprep.subr.bf16.mxu1 %v4067_v6  ;;  %v1298_v2 = vld [vmem:[#allocation7 + $0x1fe0] sm:$0xff]  ;;  %v2504_v6 = vld [vmem:[#allocation10 + $0x80] sm:$0xff] }
 0x2ab   :  { %3814 = vmatpush1.bf16.msra.mxu0 %v3813_v23  ;;  %v3829_v23 = vpack.c.bf16 %v1298_v2, %v1290_v25  ;;  %v2495_v25 = vld [vmem:[#allocation10 + $0x38] sm:$0xff]  ;;  %v2526_v2 = vld [vmem:[#allocation10 + $0x130] sm:$0xff] }
 0x2ac   :  { %4070 = vmatpush1.bf16.msra.mxu1 %v4069_v8  ;;  %3816 = vmatprep.subr.bf16.mxu0 %v3815_v24  ;;  %v4085_v8 = vpack.c.bf16 %v1300_v34, %v1292_v4  ;;  %v4087_v24 = vpack.c.bf16 %v2505_v7, %v2504_v6  ;;  %v4131_v4 = vpack.c.bf16 %v2543_v60, %v2542_v58  ;;  %v2512_v34 = vld [vmem:[#allocation10 + $0xc0] sm:$0xff]  ;;  %v2513_v6 = vld [vmem:[#allocation10 + $0xc8] sm:$0xff]  ;;  %v2503_v58 = vld [vmem:[#allocation10 + $0x78] sm:$0xff] }
 0x2ad   :  { %4072 = vmatprep.subr.bf16.mxu1 %v4071_v31  ;;  %v2520_v31 = vld [vmem:[#allocation10 + $0x100] sm:$0xff]  ;;  %v4103_v21 = vpack.c.bf16 %v2513_v6, %v2512_v34  ;;  %v2534_v60 = vld [vmem:[#allocation10 + $0x170] sm:$0xff] }
 0x2ae   :  { %v2544_v7 = vld [vmem:[#allocation10 + $0x1c0] sm:$0xff] }
 0x2af   :  { %3818 = vmatpush1.bf16.msra.mxu0 %v3817_v43  ;;  %v2539_v43 = vld [vmem:[#allocation10 + $0x198] sm:$0xff]  ;;  %v4135_v27 = vpack.c.bf16 %v2545_v9, %v2544_v7  ;;  %v2552_v7 = vld [vmem:[#allocation10 + $0x200] sm:$0xff]  ;;  %v2553_v9 = vld [vmem:[#allocation10 + $0x208] sm:$0xff] }
 0x2b0   :  { %4074 = vmatpush1.bf16.msra.mxu1 %v4073_v44  ;;  %3820 = vmatprep.subr.bf16.mxu0 %v3819_v46  ;;  %v4121_v44 = vpack.c.bf16 %v2521_v19, %v2520_v31  ;;  %v2490_v46 = vld [vmem:[#allocation10 + $0x10] sm:$0xff]  ;;  %v4123_v59 = vpack.c.bf16 %v2539_v43, %v2538_v42  ;;  %v2515_v31 = vld [vmem:[#allocation10 + $0xd8] sm:$0xff] }
 0x2b1   :  { %4076 = vmatprep.subr.bf16.mxu1 %v4075_v50  ;;  %v2523_v50 = vld [vmem:[#allocation10 + $0x118] sm:$0xff]  ;;  %v2546_v19 = vld [vmem:[#allocation10 + $0x1d0] sm:$0xff] }
 0x2b2   :  { %v2499_v42 = vld [vmem:[#allocation10 + $0x58] sm:$0xff]  ;;  %v2530_v43 = vld [vmem:[#allocation10 + $0x150] sm:$0xff] }
 0x2b3   :  { %3822 = vmatpush1.bf16.msra.mxu0 %v3821_v45  ;;  %v4093_v45 = vpack.c.bf16 %v2491_v33, %v2490_v46  ;;  %v2531_v46 = vld [vmem:[#allocation10 + $0x158] sm:$0xff]  ;;  %v2516_v33 = vld [vmem:[#allocation10 + $0xe0] sm:$0xff] }
 0x2b4   :  { %4078 = vmatpush1.bf16.msra.mxu1 %v4077_v30  ;;  %3824 = vmatprep.subr.bf16.mxu0 %v3823_v52  ;;  %v4125_v30 = vpack.c.bf16 %v2523_v50, %v2522_v48  ;;  %v4095_v52 = vpack.c.bf16 %v2509_v37, %v2508_v22  ;;  %v2517_v48 = vld [vmem:[#allocation10 + $0xe8] sm:$0xff]  ;;  %v4141_v37 = vpack.c.bf16 %v2531_v46, %v2530_v43  ;;  %v2604_v43 = vld [vmem:[#allocation10 + $0x3a0] sm:$0xff] }
 0x2b5   :  { %4080 = vmatprep.subr.bf16.mxu1 %v4079_v54  ;;  %v4127_v54 = vpack.c.bf16 %v2541_v51, %v2540_v3  ;;  %v2549_v50 = vld [vmem:[#allocation10 + $0x1e8] sm:$0xff]  ;;  %v2532_v51 = vld [vmem:[#allocation10 + $0x160] sm:$0xff] }
 0x2b6   :  { %v2501_v3 = vld [vmem:[#allocation10 + $0x68] sm:$0xff] }
 0x2b7   :  { %3826 = vmatpush1.bf16.msra.mxu0 %v3825_v61  ;;  %v4129_v61 = vpack.c.bf16 %v2525_v55, %v2524_v26 }
 0x2b8   :  { %4082 = vmatpush1.bf16.msra.mxu1 %v4081_v62  ;;  %3828 = vmatprep.subr.bf16.mxu0 %v3827_v63  ;;  %v4099_v62 = vpack.c.bf16 %v2511_v57, %v2510_v56  ;;  %v2494_v63 = vld [vmem:[#allocation10 + $0x30] sm:$0xff] }
 0x2b9   :  { %4084 = vmatprep.subr.bf16.mxu1 %v4083_v5  ;;  %v2527_v5 = vld [vmem:[#allocation10 + $0x138] sm:$0xff]  ;;  %v4101_v10 = vpack.c.bf16 %v2495_v25, %v2494_v63  ;;  %v2502_v57 = vld [vmem:[#allocation10 + $0x70] sm:$0xff]  ;;  %v2568_v63 = vld [vmem:[#allocation10 + $0x280] sm:$0xff] }
 0x2ba   :  { %v4133_v12 = vpack.c.bf16 %v2527_v5, %v2526_v2  ;;  %v2569_v25 = vld [vmem:[#allocation10 + $0x288] sm:$0xff]  ;;  %v2600_v2 = vld [vmem:[#allocation10 + $0x380] sm:$0xff]  ;;  %v4117_v5 = vpack.c.bf16 %v2503_v58, %v2502_v57 }
 0x2bb   :  { %3830 = vmatpush1.bf16.msra.mxu0 %v3829_v23  ;;  %v2496_v23 = vld [vmem:[#allocation10 + $0x40] sm:$0xff]  ;;  %v4151_v6 = vpack.c.bf16 %v2569_v25, %v2568_v63  ;;  %v2577_v57 = vld [vmem:[#allocation10 + $0x2c8] sm:$0xff] }
 0x2bc   :  { %4086 = vmatpush1.bf16.msra.mxu1 %v4085_v8  ;;  %4088 = vmatprep.subr.bf16.mxu0 %v4087_v24  ;;  %v2497_v8 = vld [vmem:[#allocation10 + $0x48] sm:$0xff]  ;;  %v2528_v24 = vld [vmem:[#allocation10 + $0x140] sm:$0xff] }
 0x2bd   :  { %4120 = vmatprep.subr.bf16.mxu1 %v4119_v29  ;;  %v2514_v29 = vld [vmem:[#allocation10 + $0xd0] sm:$0xff]  ;;  %v4105_v17 = vpack.c.bf16 %v2497_v8, %v2496_v23  ;;  %v4137_v36 = vpack.c.bf16 %v2529_v28, %v2528_v24  ;;  %v2571_v8 = vld [vmem:[#allocation10 + $0x298] sm:$0xff]  ;;  %v4153_v28 = vpack.c.bf16 %v2553_v9, %v2552_v7  ;;  %v2608_v58 = vld [vmem:[#allocation10 + $0x3c0] sm:$0xff] }
 0x2be   :  { %2190 = vmatmul.mubr.f32.vlgmr.msra.gmra.mrb[2].mxu0 %v4667_v35  ;;  %v4107_v39 = vpack.c.bf16 %v2515_v31, %v2514_v29  ;;  %v2570_v23 = vld [vmem:[#allocation10 + $0x290] sm:$0xff]  ;;  %v2560_v63 = vld [vmem:[#allocation10 + $0x240] sm:$0xff]  ;;  %v2561_v25 = vld [vmem:[#allocation10 + $0x248] sm:$0xff] }
 0x2bf   :  { %2474 = vmatmul.mubr.f32.vlgmr.msra.gmra.mrb[2].mxu1 %v4667_v35  ;;  %4090 = vmatpush3.bf16.msra.mxu0 %v4089_v20  ;;  %v4097_v35 = vpack.c.bf16 %v2493_v38, %v2492_v53  ;;  %v2498_v20 = vld [vmem:[#allocation10 + $0x50] sm:$0xff]  ;;  %v2551_v38 = vld [vmem:[#allocation10 + $0x1f8] sm:$0xff]  ;;  %v4155_v31 = vpack.c.bf16 %v2571_v8, %v2570_v23  ;;  %v4169_v9 = vpack.c.bf16 %v2561_v25, %v2560_v63 }
 0x2c0   :  { %2687 = vmatprep.mubr.f32.mxu0 %v2481_v1  ;;  %4122 = vmatpush3.bf16.msra.mxu1 %v4121_v44  ;;  %v4139_v44 = vpack.c.bf16 %v2547_v32, %v2546_v19  ;;  %v4109_v22 = vpack.c.bf16 %v2499_v42, %v2498_v20  ;;  %v4111_v1 = vpack.c.bf16 %v2517_v48, %v2516_v33  ;;  %v2550_v53 = vld [vmem:[#allocation10 + $0x1f0] sm:$0xff]  ;;  %v2555_v32 = vld [vmem:[#allocation10 + $0x218] sm:$0xff]  ;;  %v2572_v20 = vld [vmem:[#allocation10 + $0x2a0] sm:$0xff] }
 0x2c1   :  { %2757 = vmatprep.mubr.f32.mxu1 %v2483_v41  ;;  %4092 = vmatprep.subr.bf16.mxu0 %v4091_v49  ;;  %v2548_v49 = vld [vmem:[#allocation10 + $0x1e0] sm:$0xff]  ;;  %v2602_v24 = vld [vmem:[#allocation10 + $0x390] sm:$0xff]  ;;  %v2573_v42 = vld [vmem:[#allocation10 + $0x2a8] sm:$0xff] }
 0x2c2   :  { %4124 = vmatprep.subr.bf16.mxu1 %v4123_v59  ;;  %v2500_v59 = vld [vmem:[#allocation10 + $0x60] sm:$0xff]  ;;  %v4143_v41 = vpack.c.bf16 %v2549_v50, %v2548_v49  ;;  %v2554_v19 = vld [vmem:[#allocation10 + $0x210] sm:$0xff]  ;;  %v4159_v48 = vpack.c.bf16 %v2573_v42, %v2572_v20  ;;  %v2557_v50 = vld [vmem:[#allocation10 + $0x228] sm:$0xff] }
 0x2c3   :  { %4094 = vmatpush3.bf16.msra.mxu0 %v4093_v45  ;;  %v2533_v45 = vld [vmem:[#allocation10 + $0x168] sm:$0xff]  ;;  %v4113_v26 = vpack.c.bf16 %v2501_v3, %v2500_v59  ;;  %v4157_v46 = vpack.c.bf16 %v2555_v32, %v2554_v19  ;;  %v2556_v49 = vld [vmem:[#allocation10 + $0x220] sm:$0xff]  ;;  %v2574_v59 = vld [vmem:[#allocation10 + $0x2b0] sm:$0xff] }
 0x2c4   :  { %4126 = vmatpush3.bf16.msra.mxu1 %v4125_v30  ;;  %4096 = vmatprep.subr.bf16.mxu0 %v4095_v52  ;;  %v2518_v30 = vld [vmem:[#allocation10 + $0xf0] sm:$0xff]  ;;  %v2519_v52 = vld [vmem:[#allocation10 + $0xf8] sm:$0xff]  ;;  %v4145_v55 = vpack.c.bf16 %v2533_v45, %v2532_v51  ;;  %v4161_v45 = vpack.c.bf16 %v2557_v50, %v2556_v49  ;;  %v2597_v42 = vld [vmem:[#allocation10 + $0x368] sm:$0xff] }
 0x2c5   :  { %4128 = vmatprep.subr.bf16.mxu1 %v4127_v54  ;;  %v1307_v54 = vrot.slane %v4693_v47, %v4573_v18  ;;  %v4115_v56 = vpack.c.bf16 %v2519_v52, %v2518_v30  ;;  %v2575_v3 = vld [vmem:[#allocation10 + $0x2b8] sm:$0xff]  ;;  %v2606_v51 = vld [vmem:[#allocation10 + $0x3b0] sm:$0xff] }
 0x2c6   :  { %v4163_v52 = vpack.c.bf16 %v2575_v3, %v2574_v59  ;;  %v2611_v7 = vld [vmem:[#allocation10 + $0x3d8] sm:$0xff]  ;;  %v2594_v23 = vld [vmem:[#allocation10 + $0x350] sm:$0xff] }
 0x2c7   :  { %4098 = vmatpush3.bf16.msra.mxu0 %v4097_v35  ;;  %v1315_v35 = vrot.slane %v4693_v47, %v4561_v11  ;;  %v4215_v18 = vadd.f32 %v4685_v40, %v1307_v54  ;;  %v2615_v49 = vld [vmem:[#allocation10 + $0x3f8] sm:$0xff]  ;;  %v2566_v50 = vld [vmem:[#allocation10 + $0x270] sm:$0xff] }
 0x2c8   :  { %4130 = vmatpush3.bf16.msra.mxu1 %v4129_v61  ;;  %4100 = vmatprep.subr.bf16.mxu0 %v4099_v62  ;;  %v4147_v61 = vpack.c.bf16 %v2551_v38, %v2550_v53  ;;  %v2535_v62 = vld [vmem:[#allocation10 + $0x178] sm:$0xff]  ;;  %v2558_v53 = vld [vmem:[#allocation10 + $0x230] sm:$0xff] }
 0x2c9   :  { %4132 = vmatprep.subr.bf16.mxu1 %v4131_v4  ;;  %v2601_v4 = vld [vmem:[#allocation10 + $0x388] sm:$0xff]  ;;  %v4149_v34 = vpack.c.bf16 %v2535_v62, %v2534_v60  ;;  %v4217_v11 = vadd.f32 %v4687_v0, %v1315_v35  ;;  %v2480_v29 = vmax.f32 %v4215_v18, 0.0  ;;  %v2559_v38 = vld [vmem:[#allocation10 + $0x238] sm:$0xff]  ;;  %v2578_v18 = vld [vmem:[#allocation10 + $0x2d0] sm:$0xff] }
 0x2ca   :  { %v2609_v60 = vld [vmem:[#allocation10 + $0x3c8] sm:$0xff]  ;;  %v4165_v35 = vpack.c.bf16 %v2559_v38, %v2558_v53  ;;  %v2599_v59 = vld [vmem:[#allocation10 + $0x378] sm:$0xff] }
 0x2cb   :  { %4102 = vmatpush3.bf16.msra.mxu0 %v4101_v10  ;;  %v2584_v10 = vld [vmem:[#allocation10 + $0x300] sm:$0xff] }
 0x2cc   :  { %4134 = vmatpush3.bf16.msra.mxu1 %v4133_v12  ;;  %4104 = vmatprep.subr.bf16.mxu0 %v4103_v21  ;;  %v4183_v12 = vpack.c.bf16 %v2601_v4, %v2600_v2  ;;  %v2585_v21 = vld [vmem:[#allocation10 + $0x308] sm:$0xff]  ;;  %v2592_v2 = vld [vmem:[#allocation10 + $0x340] sm:$0xff]  ;;  %v4199_v4 = vpack.c.bf16 %v2609_v60, %v2608_v58 }
 0x2cd   :  { %4136 = vmatprep.subr.bf16.mxu1 %v4135_v27  ;;  %v2603_v27 = vld [vmem:[#allocation10 + $0x398] sm:$0xff]  ;;  %v4185_v40 = vpack.c.bf16 %v2585_v21, %v2584_v10 }
 0x2ce   :  { %v4187_v0 = vpack.c.bf16 %v2603_v27, %v2602_v24  ;;  %v2563_v21 = vld [vmem:[#allocation10 + $0x258] sm:$0xff]  ;;  %v2580_v27 = vld [vmem:[#allocation10 + $0x2e0] sm:$0xff] }
 0x2cf   :  { %4106 = vmatpush3.bf16.msra.mxu0 %v4105_v17  ;;  %v2586_v17 = vld [vmem:[#allocation10 + $0x310] sm:$0xff]  ;;  %v2595_v24 = vld [vmem:[#allocation10 + $0x358] sm:$0xff] }
 0x2d0   :  { %4138 = vmatpush3.bf16.msra.mxu1 %v4137_v36  ;;  %4108 = vmatprep.subr.bf16.mxu0 %v4107_v39  ;;  %v2482_v36 = vmax.f32 %v4217_v11, 0.0  ;;  %v2587_v39 = vld [vmem:[#allocation10 + $0x318] sm:$0xff]  ;;  %v4205_v19 = vpack.c.bf16 %v2595_v24, %v2594_v23 }
 0x2d1   :  { %4140 = vmatprep.subr.bf16.mxu1 %v4139_v44  ;;  %v2605_v44 = vld [vmem:[#allocation10 + $0x3a8] sm:$0xff]  ;;  %v4189_v33 = vpack.c.bf16 %v2587_v39, %v2586_v17  ;;  %v2596_v39 = vld [vmem:[#allocation10 + $0x360] sm:$0xff] }
 0x2d3   :  { %4110 = vmatpush3.bf16.msra.mxu0 %v4109_v22  ;;  %v2588_v22 = vld [vmem:[#allocation10 + $0x320] sm:$0xff] }
 0x2d4   :  { %4142 = vmatpush3.bf16.msra.mxu1 %v4141_v37  ;;  %4112 = vmatprep.subr.bf16.mxu0 %v4111_v1  ;;  %v4191_v37 = vpack.c.bf16 %v2605_v44, %v2604_v43  ;;  %v2589_v1 = vld [vmem:[#allocation10 + $0x328] sm:$0xff]  ;;  %v2582_v43 = vld [vmem:[#allocation10 + $0x2f0] sm:$0xff]  ;;  %v2583_v44 = vld [vmem:[#allocation10 + $0x2f8] sm:$0xff] }
 0x2d5   :  { %4144 = vmatprep.subr.bf16.mxu1 %v4143_v41  ;;  %v2607_v41 = vld [vmem:[#allocation10 + $0x3b8] sm:$0xff]  ;;  %v4193_v30 = vpack.c.bf16 %v2589_v1, %v2588_v22  ;;  %v2598_v1 = vld [vmem:[#allocation10 + $0x370] sm:$0xff] }
 0x2d6   :  { %v4195_v54 = vpack.c.bf16 %v2607_v41, %v2606_v51  ;;  %v4213_v51 = vpack.c.bf16 %v2599_v59, %v2598_v1  ;;  %v1323_v41 = vrot.slane %v4693_v47, %v4565_v14 }
 0x2d7   :  { %4114 = vmatpush3.bf16.msra.mxu0 %v4113_v26  ;;  %v2590_v26 = vld [vmem:[#allocation10 + $0x330] sm:$0xff] }
 0x2d8   :  { %4146 = vmatpush3.bf16.msra.mxu1 %v4145_v55  ;;  %4116 = vmatprep.subr.bf16.mxu0 %v4115_v56  ;;  %v2591_v55 = vld [vmem:[#allocation10 + $0x338] sm:$0xff]  ;;  %v2576_v56 = vld [vmem:[#allocation10 + $0x2c0] sm:$0xff] }
 0x2d9   :  { %4148 = vmatprep.subr.bf16.mxu1 %v4147_v61  ;;  %v4197_v61 = vpack.c.bf16 %v2591_v55, %v2590_v26  ;;  %v4167_v62 = vpack.c.bf16 %v2577_v57, %v2576_v56 }
 0x2db   :  { %4118 = vmatpush3.bf16.msra.mxu0 %v4117_v5  ;;  %v2593_v5 = vld [vmem:[#allocation10 + $0x348] sm:$0xff] }
 0x2dc   :  { %4150 = vmatpush3.bf16.msra.mxu1 %v4149_v34  ;;  %4152 = vmatprep.subr.bf16.mxu0 %v4151_v6  ;;  %v2579_v34 = vld [vmem:[#allocation10 + $0x2d8] sm:$0xff]  ;;  %v2610_v6 = vld [vmem:[#allocation10 + $0x3d0] sm:$0xff]  ;;  %v4201_v10 = vpack.c.bf16 %v2593_v5, %v2592_v2 }
 0x2dd   :  { %4184 = vmatprep.subr.bf16.mxu1 %v4183_v12  ;;  %v4171_v11 = vpack.c.bf16 %v2579_v34, %v2578_v18  ;;  %v2562_v12 = vld [vmem:[#allocation10 + $0x250] sm:$0xff]  ;;  %v4203_v8 = vpack.c.bf16 %v2611_v7, %v2610_v6 }
 0x2de   :  { %2688 = vmatmul.mubr.f32.vlgmr.msra.gmra.mrb[4].mxu0 %v2480_v29  ;;  %v2612_v29 = vld [vmem:[#allocation10 + $0x3e0] sm:$0xff] }
 0x2df   :  { %2758 = vmatmul.mubr.f32.vlgmr.msra.gmra.mrb[4].mxu1 %v2482_v36  ;;  %4154 = vmatpush3.bf16.msra.mxu0 %v4153_v28  ;;  %v2581_v28 = vld [vmem:[#allocation10 + $0x2e8] sm:$0xff]  ;;  %v2564_v36 = vld [vmem:[#allocation10 + $0x260] sm:$0xff] }
 0x2e0   :  { %4186 = vmatpush3.bf16.msra.mxu1 %v4185_v40  ;;  %4156 = vmatprep.subr.bf16.mxu0 %v4155_v31  ;;  %v2613_v40 = vld [vmem:[#allocation10 + $0x3e8] sm:$0xff]  ;;  %v4173_v31 = vpack.c.bf16 %v2563_v21, %v2562_v12  ;;  %v4175_v32 = vpack.c.bf16 %v2581_v28, %v2580_v27 }
 0x2e1   :  { %4188 = vmatprep.subr.bf16.mxu1 %v4187_v0  ;;  %v4207_v17 = vpack.c.bf16 %v2613_v40, %v2612_v29  ;;  %v2565_v0 = vld [vmem:[#allocation10 + $0x268] sm:$0xff] }
 0x2e2   :  { %v4177_v20 = vpack.c.bf16 %v2565_v0, %v2564_v36 }
 0x2e3   :  { %4158 = vmatpush3.bf16.msra.mxu0 %v4157_v46  ;;  %v4209_v46 = vpack.c.bf16 %v2597_v42, %v2596_v39 }
 0x2e4   :  { %4190 = vmatpush3.bf16.msra.mxu1 %v4189_v33  ;;  %4160 = vmatprep.subr.bf16.mxu0 %v4159_v48  ;;  %v4179_v33 = vpack.c.bf16 %v2583_v44, %v2582_v43  ;;  %v2614_v48 = vld [vmem:[#allocation10 + $0x3f0] sm:$0xff] }
 0x2e5   :  { %4192 = vmatprep.subr.bf16.mxu1 %v4191_v37  ;;  %v4211_v22 = vpack.c.bf16 %v2615_v49, %v2614_v48  ;;  %v2567_v37 = vld [vmem:[#allocation10 + $0x278] sm:$0xff] }
 0x2e6   :  { %v4181_v3 = vpack.c.bf16 %v2567_v37, %v2566_v50 }
 0x2e7   :  { %4162 = vmatpush3.bf16.msra.mxu0 %v4161_v45  ;;  %v1331_v45 = vrot.slane %v4693_v47, %v4569_v16 }
 0x2e8   :  { %4194 = vmatpush3.bf16.msra.mxu1 %v4193_v30  ;;  %4164 = vmatprep.subr.bf16.mxu0 %v4163_v52  ;;  %v1327_v30 = vrot.slane %v4693_v47, %v4563_v13  ;;  %v1335_v52 = vrot.slane %v4693_v47, %v4567_v15 }
 0x2e9   :  { %4196 = vmatprep.subr.bf16.mxu1 %v4195_v54 }
 0x2eb   :  { %4166 = vmatpush3.bf16.msra.mxu0 %v4165_v35 }
 0x2ec   :  { %4198 = vmatpush3.bf16.msra.mxu1 %v4197_v61  ;;  %4168 = vmatprep.subr.bf16.mxu0 %v4167_v62  ;;  %v2922_v62 = vld [vmem:[#allocation11] ss:$0 sm:$0xff] }
 0x2ed   :  { %4200 = vmatprep.subr.bf16.mxu1 %v4199_v4 }
 0x2ef   :  { %4170 = vmatpush3.bf16.msra.mxu0 %v4169_v9 }
 0x2f0   :  { %4202 = vmatpush3.bf16.msra.mxu1 %v4201_v10  ;;  %4172 = vmatprep.subr.bf16.mxu0 %v4171_v11 }
 0x2f1   :  { %4204 = vmatprep.subr.bf16.mxu1 %v4203_v8 }
 0x2f3   :  { %4174 = vmatpush3.bf16.msra.mxu0 %v4173_v31 }
 0x2f4   :  { %4206 = vmatpush3.bf16.msra.mxu1 %v4205_v19  ;;  %4176 = vmatprep.subr.bf16.mxu0 %v4175_v32 }
 0x2f5   :  { %4208 = vmatprep.subr.bf16.mxu1 %v4207_v17 }
 0x2f7   :  { %4178 = vmatpush3.bf16.msra.mxu0 %v4177_v20 }
 0x2f8   :  { %4210 = vmatpush3.bf16.msra.mxu1 %v4209_v46  ;;  %4180 = vmatprep.subr.bf16.mxu0 %v4179_v33 }
 0x2f9   :  { %4212 = vmatprep.subr.bf16.mxu1 %v4211_v22 }
 0x2fb   :  { %4182 = vmatpush3.bf16.msra.mxu0 %v4181_v3 }
 0x2fc   :  { %4214 = vmatpush3.bf16.msra.mxu1 %v4213_v51 }
 0x391   :  { %v2191_v53 = vpop.f32.mrb[2].mxu0 }
 0x392   :  { %v4219_v38 = vadd.f32 %v2191_v53, %v1323_v41  ;;  %v2475_v26 = vpop.f32.mrb[2].mxu1  ;;  %v2193_v54 = vpop.f32.mrb[3].mxu0 }
 0x393   :  { %v4221_v55 = vadd.f32 %v2475_v26, %v1331_v45  ;;  %v4220_v56 = vadd.f32 %v2193_v54, %v1327_v30  ;;  %v2477_v57 = vpop.f32.mrb[3].mxu1 }
 0x394   :  { %v4222_v58 = vadd.f32 %v2477_v57, %v1335_v52  ;;  %v2484_v35 = vmax.f32 %v4219_v38, 0.0 }
 0x395   :  { %v2485_v60 = vmax.f32 %v4220_v56, 0.0  ;;  %v2486_v61 = vmax.f32 %v4221_v55, 0.0 }
 0x396   :  { %v2487_v14 = vmax.f32 %v4222_v58, 0.0 }
 0x397   :  { %2827 = vmatprep.mubr.f32.mxu0 %v2485_v60 }
 0x398   :  { %2897 = vmatprep.mubr.f32.mxu1 %v2487_v14  ;;  %2828 = vmatmul.mubr.f32.vlgmr.msra.gmra.mrb[6].mxu0 %v2484_v35 }
 0x399   :  { %2898 = vmatmul.mubr.f32.vlgmr.msra.gmra.mrb[6].mxu1 %v2486_v61 }
 0x3b1   :  { %v2955_v13 = vpop.f32.mrb[4].mxu0 }
 0x3b2   :  { %v2990_v16 = vpop.f32.mrb[4].mxu1  ;;  %v2956_v15 = vpop.f32.mrb[5].mxu0 }
 0x3b3   :  { %v2957_v47 = vadd.f32 %v2956_v15, %v2955_v13  ;;  %v2991_v63 = vpop.f32.mrb[5].mxu1 }
 0x3b4   :  { %v2992_v25 = vadd.f32 %v2991_v63, %v2990_v16 }
 0x3b5   :  { %v2690_v2 = vadd.f32 %v2957_v47, %v2922_v62 }
 0x3b7   :  { %v2760_v4 = vadd.f32 %v2992_v25, %v2690_v2 }
 0x46b   :  { %v3025_v5 = vpop.f32.mrb[6].mxu0 }
 0x46c   :  { %v3060_v18 = vpop.f32.mrb[6].mxu1  ;;  %v3026_v34 = vpop.f32.mrb[7].mxu0 }
 0x46d   :  { %v3027_v6 = vadd.f32 %v3026_v34, %v3025_v5  ;;  %v3061_v7 = vpop.f32.mrb[7].mxu1 }
 0x46e   :  { %v3062_v9 = vadd.f32 %v3061_v7, %v3060_v18 }
 0x46f   :  { %v2830_v10 = vadd.f32 %v3027_v6, %v2760_v4 }
 0x471   :  { %v2900_v11 = vadd.f32 %v3062_v9, %v2830_v10 }
 0x473   :  { %2903 = vst [vmem:[#allocation13] sm:$0xff] %v2900_v11 }
 0x474   :  { %4405 = shalt.err (!%p4402_p10)
}
 0x475   :  { %s4406_s30 = scalar_lea.hbm %s4736_s7, 128 }
 0x476   :  { %p4407_p11 = scmp.ne.s32.totalorder %s4736_s7, %s4406_s30  ;;  %p4410_p12 = scmp.lt.u32.totalorder %s4406_s30, %s4736_s7 }
 0x478   :  { %p4412_p13 = pnand %p4410_p12, %p4407_p11 }
 0x47a   :  { %4415 = shalt.err (!%p4412_p13)
}
 0x47b   :  { %2913 = dma.vmem_to_hbm [thread:$0]  %s2911_s6, 128, %s4736_s7, [#allocation4]  }
 0x47c   :  { %4424 = dma.done.wait [#allocation4], 128  }
 0x47d   :  { %4425 = vsyncadd [#allocation4], 4294967168 }
 0x47e   :  { %2917 = vsyncpa [#allocation3], 1 }
 0x47f   :  { %2918 = vsyncpa [#allocation6], 1 }
 0x480   :  { %2919 = vsyncpa [#allocation9], 1 }
 0x481   :  { %2920 = vsyncpa [#allocation12], 1 }
 0x482   :  { %2921 = vsyncpa [#allocation4], 1 }

</bundles_post_ra>
